<compile_context>
chip_gen: v5e
topology: v5e:2x2
jax: 0.10.0
libtpu: 0.0.40
codegen_flags: <defaults>
</compile_context>

<pallas_src>
import jax
import jax.numpy as jnp
from jax.experimental import pallas as pl
from jax.experimental.pallas import tpu as pltpu

EPS = 1e-5
LANES = 128
_MIB = 1024 * 1024


def _round_up(x, m):
    return (x + m - 1) // m * m


def _divisors(n):
    out = set()
    i = 1
    while i * i <= n:
        if n % i == 0:
            out.add(i)
            out.add(n // i)
        i += 1
    return sorted(out)


def _vmem_limit_bytes():
    """Scoped-VMEM limit: ~3/4 of physical capacity, clamped to [32, 96] MiB.
    (v7x: 64 MiB/TC -> 48 MiB; v5e/v6e: 128 MiB -> 96 MiB; unknown -> 48 MiB.)"""
    cap = 64 * _MIB
    try:
        cap = int(getattr(pltpu.get_tpu_info(), "vmem_capacity_bytes", cap)) or cap
    except Exception:
        pass
    return max(32 * _MIB, min(3 * cap // 4, 96 * _MIB))


def _pick_oh_tile(oh, ow, cin, cout_p, hp, wp, kk, n_batch, x_isz, y_isz, budget):
    """Largest OH-divisor tile whose *full* pass-1 VMEM footprint (resident padded image +
    weights + double-buffered y tile + f32 accumulator + packed patch slab) fits budget."""
    resident = hp * wp * cin * x_isz + kk * cin * cout_p * x_isz  # Buffered(1) residents

    def fits(cand):
        rows = cand * ow
        need = resident
        need += 2 * cand * ow * cout_p * y_isz   # y tile, double-buffered
        need += rows * cout_p * 4                # f32 accumulator scratch
        need += rows * kk * cin * x_isz          # packed patch slab
        need += 2 * 2 * cout_p * 4               # stats tile, double-buffered
        return need <= budget

    divs = _divisors(oh)
    best = 1
    for d in divs:
        if fits(d) and d > best:
            best = d
    # v7x has 2 TensorCores: keep the all-'parallel' grid at >= 2 steps when possible.
    if n_batch * (oh // best) < 2:
        smaller = [d for d in divs if d < oh and fits(d)]
        if smaller:
            best = max(smaller)
    return best


def _pick_rows_tile(m, bytes_per_row, budget):
    """Largest divisor of m that is a multiple of 8 and keeps the (double-buffered) pass-2
    tile under budget; falls back to one full-extent block (always layout-legal)."""
    max_rows = budget // max(bytes_per_row, 1)
    best = None
    for d in _divisors(m):
        if d % 8 == 0 and d <= max_rows and (best is None or d > best):
            best = d
    return best if best is not None else m


def _spec(block_shape, index_map, *, single_buffer=False):
    """BlockSpec; constant-index residents request single buffering (halves their VMEM)."""
    if single_buffer:
        try:
            return pl.BlockSpec(block_shape, index_map, pipeline_mode=pl.Buffered(1))
        except Exception:  # older jax: no pipeline_mode / Buffered
            pass
    return pl.BlockSpec(block_shape, index_map)


def bn_conv2d_nhwc(x_nhwc, weight, gamma, beta, *, stride=1, padding=1, dilation=1,
                   oh_tile=None, compute_dtype=jnp.bfloat16, pack_taps=None,
                   single_buffer_residents=True):
    """x_nhwc: [N, H, W, Cin]; weight: [Cout, Cin, KH, KW] (PyTorch OIHW layout).
    Returns [N, OH, OW, Cout] in x dtype. Training-mode BatchNorm (batch stats, biased var).

    Orchestration (pass-1 conv+stats, tiny JAX stats reduction, pass-2 normalize) is meant
    to run eagerly so the Mosaic-capability fallback below can catch lowering errors; the
    heavy lifting is inside the two pallas_calls, which are compiled either way.
    """
    # TODO(synk): grouped convolution (groups > 1) is not implemented (module default is 1).
    # TODO(synk): for very large images on v7x (64 MiB VMEM), replace the whole-image
    #             resident block with memory_space=pl.ANY + manual double-buffered halo DMA
    #             of only oh_tile*stride + (KH-1)*dilation rows per OH tile.
    N, H, W, Cin = x_nhwc.shape
    Cout, wc, KH, KW = weight.shape
    assert wc == Cin, (wc, Cin)
    OH = (H + 2 * padding - dilation * (KH - 1) - 1) // stride + 1
    OW = (W + 2 * padding - dilation * (KW - 1) - 1) // stride + 1
    Cout_p = _round_up(Cout, LANES)
    KK = KH * KW
    out_dtype = x_nhwc.dtype
    y_dtype = compute_dtype        # bf16 intermediate on the fast path, f32 on exact path

    vmem_limit = _vmem_limit_bytes()

    # ---- operand prep: pad + cast only (no im2col materialization in HBM) ----
    x_pad = jnp.pad(x_nhwc, ((0, 0), (padding, padding), (padding, padding), (0, 0)))
    x_pad = x_pad.astype(compute_dtype)
    Hp, Wp = x_pad.shape[1], x_pad.shape[2]

    # OIHW -> [KH*KW, Cin, Cout_p]; output channels zero-padded to a lane multiple so the
    # MXU result / pass-1 stores stay lane-dense.
    # TODO(synk): for very narrow Cout (<<128) the padded intermediate still carries a
    #             Cout_p/Cout HBM tax; folding OW into the lane dim of the stored
    #             intermediate would remove it.
    w3 = jnp.transpose(weight, (2, 3, 1, 0)).reshape(KK, Cin, Cout)
    w3 = jnp.pad(w3, ((0, 0), (0, 0), (0, Cout_p - Cout))).astype(compute_dtype)

    x_isz = jnp.dtype(compute_dtype).itemsize
    y_isz = jnp.dtype(y_dtype).itemsize

    if oh_tile is None:
        oh_tile = _pick_oh_tile(OH, OW, Cin, Cout_p, Hp, Wp, KK, N, x_isz, y_isz,
                                budget=int(0.80 * vmem_limit))
    assert OH % oh_tile == 0, (OH, oh_tile)
    T = OH // oh_tile
    rows = oh_tile * OW
    # NOTE: the per-tap (oh_tile, OW, Cin) -> (rows, Cin) reshape is only a free view when
    # OW is sublane-aligned (8 for f32 / 16 for bf16); otherwise Mosaic inserts a relayout.

    if pack_taps is None:
        # Pack when a single tap would badly under-fill the MXU contraction (256 deep on
        # v6e/v7x, 128 on v5e): one K=KH*KW*Cin matmul instead of KH*KW K=Cin matmuls.
        pack_taps = (Cin < 256 and KK > 1)

    M = N * OH * OW
    count = float(M)

    # ---------------- pass 1: conv + per-tile channel statistics ----------------
    def run_pass1(pack, single_buf):
        w_in = w3.reshape(KK * Cin, Cout_p) if pack else w3

        def conv_stats_kernel(x_ref, w_ref, y_ref, stats_ref, acc_ref):
            i = pl.program_id(1)
            h_base = i * (oh_tile * stride)

            def tap(kh, kw):  # [oh_tile, OW, Cin] window of the VMEM-resident image
                h0 = h_base + kh * dilation
                w0 = kw * dilation            # static python int
                if stride == 1:
                    return x_ref[0, pl.ds(h0, oh_tile), pl.ds(w0, OW), :]
                # TODO(synk): stride>1 sublane-strided slices are slow; pre-gather rows.
                return x_ref[0, pl.ds(h0, oh_tile, stride), pl.ds(w0, OW, stride), :]

            if pack:
                # Per-tile, in-VMEM im2col: one big-K matmul keeps the MXU fed.
                pieces = [tap(*divmod(t, KW)) for t in range(KK)]
                patch = jnp.concatenate(pieces, axis=-1).reshape(rows, KK * Cin)
                acc_ref[...] = jnp.dot(patch, w_ref[...],
                                       preferred_element_type=jnp.float32)
            else:
                for t in range(KK):           # fallback: KH*KW accumulating taps
                    kh, kw = divmod(t, KW)
                    xs = tap(kh, kw).reshape(rows, Cin)
                    contrib = jnp.dot(xs, w_ref[t], preferred_element_type=jnp.float32)
                    if t == 0:
                        acc_ref[...] = contrib
                    else:
                        acc_ref[...] += contrib

            acc = acc_ref[...]                                   # [rows, Cout_p] f32
            y_ref[...] = acc.reshape(1, oh_tile, OW, Cout_p).astype(y_ref.dtype)
            # Exact f32 moments from the accumulator (before any bf16 rounding of y).
            stats_ref[0, 0] = jnp.sum(acc, axis=0, keepdims=True)
            stats_ref[0, 1] = jnp.sum(acc * acc, axis=0, keepdims=True)

        flops = 2 * N * OH * OW * KK * Cin * Cout_p
        bytes_accessed = (x_pad.size * x_isz + w_in.size * x_isz
                          + N * OH * OW * Cout_p * y_isz + N * 2 * T * Cout_p * 4)

        w_block = (KK * Cin, Cout_p) if pack else (KK, Cin, Cout_p)
        w_index = (lambda n, i: (0, 0)) if pack else (lambda n, i: (0, 0, 0))

        return pl.pallas_call(
            conv_stats_kernel,
            out_shape=(
                jax.ShapeDtypeStruct((N, OH, OW, Cout_p), y_dtype),    # conv output
                jax.ShapeDtypeStruct((N, 2, T, Cout_p), jnp.float32),  # [sum, sum_sq]
            ),
            grid=(N, T),
            in_specs=[
                # Whole padded image: constant over the OH-tile axis -> DMA'd once per n,
                # single-buffered (it never changes within an image).
                _spec((1, Hp, Wp, Cin), lambda n, i: (n, 0, 0, 0),
                      single_buffer=single_buf),
                # Weights: constant index map -> resident across the whole grid.
                _spec(w_block, w_index, single_buffer=single_buf),
            ],
            out_specs=(
                pl.BlockSpec((1, oh_tile, OW, Cout_p), lambda n, i: (n, i, 0, 0)),
                pl.BlockSpec((1, 2, 1, Cout_p), lambda n, i: (n, 0, i, 0)),
            ),
            scratch_shapes=[pltpu.VMEM((rows, Cout_p), jnp.float32)],
            compiler_params=pltpu.CompilerParams(
                dimension_semantics=("parallel", "parallel"),
                vmem_limit_bytes=vmem_limit),
            cost_estimate=pl.CostEstimate(flops=flops, transcendentals=0,
                                          bytes_accessed=bytes_accessed),
        )(x_pad, w_in)

    # -------- pass 2: flat, lane-dense, pipelined normalize (unpadded Cout output) --------
    def run_pass2(y, scale, shift, single_buf):
        y2 = y.reshape(M, Cout_p)          # free reshape (layout-compatible flatten)
        o_isz = jnp.dtype(out_dtype).itemsize
        rows2 = _pick_rows_tile(M, 2 * (Cout_p * y_isz + Cout * o_isz),
                                budget=int(0.60 * vmem_limit))
        T2 = max(M // rows2, 1)

        def bn_apply_kernel(y_ref, sc_ref, sh_ref, o_ref):
            yv = y_ref[...][:, :Cout].astype(jnp.float32)
            o_ref[...] = (yv * sc_ref[...] + sh_ref[...]).astype(o_ref.dtype)

        out2 = pl.pallas_call(
            bn_apply_kernel,
            out_shape=jax.ShapeDtypeStruct((M, Cout), out_dtype),
            grid=(T2,),
            in_specs=[
                pl.BlockSpec((rows2, Cout_p), lambda m: (m, 0)),
                _spec((1, Cout), lambda m: (0, 0), single_buffer=single_buf),
                _spec((1, Cout), lambda m: (0, 0), single_buffer=single_buf),
            ],
            out_specs=pl.BlockSpec((rows2, Cout), lambda m: (m, 0)),
            compiler_params=pltpu.CompilerParams(
                dimension_semantics=("parallel",),
                vmem_limit_bytes=vmem_limit),
            cost_estimate=pl.CostEstimate(
                flops=2 * M * Cout, transcendentals=0,
                bytes_accessed=M * Cout_p * y_isz + M * Cout * o_isz + 2 * Cout * 4),
        )(y2, scale, shift)
        return out2.reshape(N, OH, OW, Cout)

    def attempt(pack, single_buf):
        y, stats = run_pass1(pack, single_buf)
        # ---- tiny per-channel BN statistics (exact, f32) in plain JAX ----
        # NOTE: var = E[x^2] - E[x]^2 in f32 over N*OH*OW; fine at these scales but can
        # cancel for huge counts / large mean-to-std ratios (documented trade-off).
        total = jnp.sum(stats[:, 0], axis=(0, 1))        # [Cout_p]
        total_sq = jnp.sum(stats[:, 1], axis=(0, 1))     # [Cout_p]
        mean = total[:Cout] / count
        var = jnp.maximum(total_sq[:Cout] / count - mean * mean, 0.0)  # biased (training)
        scale = gamma.astype(jnp.float32) * jax.lax.rsqrt(var + EPS)
        shift = beta.astype(jnp.float32) - mean * scale
        out = run_pass2(y, scale.reshape(1, Cout), shift.reshape(1, Cout), single_buf)
        return jax.block_until_ready(out)   # surface any deferred error inside the try

    try:
        return attempt(pack_taps, single_buffer_residents)
    except Exception:
        if not (pack_taps or single_buffer_residents):
            raise
        # Conservative fallback if this Mosaic version rejects minor-dim concatenation
        # (tap packing) or Buffered(1): per-tap accumulation, default double buffering.
        return attempt(False, False)


def bn_conv2d(x, weight, gamma, beta, *, stride=1, padding=1, dilation=1,
              oh_tile=None, compute_dtype=jnp.bfloat16, pack_taps=None,
              single_buffer_residents=True):
    """PyTorch-layout wrapper: x [N, Cin, H, W] -> [N, Cout, OH, OW].
    The NCHW<->NHWC transposes are boundary glue only; channels-last callers should use
    bn_conv2d_nhwc directly to avoid the extra HBM passes."""
    x_nhwc = jnp.transpose(x, (0, 2, 3, 1))
    out = bn_conv2d_nhwc(x_nhwc, weight, gamma, beta, stride=stride, padding=padding,
                         dilation=dilation, oh_tile=oh_tile, compute_dtype=compute_dtype,
                         pack_taps=pack_taps,
                         single_buffer_residents=single_buffer_residents)
    return jnp.transpose(out, (0, 3, 1, 2))


def reference(x, weight, gamma, beta, *, stride=1, padding=1, dilation=1):
    conv = jax.lax.conv_general_dilated(
        x, weight, window_strides=(stride, stride),
        padding=[(padding, padding), (padding, padding)],
        rhs_dilation=(dilation, dilation),
        dimension_numbers=("NCHW", "OIHW", "NCHW"))
    mean = conv.mean(axis=(0, 2, 3), keepdims=True)
    var = conv.var(axis=(0, 2, 3), keepdims=True)
    g = gamma.reshape(1, -1, 1, 1)
    b = beta.reshape(1, -1, 1, 1)
    return (conv - mean) / jnp.sqrt(var + EPS) * g + b


if __name__ == "__main__":
    # BN_Conv2d(in_channels=4, out_channels=8, kernel_size=3, stride=1, padding=1)
    N, Cin, H, W = 2, 4, 16, 16
    Cout, KH, KW = 8, 3, 3

    key = jax.random.PRNGKey(0)
    kx, kw, kg, kb = jax.random.split(key, 4)
    x = jax.random.normal(kx, (N, Cin, H, W), dtype=jnp.float32)
    fan_in = Cin * KH * KW
    weight = jax.random.normal(kw, (Cout, Cin, KH, KW), dtype=jnp.float32) * (2.0 / fan_in) ** 0.5
    # Non-trivial affine params to exercise the scale/shift path.
    gamma = 1.0 + 0.1 * jax.random.normal(kg, (Cout,), dtype=jnp.float32)
    beta = 0.1 * jax.random.normal(kb, (Cout,), dtype=jnp.float32)

    ref = reference(x, weight, gamma, beta, stride=1, padding=1, dilation=1)

    # Called eagerly (not under an outer jit) so the Mosaic-capability fallback inside
    # bn_conv2d_nhwc can catch lowering errors; the two pallas_calls are compiled anyway.

    # Exact-semantics path: f32 matmul operands and f32 intermediate, tight tolerance.
    out_f32 = jax.block_until_ready(
        bn_conv2d(x, weight, gamma, beta, stride=1, padding=1, dilation=1,
                  compute_dtype=jnp.float32))
    assert out_f32.shape == (N, Cout, H, W), out_f32.shape
    assert jnp.allclose(out_f32, ref, atol=1e-3, rtol=1e-3), \
        float(jnp.max(jnp.abs(out_f32 - ref)))

    # Fast path: bf16 matmul operands + bf16 intermediate, f32 accumulation / f32 BN math.
    out_bf16 = jax.block_until_ready(
        bn_conv2d(x, weight, gamma, beta, stride=1, padding=1, dilation=1,
                  compute_dtype=jnp.bfloat16))
    assert out_bf16.shape == (N, Cout, H, W), out_bf16.shape
    assert jnp.allclose(out_bf16, ref, atol=3e-2, rtol=3e-2), \
        float(jnp.max(jnp.abs(out_bf16 - ref)))

    print("KERNEL_OK")
</pallas_src>

<mosaic_0001>
module attributes {stable_mosaic.version = 11 : i64} {
  func.func @conv_stats_kernel(%arg0: i32, %arg1: i32, %arg2: memref<1x18x18x4xf32, #tpu.memory_space<vmem>>, %arg3: memref<36x128xf32, #tpu.memory_space<vmem>>, %arg4: memref<1x16x16x128xf32, #tpu.memory_space<vmem>>, %arg5: memref<1x2x1x128xf32, #tpu.memory_space<vmem>>, %arg6: memref<256x128xf32, #tpu.memory_space<vmem>>) attributes {dimension_semantics = [#tpu.dimension_semantics<parallel>, #tpu.dimension_semantics<parallel>], iteration_bounds = array<i64: 2, 1>, scalar_prefetch = 0 : i64, scratch_operands = 1 : i64, tpu.core_type = #tpu.core_type<tc>, window_params = [{pipeline_mode = #tpu.pipeline_mode<synchronous>, transform_indices = @transform_0, window_bounds = array<i64: 1, 18, 18, 4>}, {pipeline_mode = #tpu.pipeline_mode<synchronous>, transform_indices = @transform_1, window_bounds = array<i64: 36, 128>}, {transform_indices = @transform_2, window_bounds = array<i64: 1, 16, 16, 128>}, {transform_indices = @transform_3, window_bounds = array<i64: 1, 2, 1, 128>}]} {
    %c16_i32 = arith.constant 16 : i32
    %0 = arith.muli %arg1, %c16_i32 : i32
    %c0_i32 = arith.constant 0 : i32
    %1 = arith.addi %0, %c0_i32 : i32
    %c0 = arith.constant 0 : index
    %2 = arith.index_cast %1 : i32 to index
    %c0_0 = arith.constant 0 : index
    %c0_1 = arith.constant 0 : index
    %3 = vector.load %arg2[%c0, %2, %c0_0, %c0_1] : memref<1x18x18x4xf32, #tpu.memory_space<vmem>>, vector<1x16x16x4xf32>
    %4 = vector.shape_cast %3 : vector<1x16x16x4xf32> to vector<16x16x4xf32>
    %c0_i32_2 = arith.constant 0 : i32
    %5 = arith.addi %0, %c0_i32_2 : i32
    %c0_3 = arith.constant 0 : index
    %6 = arith.index_cast %5 : i32 to index
    %c1 = arith.constant 1 : index
    %c0_4 = arith.constant 0 : index
    %7 = vector.load %arg2[%c0_3, %6, %c1, %c0_4] : memref<1x18x18x4xf32, #tpu.memory_space<vmem>>, vector<1x16x16x4xf32>
    %8 = vector.shape_cast %7 : vector<1x16x16x4xf32> to vector<16x16x4xf32>
    %c0_i32_5 = arith.constant 0 : i32
    %9 = arith.addi %0, %c0_i32_5 : i32
    %c0_6 = arith.constant 0 : index
    %10 = arith.index_cast %9 : i32 to index
    %c2 = arith.constant 2 : index
    %c0_7 = arith.constant 0 : index
    %11 = vector.load %arg2[%c0_6, %10, %c2, %c0_7] : memref<1x18x18x4xf32, #tpu.memory_space<vmem>>, vector<1x16x16x4xf32>
    %12 = vector.shape_cast %11 : vector<1x16x16x4xf32> to vector<16x16x4xf32>
    %c1_i32 = arith.constant 1 : i32
    %13 = arith.addi %0, %c1_i32 : i32
    %c0_8 = arith.constant 0 : index
    %14 = arith.index_cast %13 : i32 to index
    %c0_9 = arith.constant 0 : index
    %c0_10 = arith.constant 0 : index
    %15 = vector.load %arg2[%c0_8, %14, %c0_9, %c0_10] : memref<1x18x18x4xf32, #tpu.memory_space<vmem>>, vector<1x16x16x4xf32>
    %16 = vector.shape_cast %15 : vector<1x16x16x4xf32> to vector<16x16x4xf32>
    %c1_i32_11 = arith.constant 1 : i32
    %17 = arith.addi %0, %c1_i32_11 : i32
    %c0_12 = arith.constant 0 : index
    %18 = arith.index_cast %17 : i32 to index
    %c1_13 = arith.constant 1 : index
    %c0_14 = arith.constant 0 : index
    %19 = vector.load %arg2[%c0_12, %18, %c1_13, %c0_14] : memref<1x18x18x4xf32, #tpu.memory_space<vmem>>, vector<1x16x16x4xf32>
    %20 = vector.shape_cast %19 : vector<1x16x16x4xf32> to vector<16x16x4xf32>
    %c1_i32_15 = arith.constant 1 : i32
    %21 = arith.addi %0, %c1_i32_15 : i32
    %c0_16 = arith.constant 0 : index
    %22 = arith.index_cast %21 : i32 to index
    %c2_17 = arith.constant 2 : index
    %c0_18 = arith.constant 0 : index
    %23 = vector.load %arg2[%c0_16, %22, %c2_17, %c0_18] : memref<1x18x18x4xf32, #tpu.memory_space<vmem>>, vector<1x16x16x4xf32>
    %24 = vector.shape_cast %23 : vector<1x16x16x4xf32> to vector<16x16x4xf32>
    %c2_i32 = arith.constant 2 : i32
    %25 = arith.addi %0, %c2_i32 : i32
    %c0_19 = arith.constant 0 : index
    %26 = arith.index_cast %25 : i32 to index
    %c0_20 = arith.constant 0 : index
    %c0_21 = arith.constant 0 : index
    %27 = vector.load %arg2[%c0_19, %26, %c0_20, %c0_21] : memref<1x18x18x4xf32, #tpu.memory_space<vmem>>, vector<1x16x16x4xf32>
    %28 = vector.shape_cast %27 : vector<1x16x16x4xf32> to vector<16x16x4xf32>
    %c2_i32_22 = arith.constant 2 : i32
    %29 = arith.addi %0, %c2_i32_22 : i32
    %c0_23 = arith.constant 0 : index
    %30 = arith.index_cast %29 : i32 to index
    %c1_24 = arith.constant 1 : index
    %c0_25 = arith.constant 0 : index
    %31 = vector.load %arg2[%c0_23, %30, %c1_24, %c0_25] : memref<1x18x18x4xf32, #tpu.memory_space<vmem>>, vector<1x16x16x4xf32>
    %32 = vector.shape_cast %31 : vector<1x16x16x4xf32> to vector<16x16x4xf32>
    %c2_i32_26 = arith.constant 2 : i32
    %33 = arith.addi %0, %c2_i32_26 : i32
    %c0_27 = arith.constant 0 : index
    %34 = arith.index_cast %33 : i32 to index
    %c2_28 = arith.constant 2 : index
    %c0_29 = arith.constant 0 : index
    %35 = vector.load %arg2[%c0_27, %34, %c2_28, %c0_29] : memref<1x18x18x4xf32, #tpu.memory_space<vmem>>, vector<1x16x16x4xf32>
    %36 = vector.shape_cast %35 : vector<1x16x16x4xf32> to vector<16x16x4xf32>
    %37 = tpu.concatenate %4, %8, %12, %16, %20, %24, %28, %32, %36 in 2 : vector<16x16x4xf32>, vector<16x16x4xf32>, vector<16x16x4xf32>, vector<16x16x4xf32>, vector<16x16x4xf32>, vector<16x16x4xf32>, vector<16x16x4xf32>, vector<16x16x4xf32>, vector<16x16x4xf32> -> vector<16x16x36xf32>
    %38 = vector.shape_cast %37 : vector<16x16x36xf32> to vector<256x36xf32>
    %c0_30 = arith.constant 0 : index
    %c0_31 = arith.constant 0 : index
    %39 = vector.load %arg3[%c0_30, %c0_31] : memref<36x128xf32, #tpu.memory_space<vmem>>, vector<36x128xf32>
    %cst = arith.constant dense<0.000000e+00> : vector<256x128xf32>
    %40 = tpu.matmul %38, %39, %cst {dimension_numbers = #tpu.dot_dimension_numbers<[1], [0], [0], [1], [0, 0, 1, 1], [], []>} : vector<256x36xf32>, vector<36x128xf32>, vector<256x128xf32> -> vector<256x128xf32>
    %c0_32 = arith.constant 0 : index
    %c0_33 = arith.constant 0 : index
    %41 = vector.load %arg6[%c0_32, %c0_33] : memref<256x128xf32, #tpu.memory_space<vmem>>, vector<256x128xf32>
    tpu.vector_store %arg6[%c0_32, %c0_33], %40 {strides = array<i32>} : memref<256x128xf32, #tpu.memory_space<vmem>>, vector<256x128xf32>,
    %c0_34 = arith.constant 0 : index
    %c0_35 = arith.constant 0 : index
    %42 = vector.load %arg6[%c0_34, %c0_35] : memref<256x128xf32, #tpu.memory_space<vmem>>, vector<256x128xf32>
    %43 = vector.shape_cast %42 : vector<256x128xf32> to vector<1x16x16x128xf32>
    %c0_36 = arith.constant 0 : index
    %c0_37 = arith.constant 0 : index
    %c0_38 = arith.constant 0 : index
    %c0_39 = arith.constant 0 : index
    %44 = vector.load %arg4[%c0_36, %c0_37, %c0_38, %c0_39] : memref<1x16x16x128xf32, #tpu.memory_space<vmem>>, vector<1x16x16x128xf32>
    tpu.vector_store %arg4[%c0_36, %c0_37, %c0_38, %c0_39], %43 {strides = array<i32>} : memref<1x16x16x128xf32, #tpu.memory_space<vmem>>, vector<1x16x16x128xf32>,
    %cst_40 = arith.constant dense<0.000000e+00> : vector<128xf32>
    %45 = vector.multi_reduction <add>, %42, %cst_40 [0] : vector<256x128xf32> to vector<128xf32>
    %46 = vector.shape_cast %45 : vector<128xf32> to vector<1x128xf32>
    %c0_41 = arith.constant 0 : index
    %c0_42 = arith.constant 0 : index
    %c0_43 = arith.constant 0 : index
    %c0_44 = arith.constant 0 : index
    %47 = vector.load %arg5[%c0_41, %c0_42, %c0_43, %c0_44] : memref<1x2x1x128xf32, #tpu.memory_space<vmem>>, vector<1x1x1x128xf32>
    %48 = vector.shape_cast %47 : vector<1x1x1x128xf32> to vector<1x128xf32>
    %49 = vector.shape_cast %46 : vector<1x128xf32> to vector<1x1x1x128xf32>
    tpu.vector_store %arg5[%c0_41, %c0_42, %c0_43, %c0_44], %49 {strides = array<i32>} : memref<1x2x1x128xf32, #tpu.memory_space<vmem>>, vector<1x1x1x128xf32>,
    %50 = arith.mulf %42, %42 : vector<256x128xf32>
    %cst_45 = arith.constant dense<0.000000e+00> : vector<128xf32>
    %51 = vector.multi_reduction <add>, %50, %cst_45 [0] : vector<256x128xf32> to vector<128xf32>
    %52 = vector.shape_cast %51 : vector<128xf32> to vector<1x128xf32>
    %c0_46 = arith.constant 0 : index
    %c1_47 = arith.constant 1 : index
    %c0_48 = arith.constant 0 : index
    %c0_49 = arith.constant 0 : index
    %53 = vector.load %arg5[%c0_46, %c1_47, %c0_48, %c0_49] : memref<1x2x1x128xf32, #tpu.memory_space<vmem>>, vector<1x1x1x128xf32>
    %54 = vector.shape_cast %53 : vector<1x1x1x128xf32> to vector<1x128xf32>
    %55 = vector.shape_cast %52 : vector<1x128xf32> to vector<1x1x1x128xf32>
    tpu.vector_store %arg5[%c0_46, %c1_47, %c0_48, %c0_49], %55 {strides = array<i32>} : memref<1x2x1x128xf32, #tpu.memory_space<vmem>>, vector<1x1x1x128xf32>,
    return
  }
  func.func @transform_0(%arg0: i32, %arg1: i32) -> (i32, i32, i32, i32) {
    %c0_i32 = arith.constant 0 : i32
    %c0_i32_0 = arith.constant 0 : i32
    %c0_i32_1 = arith.constant 0 : i32
    %c0_i32_2 = arith.constant 0 : i32
    return %arg0, %c0_i32, %c0_i32_0, %c0_i32_1 : i32, i32, i32, i32
  }
  func.func @transform_1(%arg0: i32, %arg1: i32) -> (i32, i32) {
    %c0_i32 = arith.constant 0 : i32
    %c0_i32_0 = arith.constant 0 : i32
    %c0_i32_1 = arith.constant 0 : i32
    return %c0_i32, %c0_i32_0 : i32, i32
  }
  func.func @transform_2(%arg0: i32, %arg1: i32) -> (i32, i32, i32, i32) {
    %c0_i32 = arith.constant 0 : i32
    %c0_i32_0 = arith.constant 0 : i32
    %c0_i32_1 = arith.constant 0 : i32
    return %arg0, %arg1, %c0_i32, %c0_i32_0 : i32, i32, i32, i32
  }
  func.func @transform_3(%arg0: i32, %arg1: i32) -> (i32, i32, i32, i32) {
    %c0_i32 = arith.constant 0 : i32
    %c0_i32_0 = arith.constant 0 : i32
    %c0_i32_1 = arith.constant 0 : i32
    return %arg0, %c0_i32, %arg1, %c0_i32_0 : i32, i32, i32, i32
  }
}

module attributes {stable_mosaic.version = 11 : i64} {
  func.func @conv_stats_kernel(%arg0: i32, %arg1: i32, %arg2: memref<1x18x18x4xf32, #tpu.memory_space<vmem>>, %arg3: memref<9x4x128xf32, #tpu.memory_space<vmem>>, %arg4: memref<1x16x16x128xf32, #tpu.memory_space<vmem>>, %arg5: memref<1x2x1x128xf32, #tpu.memory_space<vmem>>, %arg6: memref<256x128xf32, #tpu.memory_space<vmem>>) attributes {dimension_semantics = [#tpu.dimension_semantics<parallel>, #tpu.dimension_semantics<parallel>], iteration_bounds = array<i64: 2, 1>, scalar_prefetch = 0 : i64, scratch_operands = 1 : i64, tpu.core_type = #tpu.core_type<tc>, window_params = [{transform_indices = @transform_0, window_bounds = array<i64: 1, 18, 18, 4>}, {pipeline_mode = #tpu.pipeline_mode<synchronous>, transform_indices = @transform_1, window_bounds = array<i64: 9, 4, 128>}, {transform_indices = @transform_2, window_bounds = array<i64: 1, 16, 16, 128>}, {transform_indices = @transform_3, window_bounds = array<i64: 1, 2, 1, 128>}]} {
    %c16_i32 = arith.constant 16 : i32
    %0 = arith.muli %arg1, %c16_i32 : i32
    %c0_i32 = arith.constant 0 : i32
    %1 = arith.addi %0, %c0_i32 : i32
    %c0 = arith.constant 0 : index
    %2 = arith.index_cast %1 : i32 to index
    %c0_0 = arith.constant 0 : index
    %c0_1 = arith.constant 0 : index
    %3 = vector.load %arg2[%c0, %2, %c0_0, %c0_1] : memref<1x18x18x4xf32, #tpu.memory_space<vmem>>, vector<1x16x16x4xf32>
    %4 = vector.shape_cast %3 : vector<1x16x16x4xf32> to vector<16x16x4xf32>
    %5 = vector.shape_cast %4 : vector<16x16x4xf32> to vector<256x4xf32>
    %c0_2 = arith.constant 0 : index
    %c0_3 = arith.constant 0 : index
    %c0_4 = arith.constant 0 : index
    %6 = vector.load %arg3[%c0_2, %c0_3, %c0_4] : memref<9x4x128xf32, #tpu.memory_space<vmem>>, vector<1x4x128xf32>
    %7 = vector.shape_cast %6 : vector<1x4x128xf32> to vector<4x128xf32>
    %cst = arith.constant dense<0.000000e+00> : vector<256x128xf32>
    %8 = tpu.matmul %5, %7, %cst {dimension_numbers = #tpu.dot_dimension_numbers<[1], [0], [0], [1], [0, 0, 1, 1], [], []>} : vector<256x4xf32>, vector<4x128xf32>, vector<256x128xf32> -> vector<256x128xf32>
    %c0_5 = arith.constant 0 : index
    %c0_6 = arith.constant 0 : index
    %9 = vector.load %arg6[%c0_5, %c0_6] : memref<256x128xf32, #tpu.memory_space<vmem>>, vector<256x128xf32>
    tpu.vector_store %arg6[%c0_5, %c0_6], %8 {strides = array<i32>} : memref<256x128xf32, #tpu.memory_space<vmem>>, vector<256x128xf32>,
    %c0_i32_7 = arith.constant 0 : i32
    %10 = arith.addi %0, %c0_i32_7 : i32
    %c0_8 = arith.constant 0 : index
    %11 = arith.index_cast %10 : i32 to index
    %c1 = arith.constant 1 : index
    %c0_9 = arith.constant 0 : index
    %12 = vector.load %arg2[%c0_8, %11, %c1, %c0_9] : memref<1x18x18x4xf32, #tpu.memory_space<vmem>>, vector<1x16x16x4xf32>
    %13 = vector.shape_cast %12 : vector<1x16x16x4xf32> to vector<16x16x4xf32>
    %14 = vector.shape_cast %13 : vector<16x16x4xf32> to vector<256x4xf32>
    %c1_10 = arith.constant 1 : index
    %c0_11 = arith.constant 0 : index
    %c0_12 = arith.constant 0 : index
    %15 = vector.load %arg3[%c1_10, %c0_11, %c0_12] : memref<9x4x128xf32, #tpu.memory_space<vmem>>, vector<1x4x128xf32>
    %16 = vector.shape_cast %15 : vector<1x4x128xf32> to vector<4x128xf32>
    %cst_13 = arith.constant dense<0.000000e+00> : vector<256x128xf32>
    %17 = tpu.matmul %14, %16, %cst_13 {dimension_numbers = #tpu.dot_dimension_numbers<[1], [0], [0], [1], [0, 0, 1, 1], [], []>} : vector<256x4xf32>, vector<4x128xf32>, vector<256x128xf32> -> vector<256x128xf32>
    %c0_14 = arith.constant 0 : index
    %c0_15 = arith.constant 0 : index
    %18 = vector.load %arg6[%c0_14, %c0_15] : memref<256x128xf32, #tpu.memory_space<vmem>>, vector<256x128xf32>
    %19 = arith.addf %18, %17 : vector<256x128xf32>
    %c0_16 = arith.constant 0 : index
    %c0_17 = arith.constant 0 : index
    %20 = vector.load %arg6[%c0_16, %c0_17] : memref<256x128xf32, #tpu.memory_space<vmem>>, vector<256x128xf32>
    tpu.vector_store %arg6[%c0_16, %c0_17], %19 {strides = array<i32>} : memref<256x128xf32, #tpu.memory_space<vmem>>, vector<256x128xf32>,
    %c0_i32_18 = arith.constant 0 : i32
    %21 = arith.addi %0, %c0_i32_18 : i32
    %c0_19 = arith.constant 0 : index
    %22 = arith.index_cast %21 : i32 to index
    %c2 = arith.constant 2 : index
    %c0_20 = arith.constant 0 : index
    %23 = vector.load %arg2[%c0_19, %22, %c2, %c0_20] : memref<1x18x18x4xf32, #tpu.memory_space<vmem>>, vector<1x16x16x4xf32>
    %24 = vector.shape_cast %23 : vector<1x16x16x4xf32> to vector<16x16x4xf32>
    %25 = vector.shape_cast %24 : vector<16x16x4xf32> to vector<256x4xf32>
    %c2_21 = arith.constant 2 : index
    %c0_22 = arith.constant 0 : index
    %c0_23 = arith.constant 0 : index
    %26 = vector.load %arg3[%c2_21, %c0_22, %c0_23] : memref<9x4x128xf32, #tpu.memory_space<vmem>>, vector<1x4x128xf32>
    %27 = vector.shape_cast %26 : vector<1x4x128xf32> to vector<4x128xf32>
    %cst_24 = arith.constant dense<0.000000e+00> : vector<256x128xf32>
    %28 = tpu.matmul %25, %27, %cst_24 {dimension_numbers = #tpu.dot_dimension_numbers<[1], [0], [0], [1], [0, 0, 1, 1], [], []>} : vector<256x4xf32>, vector<4x128xf32>, vector<256x128xf32> -> vector<256x128xf32>
    %c0_25 = arith.constant 0 : index
    %c0_26 = arith.constant 0 : index
    %29 = vector.load %arg6[%c0_25, %c0_26] : memref<256x128xf32, #tpu.memory_space<vmem>>, vector<256x128xf32>
    %30 = arith.addf %29, %28 : vector<256x128xf32>
    %c0_27 = arith.constant 0 : index
    %c0_28 = arith.constant 0 : index
    %31 = vector.load %arg6[%c0_27, %c0_28] : memref<256x128xf32, #tpu.memory_space<vmem>>, vector<256x128xf32>
    tpu.vector_store %arg6[%c0_27, %c0_28], %30 {strides = array<i32>} : memref<256x128xf32, #tpu.memory_space<vmem>>, vector<256x128xf32>,
    %c1_i32 = arith.constant 1 : i32
    %32 = arith.addi %0, %c1_i32 : i32
    %c0_29 = arith.constant 0 : index
    %33 = arith.index_cast %32 : i32 to index
    %c0_30 = arith.constant 0 : index
    %c0_31 = arith.constant 0 : index
    %34 = vector.load %arg2[%c0_29, %33, %c0_30, %c0_31] : memref<1x18x18x4xf32, #tpu.memory_space<vmem>>, vector<1x16x16x4xf32>
    %35 = vector.shape_cast %34 : vector<1x16x16x4xf32> to vector<16x16x4xf32>
    %36 = vector.shape_cast %35 : vector<16x16x4xf32> to vector<256x4xf32>
    %c3 = arith.constant 3 : index
    %c0_32 = arith.constant 0 : index
    %c0_33 = arith.constant 0 : index
    %37 = vector.load %arg3[%c3, %c0_32, %c0_33] : memref<9x4x128xf32, #tpu.memory_space<vmem>>, vector<1x4x128xf32>
    %38 = vector.shape_cast %37 : vector<1x4x128xf32> to vector<4x128xf32>
    %cst_34 = arith.constant dense<0.000000e+00> : vector<256x128xf32>
    %39 = tpu.matmul %36, %38, %cst_34 {dimension_numbers = #tpu.dot_dimension_numbers<[1], [0], [0], [1], [0, 0, 1, 1], [], []>} : vector<256x4xf32>, vector<4x128xf32>, vector<256x128xf32> -> vector<256x128xf32>
    %c0_35 = arith.constant 0 : index
    %c0_36 = arith.constant 0 : index
    %40 = vector.load %arg6[%c0_35, %c0_36] : memref<256x128xf32, #tpu.memory_space<vmem>>, vector<256x128xf32>
    %41 = arith.addf %40, %39 : vector<256x128xf32>
    %c0_37 = arith.constant 0 : index
    %c0_38 = arith.constant 0 : index
    %42 = vector.load %arg6[%c0_37, %c0_38] : memref<256x128xf32, #tpu.memory_space<vmem>>, vector<256x128xf32>
    tpu.vector_store %arg6[%c0_37, %c0_38], %41 {strides = array<i32>} : memref<256x128xf32, #tpu.memory_space<vmem>>, vector<256x128xf32>,
    %c1_i32_39 = arith.constant 1 : i32
    %43 = arith.addi %0, %c1_i32_39 : i32
    %c0_40 = arith.constant 0 : index
    %44 = arith.index_cast %43 : i32 to index
    %c1_41 = arith.constant 1 : index
    %c0_42 = arith.constant 0 : index
    %45 = vector.load %arg2[%c0_40, %44, %c1_41, %c0_42] : memref<1x18x18x4xf32, #tpu.memory_space<vmem>>, vector<1x16x16x4xf32>
    %46 = vector.shape_cast %45 : vector<1x16x16x4xf32> to vector<16x16x4xf32>
    %47 = vector.shape_cast %46 : vector<16x16x4xf32> to vector<256x4xf32>
    %c4 = arith.constant 4 : index
    %c0_43 = arith.constant 0 : index
    %c0_44 = arith.constant 0 : index
    %48 = vector.load %arg3[%c4, %c0_43, %c0_44] : memref<9x4x128xf32, #tpu.memory_space<vmem>>, vector<1x4x128xf32>
    %49 = vector.shape_cast %48 : vector<1x4x128xf32> to vector<4x128xf32>
    %cst_45 = arith.constant dense<0.000000e+00> : vector<256x128xf32>
    %50 = tpu.matmul %47, %49, %cst_45 {dimension_numbers = #tpu.dot_dimension_numbers<[1], [0], [0], [1], [0, 0, 1, 1], [], []>} : vector<256x4xf32>, vector<4x128xf32>, vector<256x128xf32> -> vector<256x128xf32>
    %c0_46 = arith.constant 0 : index
    %c0_47 = arith.constant 0 : index
    %51 = vector.load %arg6[%c0_46, %c0_47] : memref<256x128xf32, #tpu.memory_space<vmem>>, vector<256x128xf32>
    %52 = arith.addf %51, %50 : vector<256x128xf32>
    %c0_48 = arith.constant 0 : index
    %c0_49 = arith.constant 0 : index
    %53 = vector.load %arg6[%c0_48, %c0_49] : memref<256x128xf32, #tpu.memory_space<vmem>>, vector<256x128xf32>
    tpu.vector_store %arg6[%c0_48, %c0_49], %52 {strides = array<i32>} : memref<256x128xf32, #tpu.memory_space<vmem>>, vector<256x128xf32>,
    %c1_i32_50 = arith.constant 1 : i32
    %54 = arith.addi %0, %c1_i32_50 : i32
    %c0_51 = arith.constant 0 : index
    %55 = arith.index_cast %54 : i32 to index
    %c2_52 = arith.constant 2 : index
    %c0_53 = arith.constant 0 : index
    %56 = vector.load %arg2[%c0_51, %55, %c2_52, %c0_53] : memref<1x18x18x4xf32, #tpu.memory_space<vmem>>, vector<1x16x16x4xf32>
    %57 = vector.shape_cast %56 : vector<1x16x16x4xf32> to vector<16x16x4xf32>
    %58 = vector.shape_cast %57 : vector<16x16x4xf32> to vector<256x4xf32>
    %c5 = arith.constant 5 : index
    %c0_54 = arith.constant 0 : index
    %c0_55 = arith.constant 0 : index
    %59 = vector.load %arg3[%c5, %c0_54, %c0_55] : memref<9x4x128xf32, #tpu.memory_space<vmem>>, vector<1x4x128xf32>
    %60 = vector.shape_cast %59 : vector<1x4x128xf32> to vector<4x128xf32>
    %cst_56 = arith.constant dense<0.000000e+00> : vector<256x128xf32>
    %61 = tpu.matmul %58, %60, %cst_56 {dimension_numbers = #tpu.dot_dimension_numbers<[1], [0], [0], [1], [0, 0, 1, 1], [], []>} : vector<256x4xf32>, vector<4x128xf32>, vector<256x128xf32> -> vector<256x128xf32>
    %c0_57 = arith.constant 0 : index
    %c0_58 = arith.constant 0 : index
    %62 = vector.load %arg6[%c0_57, %c0_58] : memref<256x128xf32, #tpu.memory_space<vmem>>, vector<256x128xf32>
    %63 = arith.addf %62, %61 : vector<256x128xf32>
    %c0_59 = arith.constant 0 : index
    %c0_60 = arith.constant 0 : index
    %64 = vector.load %arg6[%c0_59, %c0_60] : memref<256x128xf32, #tpu.memory_space<vmem>>, vector<256x128xf32>
    tpu.vector_store %arg6[%c0_59, %c0_60], %63 {strides = array<i32>} : memref<256x128xf32, #tpu.memory_space<vmem>>, vector<256x128xf32>,
    %c2_i32 = arith.constant 2 : i32
    %65 = arith.addi %0, %c2_i32 : i32
    %c0_61 = arith.constant 0 : index
    %66 = arith.index_cast %65 : i32 to index
    %c0_62 = arith.constant 0 : index
    %c0_63 = arith.constant 0 : index
    %67 = vector.load %arg2[%c0_61, %66, %c0_62, %c0_63] : memref<1x18x18x4xf32, #tpu.memory_space<vmem>>, vector<1x16x16x4xf32>
    %68 = vector.shape_cast %67 : vector<1x16x16x4xf32> to vector<16x16x4xf32>
    %69 = vector.shape_cast %68 : vector<16x16x4xf32> to vector<256x4xf32>
    %c6 = arith.constant 6 : index
    %c0_64 = arith.constant 0 : index
    %c0_65 = arith.constant 0 : index
    %70 = vector.load %arg3[%c6, %c0_64, %c0_65] : memref<9x4x128xf32, #tpu.memory_space<vmem>>, vector<1x4x128xf32>
    %71 = vector.shape_cast %70 : vector<1x4x128xf32> to vector<4x128xf32>
    %cst_66 = arith.constant dense<0.000000e+00> : vector<256x128xf32>
    %72 = tpu.matmul %69, %71, %cst_66 {dimension_numbers = #tpu.dot_dimension_numbers<[1], [0], [0], [1], [0, 0, 1, 1], [], []>} : vector<256x4xf32>, vector<4x128xf32>, vector<256x128xf32> -> vector<256x128xf32>
    %c0_67 = arith.constant 0 : index
    %c0_68 = arith.constant 0 : index
    %73 = vector.load %arg6[%c0_67, %c0_68] : memref<256x128xf32, #tpu.memory_space<vmem>>, vector<256x128xf32>
    %74 = arith.addf %73, %72 : vector<256x128xf32>
    %c0_69 = arith.constant 0 : index
    %c0_70 = arith.constant 0 : index
    %75 = vector.load %arg6[%c0_69, %c0_70] : memref<256x128xf32, #tpu.memory_space<vmem>>, vector<256x128xf32>
    tpu.vector_store %arg6[%c0_69, %c0_70], %74 {strides = array<i32>} : memref<256x128xf32, #tpu.memory_space<vmem>>, vector<256x128xf32>,
    %c2_i32_71 = arith.constant 2 : i32
    %76 = arith.addi %0, %c2_i32_71 : i32
    %c0_72 = arith.constant 0 : index
    %77 = arith.index_cast %76 : i32 to index
    %c1_73 = arith.constant 1 : index
    %c0_74 = arith.constant 0 : index
    %78 = vector.load %arg2[%c0_72, %77, %c1_73, %c0_74] : memref<1x18x18x4xf32, #tpu.memory_space<vmem>>, vector<1x16x16x4xf32>
    %79 = vector.shape_cast %78 : vector<1x16x16x4xf32> to vector<16x16x4xf32>
    %80 = vector.shape_cast %79 : vector<16x16x4xf32> to vector<256x4xf32>
    %c7 = arith.constant 7 : index
    %c0_75 = arith.constant 0 : index
    %c0_76 = arith.constant 0 : index
    %81 = vector.load %arg3[%c7, %c0_75, %c0_76] : memref<9x4x128xf32, #tpu.memory_space<vmem>>, vector<1x4x128xf32>
    %82 = vector.shape_cast %81 : vector<1x4x128xf32> to vector<4x128xf32>
    %cst_77 = arith.constant dense<0.000000e+00> : vector<256x128xf32>
    %83 = tpu.matmul %80, %82, %cst_77 {dimension_numbers = #tpu.dot_dimension_numbers<[1], [0], [0], [1], [0, 0, 1, 1], [], []>} : vector<256x4xf32>, vector<4x128xf32>, vector<256x128xf32> -> vector<256x128xf32>
    %c0_78 = arith.constant 0 : index
    %c0_79 = arith.constant 0 : index
    %84 = vector.load %arg6[%c0_78, %c0_79] : memref<256x128xf32, #tpu.memory_space<vmem>>, vector<256x128xf32>
    %85 = arith.addf %84, %83 : vector<256x128xf32>
    %c0_80 = arith.constant 0 : index
    %c0_81 = arith.constant 0 : index
    %86 = vector.load %arg6[%c0_80, %c0_81] : memref<256x128xf32, #tpu.memory_space<vmem>>, vector<256x128xf32>
    tpu.vector_store %arg6[%c0_80, %c0_81], %85 {strides = array<i32>} : memref<256x128xf32, #tpu.memory_space<vmem>>, vector<256x128xf32>,
    %c2_i32_82 = arith.constant 2 : i32
    %87 = arith.addi %0, %c2_i32_82 : i32
    %c0_83 = arith.constant 0 : index
    %88 = arith.index_cast %87 : i32 to index
    %c2_84 = arith.constant 2 : index
    %c0_85 = arith.constant 0 : index
    %89 = vector.load %arg2[%c0_83, %88, %c2_84, %c0_85] : memref<1x18x18x4xf32, #tpu.memory_space<vmem>>, vector<1x16x16x4xf32>
    %90 = vector.shape_cast %89 : vector<1x16x16x4xf32> to vector<16x16x4xf32>
    %91 = vector.shape_cast %90 : vector<16x16x4xf32> to vector<256x4xf32>
    %c8 = arith.constant 8 : index
    %c0_86 = arith.constant 0 : index
    %c0_87 = arith.constant 0 : index
    %92 = vector.load %arg3[%c8, %c0_86, %c0_87] : memref<9x4x128xf32, #tpu.memory_space<vmem>>, vector<1x4x128xf32>
    %93 = vector.shape_cast %92 : vector<1x4x128xf32> to vector<4x128xf32>
    %cst_88 = arith.constant dense<0.000000e+00> : vector<256x128xf32>
    %94 = tpu.matmul %91, %93, %cst_88 {dimension_numbers = #tpu.dot_dimension_numbers<[1], [0], [0], [1], [0, 0, 1, 1], [], []>} : vector<256x4xf32>, vector<4x128xf32>, vector<256x128xf32> -> vector<256x128xf32>
    %c0_89 = arith.constant 0 : index
    %c0_90 = arith.constant 0 : index
    %95 = vector.load %arg6[%c0_89, %c0_90] : memref<256x128xf32, #tpu.memory_space<vmem>>, vector<256x128xf32>
    %96 = arith.addf %95, %94 : vector<256x128xf32>
    %c0_91 = arith.constant 0 : index
    %c0_92 = arith.constant 0 : index
    %97 = vector.load %arg6[%c0_91, %c0_92] : memref<256x128xf32, #tpu.memory_space<vmem>>, vector<256x128xf32>
    tpu.vector_store %arg6[%c0_91, %c0_92], %96 {strides = array<i32>} : memref<256x128xf32, #tpu.memory_space<vmem>>, vector<256x128xf32>,
    %c0_93 = arith.constant 0 : index
    %c0_94 = arith.constant 0 : index
    %98 = vector.load %arg6[%c0_93, %c0_94] : memref<256x128xf32, #tpu.memory_space<vmem>>, vector<256x128xf32>
    %99 = vector.shape_cast %98 : vector<256x128xf32> to vector<1x16x16x128xf32>
    %c0_95 = arith.constant 0 : index
    %c0_96 = arith.constant 0 : index
    %c0_97 = arith.constant 0 : index
    %c0_98 = arith.constant 0 : index
    %100 = vector.load %arg4[%c0_95, %c0_96, %c0_97, %c0_98] : memref<1x16x16x128xf32, #tpu.memory_space<vmem>>, vector<1x16x16x128xf32>
    tpu.vector_store %arg4[%c0_95, %c0_96, %c0_97, %c0_98], %99 {strides = array<i32>} : memref<1x16x16x128xf32, #tpu.memory_space<vmem>>, vector<1x16x16x128xf32>,
    %cst_99 = arith.constant dense<0.000000e+00> : vector<128xf32>
    %101 = vector.multi_reduction <add>, %98, %cst_99 [0] : vector<256x128xf32> to vector<128xf32>
    %102 = vector.shape_cast %101 : vector<128xf32> to vector<1x128xf32>
    %c0_100 = arith.constant 0 : index
    %c0_101 = arith.constant 0 : index
    %c0_102 = arith.constant 0 : index
    %c0_103 = arith.constant 0 : index
    %103 = vector.load %arg5[%c0_100, %c0_101, %c0_102, %c0_103] : memref<1x2x1x128xf32, #tpu.memory_space<vmem>>, vector<1x1x1x128xf32>
    %104 = vector.shape_cast %103 : vector<1x1x1x128xf32> to vector<1x128xf32>
    %105 = vector.shape_cast %102 : vector<1x128xf32> to vector<1x1x1x128xf32>
    tpu.vector_store %arg5[%c0_100, %c0_101, %c0_102, %c0_103], %105 {strides = array<i32>} : memref<1x2x1x128xf32, #tpu.memory_space<vmem>>, vector<1x1x1x128xf32>,
    %106 = arith.mulf %98, %98 : vector<256x128xf32>
    %cst_104 = arith.constant dense<0.000000e+00> : vector<128xf32>
    %107 = vector.multi_reduction <add>, %106, %cst_104 [0] : vector<256x128xf32> to vector<128xf32>
    %108 = vector.shape_cast %107 : vector<128xf32> to vector<1x128xf32>
    %c0_105 = arith.constant 0 : index
    %c1_106 = arith.constant 1 : index
    %c0_107 = arith.constant 0 : index
    %c0_108 = arith.constant 0 : index
    %109 = vector.load %arg5[%c0_105, %c1_106, %c0_107, %c0_108] : memref<1x2x1x128xf32, #tpu.memory_space<vmem>>, vector<1x1x1x128xf32>
    %110 = vector.shape_cast %109 : vector<1x1x1x128xf32> to vector<1x128xf32>
    %111 = vector.shape_cast %108 : vector<1x128xf32> to vector<1x1x1x128xf32>
    tpu.vector_store %arg5[%c0_105, %c1_106, %c0_107, %c0_108], %111 {strides = array<i32>} : memref<1x2x1x128xf32, #tpu.memory_space<vmem>>, vector<1x1x1x128xf32>,
    return
  }
  func.func @transform_0(%arg0: i32, %arg1: i32) -> (i32, i32, i32, i32) {
    %c0_i32 = arith.constant 0 : i32
    %c0_i32_0 = arith.constant 0 : i32
    %c0_i32_1 = arith.constant 0 : i32
    %c0_i32_2 = arith.constant 0 : i32
    return %arg0, %c0_i32, %c0_i32_0, %c0_i32_1 : i32, i32, i32, i32
  }
  func.func @transform_1(%arg0: i32, %arg1: i32) -> (i32, i32, i32) {
    %c0_i32 = arith.constant 0 : i32
    %c0_i32_0 = arith.constant 0 : i32
    %c0_i32_1 = arith.constant 0 : i32
    %c0_i32_2 = arith.constant 0 : i32
    return %c0_i32, %c0_i32_0, %c0_i32_1 : i32, i32, i32
  }
  func.func @transform_2(%arg0: i32, %arg1: i32) -> (i32, i32, i32, i32) {
    %c0_i32 = arith.constant 0 : i32
    %c0_i32_0 = arith.constant 0 : i32
    %c0_i32_1 = arith.constant 0 : i32
    return %arg0, %arg1, %c0_i32, %c0_i32_0 : i32, i32, i32, i32
  }
  func.func @transform_3(%arg0: i32, %arg1: i32) -> (i32, i32, i32, i32) {
    %c0_i32 = arith.constant 0 : i32
    %c0_i32_0 = arith.constant 0 : i32
    %c0_i32_1 = arith.constant 0 : i32
    return %arg0, %c0_i32, %arg1, %c0_i32_0 : i32, i32, i32, i32
  }
}

</mosaic_0001>

<bundles_post_ra>
// kernel: tpu_custom_call.1
= control target key start
LH: loop header
LB: loop body
LE: loop exit
PB: predicated region body
PF: predicated region fallthrough
CT: control target
= control target key end

     0   :  { %9 = vsyncpa [#allocation4], 0  ;;  %s4681_s0 = inlined_call_operand.vmem [shape: f32[2,18,18,4], index: 0, kind: input, shape index: {}]   ;;  %s4682_s1 = inlined_call_operand.vmem [shape: f32[36,128], index: 1, kind: input, shape index: {}]   ;;  %s4683_s2 = inlined_call_operand.hbm [shape: f32[2,16,16,128], index: 2, kind: output, shape index: {0}]   ;;  %s4684_s3 = inlined_call_operand.hbm [shape: f32[2,2,1,128], index: 3, kind: output, shape index: {1}]  }
   0x1   :  { %11 = vsyncpa [#allocation4 + $0x1], 0 }
   0x2   :  { %12 = vsyncpa [#allocation6], 0 }
   0x3   :  { %14 = vsyncpa [#allocation6 + $0x1], 0  ;;  %s2843_s12 = smov 0   ;;  %s2845_s13 = smov 0  }
   0x4   :  { %s2847_s14 = smov 0   ;;  %s2849_s15 = smov 0  }
   0x5   :  { %s2851_s16 = smov 0   ;;  %s2853_s17 = smov 0  }
   0x6 LB: > { %s2367_s18 = sadd.s32 4294967295, %s2811_s17   ;;  %s2368_s19 = sadd.s32 4294967294, %s2811_s17   ;;  %s2811_s17 = sphi %s2853_s17, %s20_s17   ;;  %s2807_s16 = sphi %s2851_s16, %s4924_s16   ;;  %s2803_s15 = sphi %s2849_s15, %s4923_s15   ;;  %s2799_s14 = sphi %s2847_s14, %s4922_s14   ;;  %s2795_s13 = sphi %s2845_s13, %s4921_s13   ;;  %s2791_s12 = sphi %s2843_s12, %s4920_s12  }
   0x7   : > { %s32_s20 = sadd.s32 1, %s2807_s16  ;;  %s88_s21 = sadd.s32 1, %s2799_s14 }
   0x8   : > { %p34_p0 = scmp.ge.s32.totalorder %s32_s20, 2  ;;  %p98_p1 = scmp.ne.s32.totalorder %s2799_s14, %s2795_s13 }
   0x9   : > { %p99_p2 = scmp.eq.s32.totalorder %s2367_s18, 1  ;;  %p104_p3 = scmp.ne.s32.totalorder %s2795_s13, %s2791_s12 }
   0xa   : > { %s4926_s20 = smov (%p34_p0, %s32_s20), 0  ;;  %p105_p5 = scmp.eq.s32.totalorder %s2368_s19, 1 }
   0xb   : > { %p2883_p4 = por %p99_p2, %p98_p1  ;;  %s83_s23 = ssub.s32 %s2807_s16, %s4926_s20 }
   0xc   : > { %p2370_p6 = scmp.ge.s32.totalorder %s2811_s17, 1  ;;  %p86_p7 = scmp.eq.s32.totalorder %s83_s23, 0 }
   0xd   : > { %p2890_p8 = por %p105_p5, %p104_p3  ;;  %p162_p9 = scmp.lt.s32.totalorder %s2811_s17, 3 }
   0xe   : > { %s2896_s25 = scalar_select %p86_p7, %s2799_s14, %s88_s21  }
   0xf   : > { %p163_p10 = pnand %p2370_p6, %p162_p9 }
  0x11   : > { %166 = sbr.rel (%p163_p10) target bundleno = 979 (0x3d3), region = 28 }
  0x16   : > { %p191_p11 = scmp.lt.s32.totalorder %s2803_s15, 1  ;;  %s2813_s4 = smov 4   ;;  %vm1518_vm0 = vcmask 31744   ;;  %vm1551_vm1 = vcmask 64512   ;;  %vm1584_vm2 = vcmask 97280   ;;  %vm1617_vm3 = vcmask 130048  }
  0x17   : > { %s2814_s5 = smov 8   ;;  %s2815_s6 = smov 12   ;;  %vm1650_vm4 = vcmask 162816   ;;  %vm1884_vm5 = vcmask 1043456   ;;  %vm1683_vm6 = vcmask 195584   ;;  %vm1716_vm7 = vcmask 228352  }
  0x18   : > { %s192_s26 = scalar_select %p191_p11, %s2803_s15, 1  ;;  %vm1749_vm8 = vcmask 261120   ;;  %vm1787_vm9 = vcmask 293888  }
  0x19   : > { %s2816_s7 = smov 16   ;;  %s2817_s8 = smov 20  }
  0x1a   : > { %s2623_s27 = smul.u32 432, %s192_s26  ;;  %s2818_s9 = smov 28  }
  0x1b   : > { %s2819_s10 = smov 24   ;;  %s2820_s11 = smov 32  }
  0x1c   : > { %s2903_s30 = scalar_lea.vmem %s4681_s0, %s2623_s27 }
  0x1d   : > { %v2906_v0 = vld [vmem:[%s2903_s30 + $0x31] sm:$0xff]  ;;  %v2909_v1 = vld [vmem:[%s2903_s30 + $0x19] sm:$0xff]  ;;  %v232_v2 = vld [vmem:[%s2903_s30 + $0x1] sm:$0xff] }
  0x1e   : > { %534 = vrot.lane.b32.xlu2 %v2906_v0, %s2813_s4  ;;  %530 = vrot.lane.b32.xlu1 %v2909_v1, %s2813_s4  ;;  %v2918_v3 = vld [vmem:[%s2903_s30 + $0x39] sm:$0xff]  ;;  %v2921_v4 = vld [vmem:[%s2903_s30 + $0x21] sm:$0xff] }
  0x1f   : > { %526 = vrot.lane.b32.xlu0 %v232_v2, %s2813_s4  ;;  %v233_v5 = vld [vmem:[%s2903_s30 + $0x9] sm:$0xff]  ;;  %v2930_v6 = vld [vmem:[%s2903_s30 + $0x61] sm:$0xff]  ;;  %v2933_v7 = vld [vmem:[%s2903_s30 + $0x51] sm:$0xff] }
  0x20   : > { %v2936_v8 = vld [vmem:[%s2903_s30 + $0x49] sm:$0xff]  ;;  %v2945_v9 = vld [vmem:[%s2903_s30 + $0x81] sm:$0xff]  ;;  %v2948_v10 = vld [vmem:[%s2903_s30 + $0x79] sm:$0xff] }
  0x21   : > { %v2951_v11 = vld [vmem:[%s2903_s30 + $0x69] sm:$0xff]  ;;  %v2963_v13 = vld [vmem:[%s2903_s30 + $0x99] sm:$0xff]  ;;  %v2966_v14 = vld [vmem:[%s2903_s30 + $0x91] sm:$0xff] }
  0x22   : > { %v2960_v12 = vld [vmem:[%s2903_s30 + $0xa9] sm:$0xff]  ;;  %v2978_v16 = vld [vmem:[%s2903_s30 + $0xc1] sm:$0xff]  ;;  %v2981_v17 = vld [vmem:[%s2903_s30 + $0xb1] sm:$0xff] }
  0x23   : > { %v2975_v15 = vld [vmem:[%s2903_s30 + $0xc9] sm:$0xff]  ;;  %v2990_v18 = vld [vmem:[%s2903_s30 + $0xf1] sm:$0xff]  ;;  %v2993_v19 = vld [vmem:[%s2903_s30 + $0xe1] sm:$0xff] }
  0x24   : > { %v2996_v20 = vld [vmem:[%s2903_s30 + $0xd9] sm:$0xff]  ;;  %v3005_v21 = vld [vmem:[%s2903_s30 + $0x111] sm:$0xff]  ;;  %v3008_v22 = vld [vmem:[%s2903_s30 + $0x109] sm:$0xff] }
  0x25   : > { %v3011_v23 = vld [vmem:[%s2903_s30 + $0xf9] sm:$0xff]  ;;  %v3023_v25 = vld [vmem:[%s2903_s30 + $0x129] sm:$0xff]  ;;  %v3026_v26 = vld [vmem:[%s2903_s30 + $0x121] sm:$0xff] }
  0x26   : > { %536 = vrot.lane.b32.xlu2 %v2918_v3, %s2813_s4  ;;  %532 = vrot.lane.b32.xlu1 %v2921_v4, %s2813_s4  ;;  %v3020_v24 = vld [vmem:[%s2903_s30 + $0x139] sm:$0xff]  ;;  %v3038_v28 = vld [vmem:[%s2903_s30 + $0x151] sm:$0xff] }
  0x27   : > { %528 = vrot.lane.b32.xlu0 %v233_v5, %s2813_s4  ;;  %v3035_v27 = vld [vmem:[%s2903_s30 + $0x159] sm:$0xff]  ;;  %v3041_v29 = vld [vmem:[%s2903_s30 + $0x141] sm:$0xff]  ;;  %v3051_v31 = vld [vmem:[%s2903_s30 + $0x171] sm:$0xff] }
  0x28   : > { %v264_v30 = vld [vmem:[%s2903_s30 + $0x2] sm:$0xff]  ;;  %v3065_v34 = vld [vmem:[%s2903_s30 + $0x1a] sm:$0xff]  ;;  %v265_v35 = vld [vmem:[%s2903_s30 + $0xa] sm:$0xff] }
  0x29   : > { %v3054_v32 = vld [vmem:[%s2903_s30 + $0x169] sm:$0xff]  ;;  %v3079_v38 = vld [vmem:[%s2903_s30 + $0x3a] sm:$0xff]  ;;  %v3082_v39 = vld [vmem:[%s2903_s30 + $0x32] sm:$0xff] }
  0x2a   : > { %v3062_v33 = vld [vmem:[%s2903_s30 + $0x22] sm:$0xff]  ;;  %v3076_v37 = vld [vmem:[%s2903_s30 + $0x4a] sm:$0xff]  ;;  %v3099_v43 = vld [vmem:[%s2903_s30 + $0x52] sm:$0xff] }
  0x2b   : > { %v3093_v41 = vld [vmem:[%s2903_s30 + $0x6a] sm:$0xff]  ;;  %v3096_v42 = vld [vmem:[%s2903_s30 + $0x62] sm:$0xff]  ;;  %v3110_v45 = vld [vmem:[%s2903_s30 + $0x92] sm:$0xff] }
  0x2c   : > { %v3113_v46 = vld [vmem:[%s2903_s30 + $0x82] sm:$0xff]  ;;  %v3116_v47 = vld [vmem:[%s2903_s30 + $0x7a] sm:$0xff]  ;;  %v3131_v51 = vld [vmem:[%s2903_s30 + $0xb2] sm:$0xff] }
  0x2d   : > { %v3134_v52 = vld [vmem:[%s2903_s30 + $0xaa] sm:$0xff]  ;;  %v3137_v53 = vld [vmem:[%s2903_s30 + $0x9a] sm:$0xff]  ;;  %v3158_v59 = vld [vmem:[%s2903_s30 + $0xc2] sm:$0xff] }
  0x2e   : > { %542 = vrot.lane.b32.xlu2 %v2930_v6, %s2813_s4  ;;  %540 = vrot.lane.b32.xlu1 %v2933_v7, %s2813_s4  ;;  %v3152_v57 = vld [vmem:[%s2903_s30 + $0xda] sm:$0xff]  ;;  %v3155_v58 = vld [vmem:[%s2903_s30 + $0xca] sm:$0xff] }
  0x2f   : > { %538 = vrot.lane.b32.xlu0 %v2936_v8, %s2813_s4  ;;  %v3173_v63 = vld [vmem:[%s2903_s30 + $0xfa] sm:$0xff]  ;;  %v3176_v2 = vld [vmem:[%s2903_s30 + $0xf2] sm:$0xff]  ;;  %v3179_v5 = vld [vmem:[%s2903_s30 + $0xe2] sm:$0xff] }
  0x36   : > { %548 = vrot.lane.b32.xlu2 %v2945_v9, %s2813_s4  ;;  %546 = vrot.lane.b32.xlu1 %v2948_v10, %s2813_s4 }
  0x37   : > { %544 = vrot.lane.b32.xlu0 %v2951_v11, %s2813_s4 }
  0x3e   : > { %554 = vrot.lane.b32.xlu2 %v2960_v12, %s2813_s4  ;;  %552 = vrot.lane.b32.xlu1 %v2963_v13, %s2813_s4 }
  0x3f   : > { %550 = vrot.lane.b32.xlu0 %v2966_v14, %s2813_s4 }
  0x46   : > { %560 = vrot.lane.b32.xlu2 %v2975_v15, %s2813_s4  ;;  %558 = vrot.lane.b32.xlu1 %v2978_v16, %s2813_s4 }
  0x47   : > { %556 = vrot.lane.b32.xlu0 %v2981_v17, %s2813_s4 }
  0x4e   : > { %566 = vrot.lane.b32.xlu2 %v2990_v18, %s2813_s4  ;;  %564 = vrot.lane.b32.xlu1 %v2993_v19, %s2813_s4 }
  0x4f   : > { %562 = vrot.lane.b32.xlu0 %v2996_v20, %s2813_s4 }
  0x56   : > { %572 = vrot.lane.b32.xlu2 %v3005_v21, %s2813_s4  ;;  %570 = vrot.lane.b32.xlu1 %v3008_v22, %s2813_s4 }
  0x57   : > { %568 = vrot.lane.b32.xlu0 %v3011_v23, %s2813_s4 }
  0x5e   : > { %578 = vrot.lane.b32.xlu2 %v3020_v24, %s2813_s4  ;;  %576 = vrot.lane.b32.xlu1 %v3023_v25, %s2813_s4 }
  0x5f   : > { %574 = vrot.lane.b32.xlu0 %v3026_v26, %s2813_s4 }
  0x66   : > { %584 = vrot.lane.b32.xlu2 %v3035_v27, %s2813_s4  ;;  %582 = vrot.lane.b32.xlu1 %v3038_v28, %s2813_s4 }
  0x67   : > { %580 = vrot.lane.b32.xlu0 %v3041_v29, %s2813_s4 }
  0x6e   : > { %654 = vrot.lane.b32.xlu2 %v264_v30, %s2814_s5  ;;  %588 = vrot.lane.b32.xlu1 %v3051_v31, %s2813_s4 }
  0x6f   : > { %586 = vrot.lane.b32.xlu0 %v3054_v32, %s2813_s4 }
  0x76   : > { %660 = vrot.lane.b32.xlu2 %v3062_v33, %s2814_s5  ;;  %658 = vrot.lane.b32.xlu1 %v3065_v34, %s2814_s5 }
  0x77   : > { %656 = vrot.lane.b32.xlu0 %v265_v35, %s2814_s5 }
  0x78   : > { %v3073_v36 = vpop.permute.xlu2 %534 }
  0x79   : > { %4722 = vst [vmem:[#allocation9_spill] sm:$0xff] %v3073_v36  ;;  %v3200_v36 = vld [vmem:[%s2903_s30 + $0x10a] sm:$0xff] }
  0x7e   : > { %666 = vrot.lane.b32.xlu2 %v3076_v37, %s2814_s5  ;;  %664 = vrot.lane.b32.xlu1 %v3079_v38, %s2814_s5 }
  0x7f   : > { %662 = vrot.lane.b32.xlu0 %v3082_v39, %s2814_s5 }
  0x80   : > { %v3090_v40 = vpop.permute.xlu2 %536 }
  0x81   : > { %4723 = vst [vmem:[#allocation10_spill] sm:$0xff] %v3090_v40  ;;  %v3194_v40 = vld [vmem:[%s2903_s30 + $0x122] sm:$0xff] }
  0x86   : > { %672 = vrot.lane.b32.xlu2 %v3093_v41, %s2814_s5  ;;  %670 = vrot.lane.b32.xlu1 %v3096_v42, %s2814_s5 }
  0x87   : > { %668 = vrot.lane.b32.xlu0 %v3099_v43, %s2814_s5 }
  0x88   : > { %v3107_v44 = vpop.permute.xlu2 %542 }
  0x89   : > { %4724 = vst [vmem:[#allocation11_spill] sm:$0xff] %v3107_v44 }
  0x8e   : > { %678 = vrot.lane.b32.xlu2 %v3110_v45, %s2814_s5  ;;  %676 = vrot.lane.b32.xlu1 %v3113_v46, %s2814_s5 }
  0x8f   : > { %674 = vrot.lane.b32.xlu0 %v3116_v47, %s2814_s5 }
  0x90   : > { %v3124_v48 = vpop.permute.xlu2 %548  ;;  %v3126_v49 = vpop.permute.xlu1 %530 }
  0x91   : > { %4725 = vst [vmem:[#allocation12_spill] sm:$0xff] %v3124_v48  ;;  %v3128_v50 = vpop.permute.xlu0 %526  ;;  %v3197_v48 = vld [vmem:[%s2903_s30 + $0x112] sm:$0xff] }
  0x92   : > { %4726 = vst [vmem:[#allocation13_spill] sm:$0xff] %v3126_v49  ;;  %v3242_v49 = vld [vmem:[%s2903_s30 + $0x152] sm:$0xff] }
  0x93   : > { %4727 = vst [vmem:[#allocation14_spill] sm:$0xff] %v3128_v50 }
  0x94   : > { %4746 = vst [vmem:[#allocation33_spill] sm:$0xff] %v3242_v49 }
  0x96   : > { %684 = vrot.lane.b32.xlu2 %v3131_v51, %s2814_s5  ;;  %682 = vrot.lane.b32.xlu1 %v3134_v52, %s2814_s5 }
  0x97   : > { %680 = vrot.lane.b32.xlu0 %v3137_v53, %s2814_s5 }
  0x98   : > { %v3145_v54 = vpop.permute.xlu2 %554  ;;  %v3147_v55 = vpop.permute.xlu1 %532 }
  0x99   : > { %4728 = vst [vmem:[#allocation15_spill] sm:$0xff] %v3145_v54  ;;  %v3149_v56 = vpop.permute.xlu0 %528  ;;  %v3221_v54 = vld [vmem:[%s2903_s30 + $0x12a] sm:$0xff] }
  0x9a   : > { %4729 = vst [vmem:[#allocation16_spill] sm:$0xff] %v3147_v55 }
  0x9b   : > { %4730 = vst [vmem:[#allocation17_spill] sm:$0xff] %v3149_v56 }
  0x9e   : > { %690 = vrot.lane.b32.xlu2 %v3152_v57, %s2814_s5  ;;  %688 = vrot.lane.b32.xlu1 %v3155_v58, %s2814_s5 }
  0x9f   : > { %686 = vrot.lane.b32.xlu0 %v3158_v59, %s2814_s5 }
  0xa0   : > { %v3166_v60 = vpop.permute.xlu2 %560  ;;  %v3168_v61 = vpop.permute.xlu1 %540 }
  0xa1   : > { %4731 = vst [vmem:[#allocation18_spill] sm:$0xff] %v3166_v60  ;;  %v3170_v62 = vpop.permute.xlu0 %538  ;;  %v3218_v60 = vld [vmem:[%s2903_s30 + $0x13a] sm:$0xff] }
  0xa2   : > { %4732 = vst [vmem:[#allocation19_spill] sm:$0xff] %v3168_v61  ;;  %v3239_v61 = vld [vmem:[%s2903_s30 + $0x15a] sm:$0xff] }
  0xa3   : > { %4733 = vst [vmem:[#allocation20_spill] sm:$0xff] %v3170_v62 }
  0xa4   : > { %4745 = vst [vmem:[#allocation32_spill] sm:$0xff] %v3239_v61 }
  0xa6   : > { %696 = vrot.lane.b32.xlu2 %v3173_v63, %s2814_s5  ;;  %694 = vrot.lane.b32.xlu1 %v3176_v2, %s2814_s5 }
  0xa7   : > { %692 = vrot.lane.b32.xlu0 %v3179_v5, %s2814_s5 }
  0xa8   : > { %v3187_v30 = vpop.permute.xlu2 %566  ;;  %v3189_v35 = vpop.permute.xlu1 %546 }
  0xa9   : > { %4734 = vst [vmem:[#allocation21_spill] sm:$0xff] %v3187_v30  ;;  %v3191_v62 = vpop.permute.xlu0 %544  ;;  %v3215_v30 = vld [vmem:[%s2903_s30 + $0x142] sm:$0xff] }
  0xaa   : > { %4735 = vst [vmem:[#allocation22_spill] sm:$0xff] %v3189_v35  ;;  %v3236_v35 = vld [vmem:[%s2903_s30 + $0x16a] sm:$0xff] }
  0xab   : > { %4736 = vst [vmem:[#allocation23_spill] sm:$0xff] %v3191_v62 }
  0xac   : > { %4740 = vst [vmem:[#allocation27_spill] sm:$0xff] %v3215_v30 }
  0xad   : > { %4744 = vst [vmem:[#allocation31_spill] sm:$0xff] %v3236_v35 }
  0xae   : > { %702 = vrot.lane.b32.xlu2 %v3194_v40, %s2814_s5  ;;  %700 = vrot.lane.b32.xlu1 %v3197_v48, %s2814_s5 }
  0xaf   : > { %698 = vrot.lane.b32.xlu0 %v3200_v36, %s2814_s5 }
  0xb0   : > { %v3208_v44 = vpop.permute.xlu2 %572  ;;  %v3210_v56 = vpop.permute.xlu1 %552 }
  0xb1   : > { %4737 = vst [vmem:[#allocation24_spill] sm:$0xff] %v3208_v44  ;;  %v3212_v50 = vpop.permute.xlu0 %550 }
  0xb2   : > { %4738 = vst [vmem:[#allocation25_spill] sm:$0xff] %v3210_v56 }
  0xb3   : > { %4739 = vst [vmem:[#allocation26_spill] sm:$0xff] %v3212_v50 }
  0xb6   : > { %708 = vrot.lane.b32.xlu2 %v3215_v30, %s2814_s5  ;;  %706 = vrot.lane.b32.xlu1 %v3218_v60, %s2814_s5  ;;  %v3257_v30 = vld [vmem:[%s2903_s30 + $0x172] sm:$0xff] }
  0xb7   : > { %704 = vrot.lane.b32.xlu0 %v3221_v54, %s2814_s5  ;;  %4750 = vst [vmem:[#allocation37_spill] sm:$0xff] %v3257_v30 }
  0xb8   : > { %v3229_v44 = vpop.permute.xlu2 %578  ;;  %v3231_v50 = vpop.permute.xlu1 %558 }
  0xb9   : > { %4741 = vst [vmem:[#allocation28_spill] sm:$0xff] %v3229_v44  ;;  %v3233_v56 = vpop.permute.xlu0 %556 }
  0xba   : > { %4742 = vst [vmem:[#allocation29_spill] sm:$0xff] %v3231_v50  ;;  %v204_v50 = vld [vmem:[%s2903_s30 + $0x30] sm:$0xff] }
  0xbb   : > { %4743 = vst [vmem:[#allocation30_spill] sm:$0xff] %v3233_v56  ;;  %v3260_v56 = vld [vmem:[%s2903_s30 + $0x18] sm:$0xff] }
  0xbc   : > { %4751 = vst [vmem:[#allocation38_spill] sm:$0xff] %v3260_v56 }
  0xbe   : > { %714 = vrot.lane.b32.xlu2 %v3236_v35, %s2814_s5  ;;  %712 = vrot.lane.b32.xlu1 %v3239_v61, %s2814_s5  ;;  %v3263_v35 = vld [vmem:[%s2903_s30 + $0x20] sm:$0xff]  ;;  %v3279_v61 = vld [vmem:[%s2903_s30 + $0x48] sm:$0xff] }
  0xbf   : > { %710 = vrot.lane.b32.xlu0 %v3242_v49, %s2814_s5  ;;  %4752 = vst [vmem:[#allocation39_spill] sm:$0xff] %v3263_v35  ;;  %v205_v49 = vld [vmem:[%s2903_s30 + $0x38] sm:$0xff] }
  0xc0   : > { %v3250_v44 = vpop.permute.xlu2 %584  ;;  %v3252_v62 = vpop.permute.xlu1 %564  ;;  %4756 = vst [vmem:[#allocation43_spill] sm:$0xff] %v3279_v61 }
  0xc1   : > { %4747 = vst [vmem:[#allocation34_spill] sm:$0xff] %v3250_v44  ;;  %v3254_v55 = vpop.permute.xlu0 %562 }
  0xc2   : > { %4748 = vst [vmem:[#allocation35_spill] sm:$0xff] %v3252_v62 }
  0xc3   : > { %4749 = vst [vmem:[#allocation36_spill] sm:$0xff] %v3254_v55 }
  0xc6   : > { %784 = vrot.lane.b32.xlu2 %v3263_v35, %s2815_s6  ;;  %782 = vrot.lane.b32.xlu1 %v3260_v56, %s2815_s6 }
  0xc7   : > { %716 = vrot.lane.b32.xlu0 %v3257_v30, %s2814_s5  ;;  %v3297_v30 = vld [vmem:[%s2903_s30 + $0x50] sm:$0xff] }
  0xc8   : > { %v3271_v44 = vpop.permute.xlu2 %654  ;;  %v3273_v55 = vpop.permute.xlu1 %570  ;;  %4761 = vst [vmem:[#allocation48_spill] sm:$0xff] %v3297_v30 }
  0xc9   : > { %4753 = vst [vmem:[#allocation40_spill] sm:$0xff] %v3271_v44  ;;  %v3275_v62 = vpop.permute.xlu0 %568 }
  0xca   : > { %4754 = vst [vmem:[#allocation41_spill] sm:$0xff] %v3273_v55  ;;  %v3294_v55 = vld [vmem:[%s2903_s30 + $0x68] sm:$0xff] }
  0xcb   : > { %4755 = vst [vmem:[#allocation42_spill] sm:$0xff] %v3275_v62  ;;  %v208_v62 = vld [vmem:[%s2903_s30 + $0x60] sm:$0xff] }
  0xcc   : > { %4760 = vst [vmem:[#allocation47_spill] sm:$0xff] %v3294_v55 }
  0xce   : > { %790 = vrot.lane.b32.xlu2 %v3279_v61, %s2815_s6  ;;  %788 = vrot.lane.b32.xlu1 %v205_v49, %s2815_s6 }
  0xcf   : > { %786 = vrot.lane.b32.xlu0 %v204_v50, %s2815_s6 }
  0xd0   : > { %v3286_v56 = vpop.permute.xlu2 %660  ;;  %v3288_v44 = vpop.permute.xlu1 %576 }
  0xd1   : > { %4757 = vst [vmem:[#allocation44_spill] sm:$0xff] %v3286_v56  ;;  %v3290_v35 = vpop.permute.xlu0 %574  ;;  %v3315_v56 = vld [vmem:[%s2903_s30 + $0x78] sm:$0xff] }
  0xd2   : > { %4758 = vst [vmem:[#allocation45_spill] sm:$0xff] %v3288_v44  ;;  %v3312_v44 = vld [vmem:[%s2903_s30 + $0x90] sm:$0xff] }
  0xd3   : > { %4759 = vst [vmem:[#allocation46_spill] sm:$0xff] %v3290_v35  ;;  %v211_v35 = vld [vmem:[%s2903_s30 + $0x80] sm:$0xff] }
  0xd4   : > { %4765 = vst [vmem:[#allocation52_spill] sm:$0xff] %v3312_v44 }
  0xd5   : > { %4766 = vst [vmem:[#allocation53_spill] sm:$0xff] %v3315_v56 }
  0xd6   : > { %796 = vrot.lane.b32.xlu2 %v3294_v55, %s2815_s6  ;;  %794 = vrot.lane.b32.xlu1 %v208_v62, %s2815_s6  ;;  %v3332_v55 = vld [vmem:[%s2903_s30 + $0xb0] sm:$0xff] }
  0xd7   : > { %792 = vrot.lane.b32.xlu0 %v3297_v30, %s2815_s6  ;;  %v3329_v30 = vld [vmem:[%s2903_s30 + $0xa8] sm:$0xff]  ;;  %4771 = vst [vmem:[#allocation58_spill] sm:$0xff] %v3332_v55 }
  0xd8   : > { %v3304_v49 = vpop.permute.xlu2 %666  ;;  %v3306_v50 = vpop.permute.xlu1 %582  ;;  %4770 = vst [vmem:[#allocation57_spill] sm:$0xff] %v3329_v30 }
  0xd9   : > { %4762 = vst [vmem:[#allocation49_spill] sm:$0xff] %v3304_v49  ;;  %v3308_v61 = vpop.permute.xlu0 %580 }
  0xda   : > { %4763 = vst [vmem:[#allocation50_spill] sm:$0xff] %v3306_v50 }
  0xdb   : > { %4764 = vst [vmem:[#allocation51_spill] sm:$0xff] %v3308_v61  ;;  %v3335_v61 = vld [vmem:[%s2903_s30 + $0x98] sm:$0xff] }
  0xdc   : > { %4772 = vst [vmem:[#allocation59_spill] sm:$0xff] %v3335_v61 }
  0xde   : > { %802 = vrot.lane.b32.xlu2 %v3312_v44, %s2815_s6  ;;  %800 = vrot.lane.b32.xlu1 %v211_v35, %s2815_s6  ;;  %v3356_v44 = vld [vmem:[%s2903_s30 + $0xc0] sm:$0xff] }
  0xdf   : > { %798 = vrot.lane.b32.xlu0 %v3315_v56, %s2815_s6  ;;  %4778 = vst [vmem:[#allocation65_spill] sm:$0xff] %v3356_v44 }
  0xe0   : > { %v3322_v62 = vpop.permute.xlu2 %672  ;;  %v3324_v49 = vpop.permute.xlu1 %588 }
  0xe1   : > { %4767 = vst [vmem:[#allocation54_spill] sm:$0xff] %v3322_v62  ;;  %v3326_v50 = vpop.permute.xlu0 %586  ;;  %v3353_v62 = vld [vmem:[%s2903_s30 + $0xd8] sm:$0xff] }
  0xe2   : > { %4768 = vst [vmem:[#allocation55_spill] sm:$0xff] %v3324_v49  ;;  %v3350_v49 = vld [vmem:[%s2903_s30 + $0xc8] sm:$0xff] }
  0xe3   : > { %4769 = vst [vmem:[#allocation56_spill] sm:$0xff] %v3326_v50 }
  0xe4   : > { %4776 = vst [vmem:[#allocation63_spill] sm:$0xff] %v3350_v49 }
  0xe5   : > { %4777 = vst [vmem:[#allocation64_spill] sm:$0xff] %v3353_v62 }
  0xe6   : > { %808 = vrot.lane.b32.xlu2 %v3332_v55, %s2815_s6  ;;  %806 = vrot.lane.b32.xlu1 %v3329_v30, %s2815_s6  ;;  %v3377_v55 = vld [vmem:[%s2903_s30 + $0xe0] sm:$0xff] }
  0xe7   : > { %804 = vrot.lane.b32.xlu0 %v3335_v61, %s2815_s6  ;;  %v3371_v61 = vld [vmem:[%s2903_s30 + $0xf0] sm:$0xff]  ;;  %4784 = vst [vmem:[#allocation71_spill] sm:$0xff] %v3377_v55 }
  0xe8   : > { %v3343_v35 = vpop.permute.xlu2 %678  ;;  %v3345_v56 = vpop.permute.xlu1 %658  ;;  %4782 = vst [vmem:[#allocation69_spill] sm:$0xff] %v3371_v61 }
  0xe9   : > { %4773 = vst [vmem:[#allocation60_spill] sm:$0xff] %v3343_v35  ;;  %v3347_v50 = vpop.permute.xlu0 %656 }
  0xea   : > { %4774 = vst [vmem:[#allocation61_spill] sm:$0xff] %v3345_v56  ;;  %v3374_v56 = vld [vmem:[%s2903_s30 + $0xf8] sm:$0xff] }
  0xeb   : > { %4775 = vst [vmem:[#allocation62_spill] sm:$0xff] %v3347_v50 }
  0xec   : > { %4783 = vst [vmem:[#allocation70_spill] sm:$0xff] %v3374_v56 }
  0xee   : > { %814 = vrot.lane.b32.xlu2 %v3353_v62, %s2815_s6  ;;  %812 = vrot.lane.b32.xlu1 %v3350_v49, %s2815_s6  ;;  %v3392_v62 = vld [vmem:[%s2903_s30 + $0x110] sm:$0xff] }
  0xef   : > { %810 = vrot.lane.b32.xlu0 %v3356_v44, %s2815_s6  ;;  %4788 = vst [vmem:[#allocation75_spill] sm:$0xff] %v3392_v62  ;;  %v3398_v44 = vld [vmem:[%s2903_s30 + $0x108] sm:$0xff] }
  0xf0   : > { %v3364_v35 = vpop.permute.xlu2 %684  ;;  %v3366_v50 = vpop.permute.xlu1 %664  ;;  %4790 = vst [vmem:[#allocation77_spill] sm:$0xff] %v3398_v44 }
  0xf1   : > { %4779 = vst [vmem:[#allocation66_spill] sm:$0xff] %v3364_v35  ;;  %v3368_v30 = vpop.permute.xlu0 %662  ;;  %v3395_v35 = vld [vmem:[%s2903_s30 + $0x120] sm:$0xff] }
  0xf2   : > { %4780 = vst [vmem:[#allocation67_spill] sm:$0xff] %v3366_v50 }
  0xf3   : > { %4781 = vst [vmem:[#allocation68_spill] sm:$0xff] %v3368_v30 }
  0xf4   : > { %4789 = vst [vmem:[#allocation76_spill] sm:$0xff] %v3395_v35 }
  0xf6   : > { %820 = vrot.lane.b32.xlu2 %v3374_v56, %s2815_s6  ;;  %818 = vrot.lane.b32.xlu1 %v3371_v61, %s2815_s6 }
  0xf7   : > { %816 = vrot.lane.b32.xlu0 %v3377_v55, %s2815_s6  ;;  %v3419_v55 = vld [vmem:[%s2903_s30 + $0x128] sm:$0xff] }
  0xf8   : > { %v3385_v50 = vpop.permute.xlu2 %690  ;;  %v3387_v30 = vpop.permute.xlu1 %670  ;;  %4796 = vst [vmem:[#allocation83_spill] sm:$0xff] %v3419_v55 }
  0xf9   : > { %4785 = vst [vmem:[#allocation72_spill] sm:$0xff] %v3385_v50  ;;  %v3389_v49 = vpop.permute.xlu0 %668  ;;  %v3416_v50 = vld [vmem:[%s2903_s30 + $0x140] sm:$0xff] }
  0xfa   : > { %4786 = vst [vmem:[#allocation73_spill] sm:$0xff] %v3387_v30 }
  0xfb   : > { %4787 = vst [vmem:[#allocation74_spill] sm:$0xff] %v3389_v49  ;;  %v3413_v49 = vld [vmem:[%s2903_s30 + $0x138] sm:$0xff] }
  0xfc   : > { %4794 = vst [vmem:[#allocation81_spill] sm:$0xff] %v3413_v49 }
  0xfd   : > { %4795 = vst [vmem:[#allocation82_spill] sm:$0xff] %v3416_v50 }
  0xfe   : > { %826 = vrot.lane.b32.xlu2 %v3395_v35, %s2815_s6  ;;  %824 = vrot.lane.b32.xlu1 %v3392_v62, %s2815_s6  ;;  %v3437_v35 = vld [vmem:[%s2903_s30 + $0x168] sm:$0xff] }
  0xff   : > { %822 = vrot.lane.b32.xlu0 %v3398_v44, %s2815_s6  ;;  %4801 = vst [vmem:[#allocation88_spill] sm:$0xff] %v3437_v35  ;;  %v3440_v44 = vld [vmem:[%s2903_s30 + $0x150] sm:$0xff] }
 0x100   : > { %v3406_v30 = vpop.permute.xlu2 %696  ;;  %v3408_v61 = vpop.permute.xlu1 %676  ;;  %4802 = vst [vmem:[#allocation89_spill] sm:$0xff] %v3440_v44 }
 0x101   : > { %4791 = vst [vmem:[#allocation78_spill] sm:$0xff] %v3406_v30  ;;  %v3410_v56 = vpop.permute.xlu0 %674  ;;  %v3434_v30 = vld [vmem:[%s2903_s30 + $0x158] sm:$0xff] }
 0x102   : > { %4792 = vst [vmem:[#allocation79_spill] sm:$0xff] %v3408_v61 }
 0x103   : > { %4793 = vst [vmem:[#allocation80_spill] sm:$0xff] %v3410_v56 }
 0x104   : > { %4800 = vst [vmem:[#allocation87_spill] sm:$0xff] %v3434_v30 }
 0x106   : > { %832 = vrot.lane.b32.xlu2 %v3416_v50, %s2815_s6  ;;  %830 = vrot.lane.b32.xlu1 %v3413_v49, %s2815_s6  ;;  %v2405_v50 = vld [vmem:[%s2903_s30 + $0x188] sm:$0xff] }
 0x107   : > { %828 = vrot.lane.b32.xlu0 %v3419_v55, %s2815_s6  ;;  %v3457_v55 = vld [vmem:[%s2903_s30 + $0x170] sm:$0xff] }
 0x108   : > { %v3427_v61 = vpop.permute.xlu2 %702  ;;  %v3429_v62 = vpop.permute.xlu1 %682 }
 0x109   : > { %4797 = vst [vmem:[#allocation84_spill] sm:$0xff] %v3427_v61  ;;  %v3431_v56 = vpop.permute.xlu0 %680  ;;  %v2404_v61 = vld [vmem:[%s2903_s30 + $0x180] sm:$0xff] }
 0x10a   : > { %4798 = vst [vmem:[#allocation85_spill] sm:$0xff] %v3429_v62 }
 0x10b   : > { %4799 = vst [vmem:[#allocation86_spill] sm:$0xff] %v3431_v56 }
 0x10e   : > { %838 = vrot.lane.b32.xlu2 %v3437_v35, %s2815_s6  ;;  %836 = vrot.lane.b32.xlu1 %v3434_v30, %s2815_s6 }
 0x10f   : > { %834 = vrot.lane.b32.xlu0 %v3440_v44, %s2815_s6 }
 0x110   : > { %v3448_v49 = vpop.permute.xlu2 %708  ;;  %v3450_v62 = vpop.permute.xlu1 %688 }
 0x111   : > { %4803 = vst [vmem:[#allocation90_spill] sm:$0xff] %v3450_v62  ;;  %v3452_v56 = vpop.permute.xlu0 %686 }
 0x116   : > { %844 = vrot.lane.b32.xlu2 %v2405_v50, %s2815_s6  ;;  %842 = vrot.lane.b32.xlu1 %v2404_v61, %s2815_s6 }
 0x117   : > { %840 = vrot.lane.b32.xlu0 %v3457_v55, %s2815_s6  ;;  %s2721_s6 = scalar_lea.hbm %s4683_s2, 512 }
 0x118   : > { %v3463_v30 = vpop.permute.xlu2 %714  ;;  %v3465_v44 = vpop.permute.xlu1 %694 }
 0x119   : > { %v3467_v35 = vpop.permute.xlu0 %692 }
 0x11e   : > { %914 = vrot.lane.b32.xlu2 %v2906_v0, %s2816_s7  ;;  %912 = vrot.lane.b32.xlu1 %v2921_v4, %s2816_s7 }
 0x11f   : > { %910 = vrot.lane.b32.xlu0 %v2909_v1, %s2816_s7 }
 0x120   : > { %v3475_v61 = vpop.permute.xlu2 %784  ;;  %v3477_v50 = vpop.permute.xlu1 %700 }
 0x121   : > { %4804 = vst [vmem:[#allocation91_spill] sm:$0xff] %v3475_v61  ;;  %v3479_v62 = vpop.permute.xlu0 %698 }
 0x126   : > { %920 = vrot.lane.b32.xlu2 %v2933_v7, %s2816_s7  ;;  %918 = vrot.lane.b32.xlu1 %v2936_v8, %s2816_s7 }
 0x127   : > { %916 = vrot.lane.b32.xlu0 %v2918_v3, %s2816_s7 }
 0x128   : > { %v3487_v0 = vpop.permute.xlu2 %790  ;;  %v3489_v4 = vpop.permute.xlu1 %706 }
 0x129   : > { %4805 = vst [vmem:[#allocation92_spill] sm:$0xff] %v3487_v0  ;;  %v3491_v1 = vpop.permute.xlu0 %704 }
 0x12e   : > { %926 = vrot.lane.b32.xlu2 %v2948_v10, %s2816_s7  ;;  %924 = vrot.lane.b32.xlu1 %v2951_v11, %s2816_s7 }
 0x12f   : > { %922 = vrot.lane.b32.xlu0 %v2930_v6, %s2816_s7 }
 0x130   : > { %v3499_v7 = vpop.permute.xlu2 %796  ;;  %v3501_v8 = vpop.permute.xlu1 %712 }
 0x131   : > { %v3503_v3 = vpop.permute.xlu0 %710 }
 0x136   : > { %932 = vrot.lane.b32.xlu2 %v2963_v13, %s2816_s7  ;;  %930 = vrot.lane.b32.xlu1 %v2966_v14, %s2816_s7 }
 0x137   : > { %928 = vrot.lane.b32.xlu0 %v2945_v9, %s2816_s7 }
 0x138   : > { %v3511_v10 = vpop.permute.xlu2 %802  ;;  %v3513_v11 = vpop.permute.xlu1 %782 }
 0x139   : > { %v3515_v6 = vpop.permute.xlu0 %716 }
 0x13e   : > { %938 = vrot.lane.b32.xlu2 %v2978_v16, %s2816_s7  ;;  %936 = vrot.lane.b32.xlu1 %v2981_v17, %s2816_s7 }
 0x13f   : > { %934 = vrot.lane.b32.xlu0 %v2960_v12, %s2816_s7 }
 0x140   : > { %v3523_v13 = vpop.permute.xlu2 %808  ;;  %v3525_v14 = vpop.permute.xlu1 %788 }
 0x141   : > { %v3527_v9 = vpop.permute.xlu0 %786 }
 0x146   : > { %944 = vrot.lane.b32.xlu2 %v2993_v19, %s2816_s7  ;;  %942 = vrot.lane.b32.xlu1 %v2996_v20, %s2816_s7 }
 0x147   : > { %940 = vrot.lane.b32.xlu0 %v2975_v15, %s2816_s7 }
 0x148   : > { %v3535_v16 = vpop.permute.xlu2 %814  ;;  %v3537_v17 = vpop.permute.xlu1 %794 }
 0x149   : > { %4806 = vst [vmem:[#allocation93_spill] sm:$0xff] %v3537_v17  ;;  %v3539_v12 = vpop.permute.xlu0 %792  ;;  %v2437_v17 = vld [vmem:[%s2903_s30 + $0x189] sm:$0xff] }
 0x14a   : > { %4807 = vst [vmem:[#allocation94_spill] sm:$0xff] %v3539_v12 }
 0x14e   : > { %950 = vrot.lane.b32.xlu2 %v3008_v22, %s2816_s7  ;;  %948 = vrot.lane.b32.xlu1 %v3011_v23, %s2816_s7 }
 0x14f   : > { %946 = vrot.lane.b32.xlu0 %v2990_v18, %s2816_s7 }
 0x150   : > { %v3547_v19 = vpop.permute.xlu2 %820  ;;  %v3549_v20 = vpop.permute.xlu1 %800 }
 0x151   : > { %v3551_v15 = vpop.permute.xlu0 %798 }
 0x152   : > { %4808 = vst [vmem:[#allocation95_spill] sm:$0xff] %v3551_v15  ;;  %v4839_v15 = vld [vmem:[#allocation39_spill] sm:$0xff] }
 0x156   : > { %956 = vrot.lane.b32.xlu2 %v3023_v25, %s2816_s7  ;;  %954 = vrot.lane.b32.xlu1 %v3026_v26, %s2816_s7 }
 0x157   : > { %952 = vrot.lane.b32.xlu0 %v3005_v21, %s2816_s7 }
 0x158   : > { %v3559_v22 = vpop.permute.xlu2 %826  ;;  %v3561_v18 = vpop.permute.xlu1 %806 }
 0x159   : > { %4809 = vst [vmem:[#allocation96_spill] sm:$0xff] %v3561_v18  ;;  %v3563_v23 = vpop.permute.xlu0 %804  ;;  %v2436_v18 = vld [vmem:[%s2903_s30 + $0x181] sm:$0xff] }
 0x15a   : > { %4810 = vst [vmem:[#allocation97_spill] sm:$0xff] %v3563_v23 }
 0x15e   : > { %962 = vrot.lane.b32.xlu2 %v3038_v28, %s2816_s7  ;;  %960 = vrot.lane.b32.xlu1 %v3041_v29, %s2816_s7 }
 0x15f   : > { %958 = vrot.lane.b32.xlu0 %v3020_v24, %s2816_s7 }
 0x160   : > { %v3571_v25 = vpop.permute.xlu2 %832  ;;  %v3573_v21 = vpop.permute.xlu1 %812 }
 0x161   : > { %v3575_v26 = vpop.permute.xlu0 %810 }
 0x166   : > { %968 = vrot.lane.b32.xlu2 %v3051_v31, %s2816_s7  ;;  %966 = vrot.lane.b32.xlu1 %v3054_v32, %s2816_s7 }
 0x167   : > { %964 = vrot.lane.b32.xlu0 %v3035_v27, %s2816_s7 }
 0x168   : > { %v3583_v28 = vpop.permute.xlu2 %838  ;;  %v3585_v29 = vpop.permute.xlu1 %818 }
 0x169   : > { %v3587_v24 = vpop.permute.xlu0 %816 }
 0x16e   : > { %1038 = vrot.lane.b32.xlu2 %v3065_v34, %s2817_s8  ;;  %972 = vrot.lane.b32.xlu1 %v2437_v17, %s2816_s7 }
 0x16f   : > { %970 = vrot.lane.b32.xlu0 %v2436_v18, %s2816_s7 }
 0x170   : > { %v3595_v31 = vpop.permute.xlu2 %844  ;;  %v3597_v32 = vpop.permute.xlu1 %824 }
 0x171   : > { %v3599_v27 = vpop.permute.xlu0 %822 }
 0x176   : > { %1044 = vrot.lane.b32.xlu2 %v3079_v38, %s2817_s8  ;;  %1042 = vrot.lane.b32.xlu1 %v3082_v39, %s2817_s8 }
 0x177   : > { %1040 = vrot.lane.b32.xlu0 %v3062_v33, %s2817_s8 }
 0x178   : > { %v3607_v34 = vpop.permute.xlu2 %914  ;;  %v3609_v17 = vpop.permute.xlu1 %830 }
 0x179   : > { %v3611_v18 = vpop.permute.xlu0 %828 }
 0x17e   : > { %1050 = vrot.lane.b32.xlu2 %v3096_v42, %s2817_s8  ;;  %1048 = vrot.lane.b32.xlu1 %v3099_v43, %s2817_s8 }
 0x17f   : > { %1046 = vrot.lane.b32.xlu0 %v3076_v37, %s2817_s8 }
 0x180   : > { %v3619_v38 = vpop.permute.xlu2 %920  ;;  %v3621_v39 = vpop.permute.xlu1 %836 }
 0x181   : > { %4811 = vst [vmem:[#allocation98_spill] sm:$0xff] %v3619_v38  ;;  %v3623_v33 = vpop.permute.xlu0 %834  ;;  %v4819_v38 = vld [vmem:[#allocation65_spill] sm:$0xff] }
 0x186   : > { %1056 = vrot.lane.b32.xlu2 %v3113_v46, %s2817_s8  ;;  %1054 = vrot.lane.b32.xlu1 %v3116_v47, %s2817_s8 }
 0x187   : > { %1052 = vrot.lane.b32.xlu0 %v3093_v41, %s2817_s8 }
 0x188   : > { %v3631_v42 = vpop.permute.xlu2 %926  ;;  %v3633_v43 = vpop.permute.xlu1 %842 }
 0x189   : > { %4812 = vst [vmem:[#allocation99_spill] sm:$0xff] %v3631_v42  ;;  %v3635_v37 = vpop.permute.xlu0 %840 }
 0x18e   : > { %1062 = vrot.lane.b32.xlu2 %v3134_v52, %s2817_s8  ;;  %1060 = vrot.lane.b32.xlu1 %v3137_v53, %s2817_s8 }
 0x18f   : > { %1058 = vrot.lane.b32.xlu0 %v3110_v45, %s2817_s8 }
 0x190   : > { %v3643_v46 = vpop.permute.xlu2 %932  ;;  %v3645_v47 = vpop.permute.xlu1 %912 }
 0x191   : > { %4813 = vst [vmem:[#allocation100_spill] sm:$0xff] %v3643_v46  ;;  %v3647_v41 = vpop.permute.xlu0 %910  ;;  %v4823_v46 = vld [vmem:[#allocation58_spill] sm:$0xff] }
 0x192   : > { %4814 = vst [vmem:[#allocation101_spill] sm:$0xff] %v3645_v47  ;;  %v4841_v47 = vld [vmem:[#allocation45_spill] sm:$0xff] }
 0x196   : > { %1068 = vrot.lane.b32.xlu2 %v3155_v58, %s2817_s8  ;;  %1066 = vrot.lane.b32.xlu1 %v3158_v59, %s2817_s8 }
 0x197   : > { %1064 = vrot.lane.b32.xlu0 %v3131_v51, %s2817_s8 }
 0x198   : > { %v3655_v52 = vpop.permute.xlu2 %938  ;;  %v3657_v53 = vpop.permute.xlu1 %918 }
 0x199   : > { %4815 = vst [vmem:[#allocation102_spill] sm:$0xff] %v3657_v53  ;;  %v3659_v45 = vpop.permute.xlu0 %916  ;;  %v4824_v53 = vld [vmem:[#allocation27_spill] sm:$0xff] }
 0x19e   : > { %1074 = vrot.lane.b32.xlu2 %v3176_v2, %s2817_s8  ;;  %1072 = vrot.lane.b32.xlu1 %v3179_v5, %s2817_s8 }
 0x19f   : > { %1070 = vrot.lane.b32.xlu0 %v3152_v57, %s2817_s8 }
 0x1a0   : > { %v3667_v58 = vpop.permute.xlu2 %944  ;;  %v3669_v59 = vpop.permute.xlu1 %924 }
 0x1a1   : > { %v3671_v51 = vpop.permute.xlu0 %922 }
 0x1a2   : > { %4816 = vst [vmem:[#allocation103_spill] sm:$0xff] %v3671_v51  ;;  %v4818_v51 = vld [vmem:[#allocation29_spill] sm:$0xff] }
 0x1a3   : > { %v1535_v12 = vsel %vm1518_vm0, %v4819_v38, %v4818_v51  ;;  %v4825_v38 = vld [vmem:[#allocation66_spill] sm:$0xff] }
 0x1a6   : > { %1080 = vrot.lane.b32.xlu2 %v3197_v48, %s2817_s8  ;;  %1078 = vrot.lane.b32.xlu1 %v3200_v36, %s2817_s8 }
 0x1a7   : > { %1076 = vrot.lane.b32.xlu0 %v3173_v63, %s2817_s8 }
 0x1a8   : > { %v3679_v2 = vpop.permute.xlu2 %950  ;;  %v3681_v5 = vpop.permute.xlu1 %930 }
 0x1a9   : > { %v3683_v57 = vpop.permute.xlu0 %928 }
 0x1ae   : > { %1086 = vrot.lane.b32.xlu2 %v3218_v60, %s2817_s8  ;;  %1084 = vrot.lane.b32.xlu1 %v3221_v54, %s2817_s8  ;;  %v4820_v60 = vld [vmem:[#allocation32_spill] sm:$0xff]  ;;  %v4821_v54 = vld [vmem:[#allocation33_spill] sm:$0xff] }
 0x1af   : > { %1082 = vrot.lane.b32.xlu0 %v3194_v40, %s2817_s8  ;;  %v4822_v40 = vld [vmem:[#allocation30_spill] sm:$0xff] }
 0x1b0   : > { %v3691_v48 = vpop.permute.xlu2 %956  ;;  %v3693_v36 = vpop.permute.xlu1 %936  ;;  %v1534_v23 = vsel %vm1518_vm0, %v4823_v46, %v4822_v40 }
 0x1b1   : > { %v3695_v63 = vpop.permute.xlu0 %934  ;;  %v1567_v51 = vsel %vm1551_vm1, %v1534_v23, %v4825_v38  ;;  %v4827_v23 = vld [vmem:[#allocation35_spill] sm:$0xff] }
 0x1b2   : > { %4817 = vst [vmem:[#allocation104_spill] sm:$0xff] %v3695_v63  ;;  %v1568_v63 = vsel %vm1551_vm1, %v1535_v12, %v3452_v56  ;;  %v1600_v46 = vsel %vm1584_vm2, %v1567_v51, %v3573_v21  ;;  %v4828_v38 = vld [vmem:[#allocation71_spill] sm:$0xff]  ;;  %v4829_v21 = vld [vmem:[#allocation37_spill] sm:$0xff]  ;;  %v4831_v51 = vld [vmem:[#allocation64_spill] sm:$0xff] }
 0x1b6   : > { %1092 = vrot.lane.b32.xlu2 %v4820_v60, %s2817_s8  ;;  %1090 = vrot.lane.b32.xlu1 %v4821_v54, %s2817_s8  ;;  %v1601_v60 = vsel %vm1584_vm2, %v1568_v63, %v3535_v16  ;;  %v1538_v16 = vsel %vm1518_vm0, %v4828_v38, %v4827_v23  ;;  %v4830_v63 = vld [vmem:[#allocation36_spill] sm:$0xff] }
 0x1b7   : > { %1088 = vrot.lane.b32.xlu0 %v4824_v53, %s2817_s8  ;;  %v3726_v53 = vld [vmem:[%s2903_s30 + $0x182] sm:$0xff] }
 0x1b8   : > { %v3715_v0 = vpop.permute.xlu2 %962  ;;  %v943_v54 = vpop.permute.xlu1 %942  ;;  %4826 = vst [vmem:[#allocation29_spill] sm:$0xff] %v3726_v53 }
 0x1b9   : > { %v3720_v40 = vsel %vm1617_vm3, %v1601_v60, %v943_v54  ;;  %v941_v56 = vpop.permute.xlu0 %940  ;;  %v1537_v60 = vsel %vm1518_vm0, %v4831_v51, %v4830_v63  ;;  %v1571_v54 = vsel %vm1551_vm1, %v1538_v16, %v3467_v35  ;;  %v2502_v16 = vld [vmem:[%s2903_s30 + $0x31] sm:$0xff] }
 0x1ba   : > { %v3723_v12 = vsel %vm1617_vm3, %v1600_v46, %v941_v56  ;;  %v4832_v46 = vld [vmem:[#allocation31_spill] sm:$0xff]  ;;  %v4833_v56 = vld [vmem:[#allocation72_spill] sm:$0xff]  ;;  %v1604_v38 = vsel %vm1584_vm2, %v1571_v54, %v3547_v19  ;;  %v4835_v19 = vld [vmem:[#allocation41_spill] sm:$0xff] }
 0x1bb   : > { %v1570_v23 = vsel %vm1551_vm1, %v1537_v60, %v4833_v56  ;;  %v2470_v60 = vld [vmem:[%s2903_s30 + $0x30] sm:$0xff]  ;;  %v4836_v54 = vld [vmem:[#allocation77_spill] sm:$0xff] }
 0x1bc   : > { %v1541_v56 = vsel %vm1518_vm0, %v4836_v54, %v4835_v19  ;;  %v2471_v19 = vld [vmem:[%s2903_s30 + $0x38] sm:$0xff] }
 0x1bd   : > { %v4838_v54 = vld [vmem:[#allocation16_spill] sm:$0xff] }
 0x1be   : > { %1098 = vrot.lane.b32.xlu2 %v3726_v53, %s2817_s8  ;;  %1096 = vrot.lane.b32.xlu1 %v4829_v21, %s2817_s8  ;;  %v1603_v21 = vsel %vm1584_vm2, %v1570_v23, %v3585_v29  ;;  %v1574_v29 = vsel %vm1551_vm1, %v1541_v56, %v3479_v62  ;;  %v1522_v62 = vsel %vm1518_vm0, %v4839_v15, %v4838_v54  ;;  %v4840_v56 = vld [vmem:[#allocation44_spill] sm:$0xff] }
 0x1bf   : > { %1094 = vrot.lane.b32.xlu0 %v4832_v46, %s2817_s8  ;;  %v3759_v46 = vld [vmem:[%s2903_s30 + $0x18a] sm:$0xff]  ;;  %v4845_v54 = vld [vmem:[#allocation84_spill] sm:$0xff] }
 0x1c0   : > { %v3746_v53 = vpop.permute.xlu2 %968  ;;  %v949_v42 = vpop.permute.xlu1 %948  ;;  %4834 = vst [vmem:[#allocation65_spill] sm:$0xff] %v3759_v46 }
 0x1c1   : > { %v3751_v63 = vsel %vm1617_vm3, %v1604_v38, %v949_v42  ;;  %v947_v51 = vpop.permute.xlu0 %946  ;;  %v1607_v42 = vsel %vm1584_vm2, %v1574_v29, %v3559_v22  ;;  %v4842_v22 = vld [vmem:[#allocation83_spill] sm:$0xff] }
 0x1c2   : > { %v3754_v35 = vsel %vm1617_vm3, %v1603_v21, %v947_v51  ;;  %v1544_v29 = vsel %vm1518_vm0, %v4842_v22, %v4841_v47  ;;  %v4849_v22 = vld [vmem:[#allocation82_spill] sm:$0xff] }
 0x1c6   : > { %1294 = vrot.lane.b32.xlu2 %v2502_v16, %s2818_s9  ;;  %1166 = vrot.lane.b32.xlu1 %v2470_v60, %s2819_s10  ;;  %v2503_v16 = vld [vmem:[%s2903_s30 + $0x39] sm:$0xff] }
 0x1c7   : > { %1100 = vrot.lane.b32.xlu0 %v3759_v46, %s2817_s8  ;;  %v2534_v60 = vld [vmem:[%s2903_s30 + $0x32] sm:$0xff]  ;;  %v1555_v46 = vsel %vm1551_vm1, %v1522_v62, %v4840_v56  ;;  %s4442_s8 = sand.u32 1, %s2795_s13  }
 0x1c8   : > { %v3772_v23 = vpop.permute.xlu2 %1038  ;;  %v955_v38 = vpop.permute.xlu1 %954  ;;  %v1588_v15 = vsel %vm1584_vm2, %v1555_v46, %v3525_v14  ;;  %s2371_s18 = sshll.u32 %s4442_s8, 8  ;;  %s2207_s26 = scalar_lea.sflag [#allocation4], %s4442_s8 }
 0x1c9   : > { %4837 = vst [vmem:[#allocation32_spill] sm:$0xff] %v3772_v23  ;;  %v3775_v21 = vsel %vm1617_vm3, %v1607_v42, %v955_v38  ;;  %v3777_v51 = vpop.permute.xlu0 %952  ;;  %v4843_v42 = vld [vmem:[#allocation46_spill] sm:$0xff]  ;;  %v4844_v38 = vld [vmem:[#allocation76_spill] sm:$0xff]  ;;  %v1577_v23 = vsel %vm1551_vm1, %v1544_v29, %v3491_v1  ;;  %s4456_s19 = scalar_lea.vmem [#allocation3], %s2371_s18 }
 0x1ca   : > { %v1543_v61 = vsel %vm1518_vm0, %v4844_v38, %v4843_v42  ;;  %s2227_s21 = sshll.u32 %s4456_s19, 4  ;;  %s2228_s21 = int_to_ptr.vmem [resolvable:$true] %s2227_s21 }
 0x1cb   : > { %v1576_v47 = vsel %vm1551_vm1, %v1543_v61, %v4845_v54 }
 0x1cc   : > { %v1609_v1 = vsel %vm1584_vm2, %v1576_v47, %v3609_v17  ;;  %v4848_v17 = vld [vmem:[#allocation51_spill] sm:$0xff] }
 0x1cd   : > { %v1546_v29 = vsel %vm1518_vm0, %v4849_v22, %v4848_v17  ;;  %v4855_v22 = vld [vmem:[#allocation88_spill] sm:$0xff] }
 0x1ce   : > { %1296 = vrot.lane.b32.xlu2 %v2503_v16, %s2818_s9  ;;  %1168 = vrot.lane.b32.xlu1 %v2471_v19, %s2819_s10  ;;  %v1610_v16 = vsel %vm1584_vm2, %v1577_v23, %v3571_v25  ;;  %v1621_v19 = vsel %vm1617_vm3, %v1588_v15, %v3659_v45  ;;  %v2535_v45 = vld [vmem:[%s2903_s30 + $0x3a] sm:$0xff]  ;;  %v1579_v42 = vsel %vm1551_vm1, %v1546_v29, %v3448_v49 }
 0x1cf   : > { %1422 = vrot.lane.b32.xlu0 %v2534_v60, %s2820_s11  ;;  %v4846_v23 = vld [vmem:[#allocation52_spill] sm:$0xff]  ;;  %v4847_v60 = vld [vmem:[#allocation43_spill] sm:$0xff]  ;;  %v1612_v54 = vsel %vm1584_vm2, %v1579_v42, %v3621_v39 }
 0x1d0   : > { %v1045_v62 = vpop.permute.xlu2 %1044  ;;  %v961_v56 = vpop.permute.xlu1 %960  ;;  %v4854_v39 = vld [vmem:[#allocation56_spill] sm:$0xff] }
 0x1d1   : > { %v3809_v14 = vsel %vm1650_vm4, %v1621_v19, %v1045_v62  ;;  %v3812_v46 = vsel %vm1617_vm3, %v1610_v16, %v961_v56  ;;  %v959_v61 = vpop.permute.xlu0 %958  ;;  %v2536_v19 = vld [vmem:[%s2903_s30 + $0x4a] sm:$0xff]  ;;  %v1549_v29 = vsel %vm1518_vm0, %v4855_v22, %v4854_v39 }
 0x1d2   : > { %v3815_v25 = vsel %vm1617_vm3, %v1609_v1, %v959_v61  ;;  %v2510_v62 = vld [vmem:[%s2903_s30 + $0x91] sm:$0xff]  ;;  %v2504_v56 = vld [vmem:[%s2903_s30 + $0x49] sm:$0xff] }
 0x1d3   : > { %v4850_v1 = vld [vmem:[#allocation23_spill] sm:$0xff] }
 0x1d4   : > { %v4851_v61 = vld [vmem:[#allocation47_spill] sm:$0xff] }
 0x1d6   : > { %1182 = vrot.lane.b32.xlu2 %v4846_v23, %s2819_s10  ;;  %1170 = vrot.lane.b32.xlu1 %v4847_v60, %s2819_s10  ;;  %v4852_v23 = vld [vmem:[#allocation54_spill] sm:$0xff]  ;;  %v4853_v60 = vld [vmem:[#allocation55_spill] sm:$0xff] }
 0x1d7   : > { %1424 = vrot.lane.b32.xlu0 %v2535_v45, %s2820_s11  ;;  %v1528_v45 = vsel %vm1518_vm0, %v4851_v61, %v4850_v1  ;;  %v1550_v17 = vsel %vm1518_vm0, %v3457_v55, %v4853_v60  ;;  %v1582_v55 = vsel %vm1551_vm1, %v1549_v29, %v3463_v30 }
 0x1d8   : > { %v3828_v38 = vpop.permute.xlu2 %1050  ;;  %v3830_v15 = vpop.permute.xlu1 %966  ;;  %v1561_v49 = vsel %vm1551_vm1, %v1528_v45, %v4852_v23  ;;  %v1583_v42 = vsel %vm1551_vm1, %v1550_v17, %v3515_v6  ;;  %v1615_v61 = vsel %vm1584_vm2, %v1582_v55, %v3633_v43  ;;  %v4856_v45 = vld [vmem:[#allocation13_spill] sm:$0xff]  ;;  %v4857_v23 = vld [vmem:[#allocation38_spill] sm:$0xff]  ;;  %v4859_v17 = vld [vmem:[#allocation59_spill] sm:$0xff] }
 0x1d9   : > { %v965_v47 = vpop.permute.xlu0 %964  ;;  %v4858_v43 = vld [vmem:[#allocation61_spill] sm:$0xff] }
 0x1da   : > { %v3835_v16 = vsel %vm1617_vm3, %v1612_v54, %v965_v47  ;;  %v1594_v54 = vsel %vm1584_vm2, %v1561_v49, %v3549_v20  ;;  %v1616_v47 = vsel %vm1584_vm2, %v1583_v42, %v3595_v31  ;;  %v2473_v31 = vld [vmem:[%s2903_s30 + $0x50] sm:$0xff]  ;;  %v1521_v49 = vsel %vm1518_vm0, %v4857_v23, %v4856_v45  ;;  %v4861_v23 = vld [vmem:[#allocation48_spill] sm:$0xff] }
 0x1db   : > { %v1554_v60 = vsel %vm1551_vm1, %v1521_v49, %v4858_v43  ;;  %v4860_v45 = vld [vmem:[#allocation19_spill] sm:$0xff]  ;;  %v4862_v43 = vld [vmem:[#allocation74_spill] sm:$0xff] }
 0x1dc   : > { %v1587_v39 = vsel %vm1584_vm2, %v1554_v60, %v3527_v9  ;;  %v1526_v49 = vsel %vm1518_vm0, %v4861_v23, %v4860_v45  ;;  %v4864_v45 = vld [vmem:[#allocation70_spill] sm:$0xff] }
 0x1dd   : > { %v1620_v22 = vsel %vm1617_vm3, %v1587_v39, %v3607_v34  ;;  %v4865_v23 = vld [vmem:[#allocation22_spill] sm:$0xff] }
 0x1de   : > { %1426 = vrot.lane.b32.xlu2 %v2536_v19, %s2820_s11  ;;  %1310 = vrot.lane.b32.xlu1 %v2510_v62, %s2818_s9  ;;  %v1627_v19 = vsel %vm1617_vm3, %v1594_v54, %v3683_v57  ;;  %v2542_v57 = vld [vmem:[%s2903_s30 + $0x92] sm:$0xff] }
 0x1df   : > { %1298 = vrot.lane.b32.xlu0 %v2504_v56, %s2818_s9 }
 0x1e0   : > { %v1057_v62 = vpop.permute.xlu2 %1056  ;;  %v973_v1 = vpop.permute.xlu1 %972 }
 0x1e1   : > { %v3867_v6 = vsel %vm1650_vm4, %v1627_v19, %v1057_v62  ;;  %v3870_v20 = vsel %vm1617_vm3, %v1616_v47, %v973_v1  ;;  %v971_v56 = vpop.permute.xlu0 %970  ;;  %v2486_v47 = vld [vmem:[%s2903_s30 + $0xf0] sm:$0xff]  ;;  %v2511_v19 = vld [vmem:[%s2903_s30 + $0x99] sm:$0xff] }
 0x1e2   : > { %v3873_v30 = vsel %vm1617_vm3, %v1615_v61, %v971_v56  ;;  %v2505_v62 = vld [vmem:[%s2903_s30 + $0x51] sm:$0xff] }
 0x1e3   : > { %v2518_v56 = vld [vmem:[%s2903_s30 + $0xf1] sm:$0xff] }
 0x1e6   : > { %1184 = vrot.lane.b32.xlu2 %v4859_v17, %s2819_s10  ;;  %1172 = vrot.lane.b32.xlu1 %v2473_v31, %s2819_s10  ;;  %v2543_v31 = vld [vmem:[%s2903_s30 + $0x9a] sm:$0xff] }
 0x1e7   : > { %1438 = vrot.lane.b32.xlu0 %v2542_v57, %s2820_s11  ;;  %v2537_v57 = vld [vmem:[%s2903_s30 + $0x52] sm:$0xff] }
 0x1e8   : > { %v3890_v29 = vpop.permute.xlu2 %1062  ;;  %v1043_v42 = vpop.permute.xlu1 %1042 }
 0x1e9   : > { %v3893_v54 = vsel %vm1650_vm4, %v1620_v22, %v1043_v42  ;;  %v3895_v55 = vpop.permute.xlu0 %1040 }
 0x1ee   : > { %1198 = vrot.lane.b32.xlu2 %v2486_v47, %s2819_s10  ;;  %1312 = vrot.lane.b32.xlu1 %v2511_v19, %s2818_s9 }
 0x1ef   : > { %1300 = vrot.lane.b32.xlu0 %v2505_v62, %s2818_s9 }
 0x1f0   : > { %v1069_v9 = vpop.permute.xlu2 %1068  ;;  %v3903_v34 = vpop.permute.xlu1 %1048 }
 0x1f1   : > { %v3907_v1 = vsel %vm1650_vm4, %v3723_v12, %v1069_v9  ;;  %v3909_v61 = vpop.permute.xlu0 %1046  ;;  %v1559_v12 = vsel %vm1551_vm1, %v1526_v49, %v4862_v43  ;;  %v2480_v9 = vld [vmem:[%s2903_s30 + $0xa8] sm:$0xff] }
 0x1f2   : > { %v1592_v60 = vsel %vm1584_vm2, %v1559_v12, %v3499_v7  ;;  %v4866_v49 = vld [vmem:[#allocation53_spill] sm:$0xff]  ;;  %v4867_v43 = vld [vmem:[#allocation78_spill] sm:$0xff]  ;;  %v4868_v12 = vld [vmem:[#allocation80_spill] sm:$0xff] }
 0x1f3   : > { %v1625_v42 = vsel %vm1617_vm3, %v1592_v60, %v3669_v59  ;;  %v1529_v59 = vsel %vm1518_vm0, %v4866_v49, %v4865_v23  ;;  %v2506_v49 = vld [vmem:[%s2903_s30 + $0x61] sm:$0xff] }
 0x1f4   : > { %v1562_v60 = vsel %vm1551_vm1, %v1529_v59, %v4868_v12  ;;  %v4869_v59 = vld [vmem:[#allocation15_spill] sm:$0xff]  ;;  %v4872_v12 = vld [vmem:[#allocation85_spill] sm:$0xff] }
 0x1f6   : > { %1326 = vrot.lane.b32.xlu2 %v2518_v56, %s2818_s9  ;;  %1440 = vrot.lane.b32.xlu1 %v2543_v31, %s2820_s11  ;;  %v2474_v56 = vld [vmem:[%s2903_s30 + $0x60] sm:$0xff]  ;;  %v2550_v31 = vld [vmem:[%s2903_s30 + $0xf2] sm:$0xff] }
 0x1f7   : > { %1428 = vrot.lane.b32.xlu0 %v2537_v57, %s2820_s11  ;;  %v4863_v57 = vld [vmem:[#allocation42_spill] sm:$0xff] }
 0x1f8   : > { %v1075_v39 = vpop.permute.xlu2 %1074  ;;  %v3924_v22 = vpop.permute.xlu1 %1054  ;;  %v1540_v7 = vsel %vm1518_vm0, %v4864_v45, %v4863_v57 }
 0x1f9   : > { %v3930_v47 = vsel %vm1650_vm4, %v3754_v35, %v1075_v39  ;;  %v1053_v19 = vpop.permute.xlu0 %1052  ;;  %v1573_v35 = vsel %vm1551_vm1, %v1540_v7, %v4867_v43 }
 0x1fa   : > { %v3933_v62 = vsel %vm1650_vm4, %v1625_v42, %v1053_v19  ;;  %v1606_v39 = vsel %vm1584_vm2, %v1573_v35, %v3597_v32  ;;  %v1595_v42 = vsel %vm1584_vm2, %v1562_v60, %v3511_v10  ;;  %v4870_v10 = vld [vmem:[#allocation57_spill] sm:$0xff]  ;;  %v4873_v60 = vld [vmem:[#allocation86_spill] sm:$0xff] }
 0x1fb   : > { %v1639_v19 = vsel %vm1617_vm3, %v1606_v39, %v3777_v51  ;;  %v1533_v43 = vsel %vm1518_vm0, %v4870_v10, %v4869_v59  ;;  %v4871_v51 = vld [vmem:[#allocation25_spill] sm:$0xff]  ;;  %v4874_v10 = vld [vmem:[#allocation18_spill] sm:$0xff] }
 0x1fc   : > { %v1532_v35 = vsel %vm1518_vm0, %v4859_v17, %v4871_v51  ;;  %v2544_v59 = vld [vmem:[%s2903_s30 + $0xaa] sm:$0xff] }
 0x1fd   : > { %v1565_v39 = vsel %vm1551_vm1, %v1532_v35, %v4873_v60  ;;  %v4876_v51 = vld [vmem:[#allocation90_spill] sm:$0xff] }
 0x1fe   : > { %1186 = vrot.lane.b32.xlu2 %v2480_v9, %s2819_s10  ;;  %1174 = vrot.lane.b32.xlu1 %v2474_v56, %s2819_s10  ;;  %v1628_v9 = vsel %vm1617_vm3, %v1595_v42, %v3681_v5  ;;  %v1566_v5 = vsel %vm1551_vm1, %v1533_v43, %v4872_v12  ;;  %v1598_v17 = vsel %vm1584_vm2, %v1565_v39, %v3523_v13  ;;  %v2519_v13 = vld [vmem:[%s2903_s30 + $0xf9] sm:$0xff] }
 0x1ff   : > { %1454 = vrot.lane.b32.xlu0 %v2550_v31, %s2820_s11  ;;  %v2512_v31 = vld [vmem:[%s2903_s30 + $0xa9] sm:$0xff]  ;;  %v1599_v42 = vsel %vm1584_vm2, %v1566_v5, %v3575_v26  ;;  %v4875_v43 = vld [vmem:[#allocation63_spill] sm:$0xff] }
 0x200   : > { %v1081_v57 = vpop.permute.xlu2 %1080  ;;  %v3957_v7 = vpop.permute.xlu1 %1060 }
 0x201   : > { %v3962_v56 = vsel %vm1650_vm4, %v1639_v19, %v1081_v57  ;;  %v1059_v23 = vpop.permute.xlu0 %1058  ;;  %v1632_v19 = vsel %vm1617_vm3, %v1599_v42, %v3655_v52  ;;  %v2538_v52 = vld [vmem:[%s2903_s30 + $0x62] sm:$0xff] }
 0x202   : > { %v3965_v32 = vsel %vm1650_vm4, %v1628_v9, %v1059_v23 }
 0x206   : > { %1200 = vrot.lane.b32.xlu2 %v4864_v45, %s2819_s10  ;;  %1314 = vrot.lane.b32.xlu1 %v2512_v31, %s2818_s9  ;;  %v1631_v45 = vsel %vm1617_vm3, %v1598_v17, %v3693_v36  ;;  %v1536_v36 = vsel %vm1518_vm0, %v4875_v43, %v4874_v10 }
 0x207   : > { %1302 = vrot.lane.b32.xlu0 %v2506_v49, %s2818_s9 }
 0x208   : > { %v1087_v57 = vpop.permute.xlu2 %1086  ;;  %v1067_v9 = vpop.permute.xlu1 %1066 }
 0x209   : > { %v3993_v23 = vsel %vm1650_vm4, %v3815_v25, %v1087_v57  ;;  %v3996_v31 = vsel %vm1650_vm4, %v1632_v19, %v1067_v9  ;;  %v1065_v26 = vpop.permute.xlu0 %1064  ;;  %v1569_v25 = vsel %vm1551_vm1, %v1536_v36, %v4876_v51  ;;  %v2475_v57 = vld [vmem:[%s2903_s30 + $0x68] sm:$0xff]  ;;  %v2551_v9 = vld [vmem:[%s2903_s30 + $0xfa] sm:$0xff]  ;;  %v2513_v51 = vld [vmem:[%s2903_s30 + $0xb1] sm:$0xff] }
 0x20a   : > { %v3999_v49 = vsel %vm1650_vm4, %v1631_v45, %v1065_v26  ;;  %v1602_v35 = vsel %vm1584_vm2, %v1569_v25, %v3587_v24  ;;  %v2481_v24 = vld [vmem:[%s2903_s30 + $0xb0] sm:$0xff]  ;;  %v4877_v45 = vld [vmem:[#allocation21_spill] sm:$0xff] }
 0x20b   : > { %v1635_v12 = vsel %vm1617_vm3, %v1602_v35, %v3667_v58  ;;  %v4878_v26 = vld [vmem:[#allocation69_spill] sm:$0xff]  ;;  %v1784_v35 = vld [vmem:[%s4682_s1 + $0x10] sm:$0xff] }
 0x20c   : > { %v1539_v58 = vsel %vm1518_vm0, %v4878_v26, %v4877_v45  ;;  %v2507_v25 = vld [vmem:[%s2903_s30 + $0x69] sm:$0xff]  ;;  %v1782_v26 = vld [vmem:[%s4682_s1] sm:$0xff] }
 0x20e   : > { %1328 = vrot.lane.b32.xlu2 %v2519_v13, %s2818_s9  ;;  %1442 = vrot.lane.b32.xlu1 %v2544_v59, %s2820_s11  ;;  %v1572_v13 = vsel %vm1551_vm1, %v1539_v58, %v3465_v44 }
 0x20f   : > { %1430 = vrot.lane.b32.xlu0 %v2538_v52, %s2820_s11 }
 0x210   : > { %v1093_v5 = vpop.permute.xlu2 %1092  ;;  %v1073_v60 = vpop.permute.xlu1 %1072 }
 0x211   : > { %v4018_v39 = vsel %vm1650_vm4, %v3835_v16, %v1093_v5  ;;  %v4021_v42 = vsel %vm1650_vm4, %v1635_v12, %v1073_v60  ;;  %v1071_v17 = vpop.permute.xlu0 %1070  ;;  %v4879_v12 = vld [vmem:[#allocation24_spill] sm:$0xff] }
 0x212   : > { %v4025_v19 = vsel %vm1650_vm4, %v3720_v40, %v1071_v17  ;;  %v1605_v40 = vsel %vm1584_vm2, %v1572_v13, %v3599_v27  ;;  %v1786_v27 = vld [vmem:[%s4682_s1 + $0x20] sm:$0xf]  ;;  %v2539_v13 = vld [vmem:[%s2903_s30 + $0x6a] sm:$0xff] }
 0x213   : > { %v1638_v16 = vsel %vm1617_vm3, %v1605_v40, %v3679_v2  ;;  %2566 = vmatpush.msk.msra.mxu0 %vm1884_vm5, %v1786_v27  ;;  %v1785_v2 = vld [vmem:[%s4682_s1 + $0x18] sm:$0xff]  ;;  %2608 = vmatpush.msk.msra.mxu1 %vm1884_vm5, %v1786_v27 }
 0x214   : > { %2609 = vmatpush.msk.msra.mxu2 %vm1884_vm5, %v1786_v27  ;;  %2610 = vmatpush.msk.msra.mxu3 %vm1884_vm5, %v1786_v27  ;;  %v4881_v40 = vld [vmem:[#allocation28_spill] sm:$0xff] }
 0x215   : > { %1900 = vmatpush.msra.mxu0 %v1785_v2  ;;  %2611 = vmatpush.msra.mxu1 %v1785_v2 }
 0x216   : > { %1188 = vrot.lane.b32.xlu2 %v2481_v24, %s2819_s10  ;;  %1176 = vrot.lane.b32.xlu1 %v2475_v57, %s2819_s10  ;;  %v1783_v24 = vld [vmem:[%s4682_s1 + $0x8] sm:$0xff] }
 0x217   : > { %1456 = vrot.lane.b32.xlu0 %v2551_v9, %s2820_s11  ;;  %2612 = vmatpush.msra.mxu2 %v1785_v2 }
 0x218   : > { %v1099_v59 = vpop.permute.xlu2 %1098  ;;  %v1079_v52 = vpop.permute.xlu1 %1078  ;;  %2613 = vmatpush.msra.mxu3 %v1785_v2  ;;  %1901 = vmatpush.msra.mxu0 %v1784_v35 }
 0x219   : > { %v4044_v44 = vsel %vm1650_vm4, %v3873_v30, %v1099_v59  ;;  %v4047_v10 = vsel %vm1650_vm4, %v1638_v16, %v1079_v52  ;;  %v1077_v43 = vpop.permute.xlu0 %1076  ;;  %v2488_v30 = vld [vmem:[%s2903_s30 + $0x108] sm:$0xff]  ;;  %2614 = vmatpush.msra.mxu1 %v1784_v35  ;;  %2615 = vmatpush.msra.mxu2 %v1784_v35 }
 0x21a   : > { %v4054_v36 = vsel %vm1650_vm4, %v3751_v63, %v1077_v43  ;;  %v4880_v63 = vld [vmem:[#allocation75_spill] sm:$0xff]  ;;  %1902 = vmatpush.msra.mxu0 %v1783_v24  ;;  %2616 = vmatpush.msra.mxu3 %v1784_v35  ;;  %v4882_v16 = vld [vmem:[#allocation81_spill] sm:$0xff] }
 0x21b   : > { %v1542_v5 = vsel %vm1518_vm0, %v4880_v63, %v4879_v12  ;;  %2617 = vmatpush.msra.mxu1 %v1783_v24  ;;  %2618 = vmatpush.msra.mxu2 %v1783_v24  ;;  %v1545_v59 = vsel %vm1518_vm0, %v4882_v16, %v4881_v40  ;;  %v4883_v43 = vld [vmem:[#allocation89_spill] sm:$0xff]  ;;  %v2526_v12 = vld [vmem:[%s2903_s30 + $0x151] sm:$0xff] }
 0x21c   : > { %v1575_v60 = vsel %vm1551_vm1, %v1542_v5, %v3477_v50  ;;  %1903 = vmatpush.msra.mxu0 %v1782_v26  ;;  %2619 = vmatpush.msra.mxu3 %v1783_v24  ;;  %v2552_v35 = vld [vmem:[%s2903_s30 + $0x10a] sm:$0xff]  ;;  %v4885_v5 = vld [vmem:[#allocation87_spill] sm:$0xff]  ;;  %v2482_v40 = vld [vmem:[%s2903_s30 + $0xc0] sm:$0xff] }
 0x21d   : > { %v1608_v17 = vsel %vm1584_vm2, %v1575_v60, %v3611_v18  ;;  %2620 = vmatpush.msra.mxu1 %v1782_v26  ;;  %2621 = vmatpush.msra.mxu2 %v1782_v26  ;;  %v4884_v63 = vld [vmem:[#allocation34_spill] sm:$0xff] }
 0x21e   : > { %1202 = vrot.lane.b32.xlu2 %v2488_v30, %s2819_s10  ;;  %1316 = vrot.lane.b32.xlu1 %v2513_v51, %s2818_s9  ;;  %v1641_v57 = vsel %vm1617_vm3, %v1608_v17, %v3691_v48  ;;  %v2545_v48 = vld [vmem:[%s2903_s30 + $0xb2] sm:$0xff]  ;;  %v1548_v60 = vsel %vm1518_vm0, %v4885_v5, %v4884_v63 }
 0x21f   : > { %1304 = vrot.lane.b32.xlu0 %v2507_v25, %s2818_s9  ;;  %2622 = vmatpush.msra.mxu3 %v1782_v26  ;;  %v4886_v17 = vld [vmem:[#allocation50_spill] sm:$0xff]  ;;  %v1581_v24 = vsel %vm1551_vm1, %v1548_v60, %v3501_v8  ;;  %v2508_v5 = vld [vmem:[%s2903_s30 + $0x79] sm:$0xff] }
 0x220   : > { %v4080_v50 = vpop.permute.xlu2 %1294  ;;  %v1085_v9 = vpop.permute.xlu1 %1084  ;;  %v2558_v16 = vld [vmem:[%s2903_s30 + $0x152] sm:$0xff]  ;;  %v4889_v60 = vld [vmem:[#allocation32_spill] sm:$0xff] }
 0x221   : > { %v4083_v45 = vsel %vm1650_vm4, %v1641_v57, %v1085_v9  ;;  %v1083_v18 = vpop.permute.xlu0 %1082  ;;  %v1614_v57 = vsel %vm1584_vm2, %v1581_v24, %v3635_v37 }
 0x222   : > { %v4090_v58 = vsel %vm1650_vm4, %v3775_v21, %v1083_v18  ;;  %v1578_v21 = vsel %vm1551_vm1, %v1545_v59, %v3489_v4  ;;  %v1647_v8 = vsel %vm1617_vm3, %v1614_v57, %v3746_v53  ;;  %v200_v53 = vld [vmem:[%s2903_s30] sm:$0xff] }
 0x223   : > { %v1611_v52 = vsel %vm1584_vm2, %v1578_v21, %v3623_v33  ;;  %v2520_v33 = vld [vmem:[%s2903_s30 + $0x109] sm:$0xff] }
 0x224   : > { %v1644_v27 = vsel %vm1617_vm3, %v1611_v52, %v3715_v0  ;;  %v1547_v0 = vsel %vm1518_vm0, %v4883_v43, %v4886_v17  ;;  %v4887_v21 = vld [vmem:[#allocation14_spill] sm:$0xff] }
 0x225   : > { %v1519_v52 = vsel %vm1518_vm0, %v200_v53, %v4887_v21  ;;  %v4893_v53 = vld [vmem:[#allocation101_spill] sm:$0xff]  ;;  %v2495_v21 = vld [vmem:[%s2903_s30 + $0x158] sm:$0xff] }
 0x226   : > { %1444 = vrot.lane.b32.xlu2 %v2545_v48, %s2820_s11  ;;  %1432 = vrot.lane.b32.xlu1 %v2539_v13, %s2820_s11 }
 0x227   : > { %1214 = vrot.lane.b32.xlu0 %v4883_v43, %s2819_s10 }
 0x228   : > { %v4107_v2 = vpop.permute.xlu2 %1296  ;;  %v1091_v30 = vpop.permute.xlu1 %1090 }
 0x229   : > { %v4110_v51 = vsel %vm1650_vm4, %v1644_v27, %v1091_v30  ;;  %v1089_v4 = vpop.permute.xlu0 %1088  ;;  %v4888_v27 = vld [vmem:[#allocation40_spill] sm:$0xff] }
 0x22a   : > { %v4114_v25 = vsel %vm1650_vm4, %v3812_v46, %v1089_v4  ;;  %v1580_v46 = vsel %vm1551_vm1, %v1547_v0, %v3503_v3  ;;  %v1552_v30 = vsel %vm1551_vm1, %v1519_v52, %v4888_v27  ;;  %v201_v0 = vld [vmem:[%s2903_s30 + $0x8] sm:$0xff] }
 0x22b   : > { %v1613_v9 = vsel %vm1584_vm2, %v1580_v46, %v3583_v28  ;;  %v2476_v28 = vld [vmem:[%s2903_s30 + $0x78] sm:$0xff] }
 0x22c   : > { %v1646_v48 = vsel %vm1617_vm3, %v1613_v9, %v3830_v15 }
 0x22e   : > { %1458 = vrot.lane.b32.xlu2 %v2552_v35, %s2820_s11  ;;  %1342 = vrot.lane.b32.xlu1 %v2526_v12, %s2818_s9  ;;  %v1585_v35 = vsel %vm1584_vm2, %v1552_v30, %v3513_v11  ;;  %v2489_v12 = vld [vmem:[%s2903_s30 + $0x110] sm:$0xff] }
 0x22f   : > { %1330 = vrot.lane.b32.xlu0 %v2520_v33, %s2818_s9  ;;  %v2514_v33 = vld [vmem:[%s2903_s30 + $0xc1] sm:$0xff]  ;;  %v1618_v63 = vsel %vm1617_vm3, %v1585_v35, %v3647_v41 }
 0x230   : > { %v4138_v18 = vpop.permute.xlu2 %1182  ;;  %v1097_v26 = vpop.permute.xlu1 %1096  ;;  %v1651_v17 = vsel %vm1650_vm4, %v1618_v63, %v4889_v60  ;;  %v2521_v63 = vld [vmem:[%s2903_s30 + $0x111] sm:$0xff] }
 0x231   : > { %v4143_v13 = vsel %vm1650_vm4, %v1647_v8, %v1097_v26  ;;  %v1095_v3 = vpop.permute.xlu0 %1094  ;;  %v4891_v8 = vld [vmem:[#allocation62_spill] sm:$0xff] }
 0x232   : > { %v4146_v37 = vsel %vm1650_vm4, %v1646_v48, %v1095_v3  ;;  %v4892_v3 = vld [vmem:[#allocation91_spill] sm:$0xff] }
 0x236   : > { %1190 = vrot.lane.b32.xlu2 %v2482_v40, %s2819_s10  ;;  %1178 = vrot.lane.b32.xlu1 %v2476_v28, %s2819_s10  ;;  %v2546_v28 = vld [vmem:[%s2903_s30 + $0xc2] sm:$0xff] }
 0x237   : > { %1470 = vrot.lane.b32.xlu0 %v2558_v16, %s2820_s11  ;;  %v2540_v16 = vld [vmem:[%s2903_s30 + $0x7a] sm:$0xff] }
 0x238   : > { %v1427_v15 = vpop.permute.xlu2 %1426  ;;  %v1167_v59 = vpop.permute.xlu1 %1166 }
 0x239   : > { %v1101_v43 = vpop.permute.xlu0 %1100  ;;  %v1684_v24 = vsel %vm1683_vm6, %v1651_v17, %v1167_v59 }
 0x23a   : > { %v4161_v4 = vsel %vm1650_vm4, %v3870_v20, %v1101_v43  ;;  %v4890_v20 = vld [vmem:[#allocation17_spill] sm:$0xff]  ;;  %v1717_v9 = vsel %vm1716_vm7, %v1684_v24, %v4080_v50 }
 0x23b   : > { %v1520_v46 = vsel %vm1518_vm0, %v201_v0, %v4890_v20  ;;  %v2694_v24 = vld [vmem:[%s2903_s30 + $0x60] sm:$0xff] }
 0x23c   : > { %v1553_v26 = vsel %vm1551_vm1, %v1520_v46, %v4891_v8  ;;  %v4895_v8 = vld [vmem:[#allocation73_spill] sm:$0xff] }
 0x23d   : > { %v1586_v40 = vsel %vm1584_vm2, %v1553_v26, %v4892_v3 }
 0x23e   : > { %1204 = vrot.lane.b32.xlu2 %v2489_v12, %s2819_s10  ;;  %1318 = vrot.lane.b32.xlu1 %v2514_v33, %s2818_s9  ;;  %v1619_v59 = vsel %vm1617_vm3, %v1586_v40, %v4893_v53  ;;  %v2527_v33 = vld [vmem:[%s2903_s30 + $0x159] sm:$0xff] }
 0x23f   : > { %1306 = vrot.lane.b32.xlu0 %v2508_v5, %s2818_s9  ;;  %v1652_v50 = vsel %vm1650_vm4, %v1619_v59, %v3895_v55  ;;  %v2553_v55 = vld [vmem:[%s2903_s30 + $0x112] sm:$0xff] }
 0x240   : > { %v4177_v11 = vpop.permute.xlu2 %1184  ;;  %v1169_v41 = vpop.permute.xlu1 %1168  ;;  %v4897_v40 = vld [vmem:[#allocation99_spill] sm:$0xff] }
 0x241   : > { %v1423_v57 = vpop.permute.xlu0 %1422  ;;  %v1685_v52 = vsel %vm1683_vm6, %v1652_v50, %v1169_v41  ;;  %v4894_v41 = vld [vmem:[#allocation11_spill] sm:$0xff] }
 0x242   : > { %v1750_v48 = vsel %vm1749_vm8, %v1717_v9, %v1423_v57  ;;  %v1718_v35 = vsel %vm1716_vm7, %v1685_v52, %v4107_v2  ;;  %v1527_v20 = vsel %vm1518_vm0, %v2694_v24, %v4894_v41  ;;  %v2483_v57 = vld [vmem:[%s2903_s30 + $0xc8] sm:$0xff]  ;;  %v2477_v9 = vld [vmem:[%s2903_s30 + $0x80] sm:$0xff] }
 0x243   : > { %2567 = vmatmul.msk.f32.vlgmr.msra.gmra.mxu0 %vm1787_vm9, %v1750_v48  ;;  %v1560_v26 = vsel %vm1551_vm1, %v1527_v20, %v4895_v8  ;;  %v2559_v48 = vld [vmem:[%s2903_s30 + $0x15a] sm:$0xff] }
 0x246   : > { %1446 = vrot.lane.b32.xlu2 %v2546_v28, %s2820_s11  ;;  %1434 = vrot.lane.b32.xlu1 %v2540_v16, %s2820_s11 }
 0x247   : > { %1216 = vrot.lane.b32.xlu0 %v2495_v21, %s2819_s10 }
 0x248   : > { %v4200_v43 = vpop.permute.xlu2 %1198  ;;  %v1171_v27 = vpop.permute.xlu1 %1170 }
 0x249   : > { %v1425_v30 = vpop.permute.xlu0 %1424  ;;  %v1686_v2 = vsel %vm1683_vm6, %v3893_v54, %v1171_v27  ;;  %v4896_v54 = vld [vmem:[#allocation95_spill] sm:$0xff]  ;;  %v2490_v27 = vld [vmem:[%s2903_s30 + $0x120] sm:$0xff] }
 0x24a   : > { %v1751_v12 = vsel %vm1749_vm8, %v1718_v35, %v1425_v30  ;;  %v1593_v3 = vsel %vm1584_vm2, %v1560_v26, %v4896_v54  ;;  %v2509_v30 = vld [vmem:[%s2903_s30 + $0x81] sm:$0xff] }
 0x24b   : > { %2568 = vmatmul.msk.f32.gmra.mxu0 %vm1787_vm9, %v1751_v12  ;;  %v1626_v28 = vsel %vm1617_vm3, %v1593_v3, %v4897_v40  ;;  %v2516_v40 = vld [vmem:[%s2903_s30 + $0xd9] sm:$0xff] }
 0x24e   : > { %1460 = vrot.lane.b32.xlu2 %v2553_v55, %s2820_s11  ;;  %1344 = vrot.lane.b32.xlu1 %v2527_v33, %s2818_s9  ;;  %v2547_v55 = vld [vmem:[%s2903_s30 + $0xca] sm:$0xff]  ;;  %v2541_v33 = vld [vmem:[%s2903_s30 + $0x82] sm:$0xff] }
 0x24f   : > { %1332 = vrot.lane.b32.xlu0 %v2521_v63, %s2818_s9  ;;  %v2496_v63 = vld [vmem:[%s2903_s30 + $0x168] sm:$0xff] }
 0x250   : > { %v1327_v5 = vpop.permute.xlu2 %1326  ;;  %v1311_v60 = vpop.permute.xlu1 %1310 }
 0x251   : > { %v1299_v17 = vpop.permute.xlu0 %1298 }
 0x252   : > { %v1719_v0 = vsel %vm1716_vm7, %v1686_v2, %v1299_v17 }
 0x253   : > { %v1752_v46 = vsel %vm1749_vm8, %v1719_v0, %v1427_v15  ;;  %v1659_v15 = vsel %vm1650_vm4, %v1626_v28, %v3924_v22  ;;  %v2515_v22 = vld [vmem:[%s2903_s30 + $0xc9] sm:$0xff]  ;;  %v2484_v28 = vld [vmem:[%s2903_s30 + $0xd8] sm:$0xff] }
 0x254   : > { %2569 = vmatmul.msk.f32.gmra.mxu0 %vm1787_vm9, %v1752_v46  ;;  %v1692_v16 = vsel %vm1683_vm6, %v1659_v15, %v4138_v18  ;;  %v2560_v15 = vld [vmem:[%s2903_s30 + $0x16a] sm:$0xff] }
 0x255   : > { %v1725_v21 = vsel %vm1716_vm7, %v1692_v16, %v1311_v60  ;;  %v1693_v60 = vsel %vm1683_vm6, %v3867_v6, %v4177_v11  ;;  %v2528_v6 = vld [vmem:[%s2903_s30 + $0x169] sm:$0xff]  ;;  %v2522_v11 = vld [vmem:[%s2903_s30 + $0x121] sm:$0xff] }
 0x256   : > { %1192 = vrot.lane.b32.xlu2 %v2483_v57, %s2819_s10  ;;  %1180 = vrot.lane.b32.xlu1 %v2477_v9, %s2819_s10  ;;  %v1700_v9 = vsel %vm1683_vm6, %v4025_v19, %v4200_v43  ;;  %v2695_v16 = vld [vmem:[%s2903_s30 + $0x30] sm:$0xff] }
 0x257   : > { %1472 = vrot.lane.b32.xlu0 %v2559_v48, %s2820_s11  ;;  %v1733_v48 = vsel %vm1716_vm7, %v1700_v9, %v1327_v5 }
 0x258   : > { %v4236_v53 = vpop.permute.xlu2 %1186  ;;  %v1173_v59 = vpop.permute.xlu1 %1172 }
 0x259   : > { %v1439_v50 = vpop.permute.xlu0 %1438  ;;  %v1687_v2 = vsel %vm1683_vm6, %v3809_v14, %v1173_v59  ;;  %v2554_v14 = vld [vmem:[%s2903_s30 + $0x122] sm:$0xff] }
 0x25a   : > { %v1758_v52 = vsel %vm1749_vm8, %v1725_v21, %v1439_v50  ;;  %v4898_v59 = vld [vmem:[#allocation9_spill] sm:$0xff]  ;;  %v2548_v50 = vld [vmem:[%s2903_s30 + $0xda] sm:$0xff] }
 0x25b   : > { %2575 = vmatmul.msk.f32.vlgmr.msra.gmra.mxu1 %vm1787_vm9, %v1758_v52  ;;  %v1523_v21 = vsel %vm1518_vm0, %v2695_v16, %v4898_v59  ;;  %v2497_v52 = vld [vmem:[%s2903_s30 + $0x170] sm:$0xff]  ;;  %v4904_v16 = vld [vmem:[#allocation97_spill] sm:$0xff] }
 0x25e   : > { %1206 = vrot.lane.b32.xlu2 %v2490_v27, %s2819_s10  ;;  %1320 = vrot.lane.b32.xlu1 %v2515_v22, %s2818_s9  ;;  %v4899_v27 = vld [vmem:[#allocation68_spill] sm:$0xff] }
 0x25f   : > { %1308 = vrot.lane.b32.xlu0 %v2509_v30, %s2818_s9  ;;  %v1556_v22 = vsel %vm1551_vm1, %v1523_v21, %v4899_v27  ;;  %v2491_v30 = vld [vmem:[%s2903_s30 + $0x128] sm:$0xff] }
 0x260   : > { %v4247_v18 = vpop.permute.xlu2 %1200  ;;  %v1313_v35 = vpop.permute.xlu1 %1312 }
 0x261   : > { %v1301_v12 = vpop.permute.xlu0 %1300  ;;  %v1726_v17 = vsel %vm1716_vm7, %v1693_v60, %v1313_v35  ;;  %v4900_v35 = vld [vmem:[#allocation92_spill] sm:$0xff]  ;;  %v1694_v60 = vsel %vm1683_vm6, %v3965_v32, %v4236_v53  ;;  %v2555_v32 = vld [vmem:[%s2903_s30 + $0x12a] sm:$0xff] }
 0x262   : > { %v1720_v41 = vsel %vm1716_vm7, %v1687_v2, %v1301_v12  ;;  %v1589_v12 = vsel %vm1584_vm2, %v1556_v22, %v4900_v35  ;;  %v2529_v53 = vld [vmem:[%s2903_s30 + $0x171] sm:$0xff] }
 0x266   : > { %1448 = vrot.lane.b32.xlu2 %v2547_v55, %s2820_s11  ;;  %1436 = vrot.lane.b32.xlu1 %v2541_v33, %s2820_s11  ;;  %v4901_v55 = vld [vmem:[#allocation102_spill] sm:$0xff] }
 0x267   : > { %1218 = vrot.lane.b32.xlu0 %v2496_v63, %s2819_s10  ;;  %v1622_v33 = vsel %vm1617_vm3, %v1589_v12, %v4901_v55  ;;  %v2697_v12 = vld [vmem:[%s2903_s30 + $0x38] sm:$0xff]  ;;  %v4906_v55 = vld [vmem:[#allocation10_spill] sm:$0xff] }
 0x268   : > { %v4261_v0 = vpop.permute.xlu2 %1328  ;;  %v1441_v24 = vpop.permute.xlu1 %1440  ;;  %v1655_v63 = vsel %vm1650_vm4, %v1622_v33, %v3909_v61  ;;  %v1524_v33 = vsel %vm1518_vm0, %v2697_v12, %v4906_v55  ;;  %v4913_v55 = vld [vmem:[#allocation96_spill] sm:$0xff] }
 0x269   : > { %v1429_v20 = vpop.permute.xlu0 %1428  ;;  %v1759_v46 = vsel %vm1749_vm8, %v1726_v17, %v1441_v24 }
 0x26a   : > { %v1753_v57 = vsel %vm1749_vm8, %v1720_v41, %v1429_v20  ;;  %2576 = vmatmul.msk.f32.gmra.mxu1 %vm1787_vm9, %v1759_v46 }
 0x26b   : > { %2570 = vmatmul.msk.f32.gmra.mxu0 %vm1787_vm9, %v1753_v57 }
 0x26e   : > { %1462 = vrot.lane.b32.xlu2 %v2554_v14, %s2820_s11  ;;  %1346 = vrot.lane.b32.xlu1 %v2528_v6, %s2818_s9  ;;  %v2523_v14 = vld [vmem:[%s2903_s30 + $0x129] sm:$0xff]  ;;  %v1701_v6 = vsel %vm1683_vm6, %v4021_v42, %v4247_v18  ;;  %v2561_v18 = vld [vmem:[%s2903_s30 + $0x172] sm:$0xff] }
 0x26f   : > { %1334 = vrot.lane.b32.xlu0 %v2522_v11, %s2818_s9 }
 0x270   : > { %v4277_v8 = vpop.permute.xlu2 %1188  ;;  %v1175_v26 = vpop.permute.xlu1 %1174 }
 0x271   : > { %v1455_v54 = vpop.permute.xlu0 %1454  ;;  %v1688_v2 = vsel %vm1683_vm6, %v1655_v63, %v1175_v26  ;;  %v1734_v26 = vsel %vm1716_vm7, %v1701_v6, %v4261_v0  ;;  %v4905_v0 = vld [vmem:[#allocation100_spill] sm:$0xff] }
 0x272   : > { %v1766_v3 = vsel %vm1749_vm8, %v1733_v48, %v1455_v54 }
 0x273   : > { %2583 = vmatmul.msk.f32.vlgmr.msra.gmra.mxu2 %vm1787_vm9, %v1766_v3  ;;  %v2696_v3 = vld [vmem:[%s2903_s30 + $0x80] sm:$0xff] }
 0x276   : > { %1322 = vrot.lane.b32.xlu2 %v2516_v40, %s2818_s9  ;;  %1194 = vrot.lane.b32.xlu1 %v2484_v28, %s2819_s10  ;;  %v4902_v40 = vld [vmem:[#allocation12_spill] sm:$0xff] }
 0x277   : > { %1474 = vrot.lane.b32.xlu0 %v2560_v15, %s2820_s11  ;;  %v1530_v28 = vsel %vm1518_vm0, %v2696_v3, %v4902_v40  ;;  %v2517_v15 = vld [vmem:[%s2903_s30 + $0xe1] sm:$0xff] }
 0x278   : > { %v4288_v19 = vpop.permute.xlu2 %1202  ;;  %v1315_v43 = vpop.permute.xlu1 %1314 }
 0x279   : > { %v1303_v5 = vpop.permute.xlu0 %1302  ;;  %v1727_v17 = vsel %vm1716_vm7, %v1694_v60, %v1315_v43  ;;  %v2485_v43 = vld [vmem:[%s2903_s30 + $0xe0] sm:$0xff]  ;;  %v4907_v60 = vld [vmem:[#allocation67_spill] sm:$0xff]  ;;  %v1702_v40 = vsel %vm1683_vm6, %v3930_v47, %v4288_v19 }
 0x27a   : > { %v1721_v20 = vsel %vm1716_vm7, %v1688_v2, %v1303_v5  ;;  %v4903_v5 = vld [vmem:[#allocation79_spill] sm:$0xff]  ;;  %v2549_v2 = vld [vmem:[%s2903_s30 + $0xe2] sm:$0xff] }
 0x27b   : > { %v1563_v42 = vsel %vm1551_vm1, %v1530_v28, %v4903_v5  ;;  %v2499_v5 = vld [vmem:[%s2903_s30 + $0x188] sm:$0xff] }
 0x27c   : > { %v1596_v59 = vsel %vm1584_vm2, %v1563_v42, %v4904_v16  ;;  %v2493_v42 = vld [vmem:[%s2903_s30 + $0x140] sm:$0xff] }
 0x27d   : > { %v1629_v21 = vsel %vm1617_vm3, %v1596_v59, %v4905_v0 }
 0x27e   : > { %1450 = vrot.lane.b32.xlu2 %v2548_v50, %s2820_s11  ;;  %1220 = vrot.lane.b32.xlu1 %v2497_v52, %s2819_s10  ;;  %v1662_v50 = vsel %vm1650_vm4, %v1629_v21, %v3957_v7  ;;  %v1557_v7 = vsel %vm1551_vm1, %v1524_v33, %v4907_v60  ;;  %v2699_v21 = vld [vmem:[%s2903_s30 + $0x90] sm:$0xff] }
 0x27f   : > { %1208 = vrot.lane.b32.xlu0 %v2491_v30, %s2819_s10  ;;  %v1695_v52 = vsel %vm1683_vm6, %v1662_v50, %v4277_v8  ;;  %v2498_v8 = vld [vmem:[%s2903_s30 + $0x180] sm:$0xff]  ;;  %v4911_v50 = vld [vmem:[#allocation26_spill] sm:$0xff] }
 0x280   : > { %v1445_v24 = vpop.permute.xlu2 %1444  ;;  %v1443_v41 = vpop.permute.xlu1 %1442 }
 0x281   : > { %v1431_v46 = vpop.permute.xlu0 %1430  ;;  %v1760_v57 = vsel %vm1749_vm8, %v1727_v17, %v1443_v41  ;;  %v4908_v17 = vld [vmem:[#allocation94_spill] sm:$0xff] }
 0x282   : > { %v1754_v61 = vsel %vm1749_vm8, %v1721_v20, %v1431_v46  ;;  %2577 = vmatmul.msk.f32.gmra.mxu1 %vm1787_vm9, %v1760_v57  ;;  %v1590_v41 = vsel %vm1584_vm2, %v1557_v7, %v4908_v17  ;;  %v2492_v20 = vld [vmem:[%s2903_s30 + $0x138] sm:$0xff]  ;;  %v4909_v46 = vld [vmem:[#allocation98_spill] sm:$0xff] }
 0x283   : > { %2571 = vmatmul.msk.f32.gmra.mxu0 %vm1787_vm9, %v1754_v61  ;;  %v1623_v57 = vsel %vm1617_vm3, %v1590_v41, %v4909_v46  ;;  %v4915_v46 = vld [vmem:[#allocation20_spill] sm:$0xff] }
 0x286   : > { %1464 = vrot.lane.b32.xlu2 %v2555_v32, %s2820_s11  ;;  %1348 = vrot.lane.b32.xlu1 %v2529_v53, %s2818_s9 }
 0x287   : > { %1336 = vrot.lane.b32.xlu0 %v2523_v14, %s2818_s9 }
 0x288   : > { %v1459_v11 = vpop.permute.xlu2 %1458  ;;  %v1177_v9 = vpop.permute.xlu1 %1176 }
 0x289   : > { %v1457_v48 = vpop.permute.xlu0 %1456 }
 0x28a   : > { %v1767_v54 = vsel %vm1749_vm8, %v1734_v26, %v1457_v48  ;;  %v2524_v48 = vld [vmem:[%s2903_s30 + $0x139] sm:$0xff] }
 0x28b   : > { %2584 = vmatmul.msk.f32.gmra.mxu2 %vm1787_vm9, %v1767_v54  ;;  %v2698_v54 = vld [vmem:[%s2903_s30 + $0x181] sm:$0xff] }
 0x28e   : > { %1324 = vrot.lane.b32.xlu2 %v2517_v15, %s2818_s9  ;;  %1196 = vrot.lane.b32.xlu1 %v2485_v43, %s2819_s10 }
 0x28f   : > { %1476 = vrot.lane.b32.xlu0 %v2561_v18, %s2820_s11  ;;  %v4910_v18 = vld [vmem:[#allocation29_spill] sm:$0xff] }
 0x290   : > { %v4349_v27 = vpop.permute.xlu2 %1190  ;;  %v1317_v22 = vpop.permute.xlu1 %1316 }
 0x291   : > { %v1728_v30 = vsel %vm1716_vm7, %v1695_v52, %v1317_v22  ;;  %v1305_v35 = vpop.permute.xlu0 %1304  ;;  %v1531_v52 = vsel %vm1518_vm0, %v2699_v21, %v4911_v50  ;;  %v2531_v22 = vld [vmem:[%s2903_s30 + $0x189] sm:$0xff] }
 0x292   : > { %v1761_v63 = vsel %vm1749_vm8, %v1728_v30, %v1445_v24  ;;  %v1656_v24 = vsel %vm1650_vm4, %v1623_v57, %v3903_v34  ;;  %v2556_v34 = vld [vmem:[%s2903_s30 + $0x13a] sm:$0xff]  ;;  %v2557_v30 = vld [vmem:[%s2903_s30 + $0x142] sm:$0xff] }
 0x293   : > { %2578 = vmatmul.msk.f32.gmra.mxu1 %vm1787_vm9, %v1761_v63  ;;  %v1689_v61 = vsel %vm1683_vm6, %v1656_v24, %v1177_v9  ;;  %v4914_v63 = vld [vmem:[#allocation104_spill] sm:$0xff] }
 0x294   : > { %v1722_v32 = vsel %vm1716_vm7, %v1689_v61, %v1305_v35  ;;  %v4912_v35 = vld [vmem:[#allocation60_spill] sm:$0xff] }
 0x295   : > { %v1564_v12 = vsel %vm1551_vm1, %v1531_v52, %v4912_v35  ;;  %v2565_v50 = vld [vmem:[%s2903_s30 + $0x1a2] sm:$0xff] }
 0x296   : > { %1452 = vrot.lane.b32.xlu2 %v2549_v2, %s2820_s11  ;;  %1222 = vrot.lane.b32.xlu1 %v2498_v8, %s2819_s10  ;;  %v1597_v33 = vsel %vm1584_vm2, %v1564_v12, %v4913_v55 }
 0x297   : > { %1210 = vrot.lane.b32.xlu0 %v2492_v20, %s2819_s10  ;;  %v1630_v60 = vsel %vm1617_vm3, %v1597_v33, %v4914_v63  ;;  %v2700_v20 = vld [vmem:[%s2903_s30 + $0x48] sm:$0xff] }
 0x298   : > { %v4373_v53 = vpop.permute.xlu2 %1204  ;;  %v1433_v14 = vpop.permute.xlu1 %1432  ;;  %v1663_v7 = vsel %vm1650_vm4, %v1630_v60, %v3890_v29  ;;  %v1525_v57 = vsel %vm1518_vm0, %v2700_v20, %v4915_v46 }
 0x299   : > { %v1215_v6 = vpop.permute.xlu0 %1214  ;;  %v1755_v26 = vsel %vm1749_vm8, %v1722_v32, %v1433_v14  ;;  %v1696_v2 = vsel %vm1683_vm6, %v1663_v7, %v4349_v27  ;;  %v4916_v32 = vld [vmem:[#allocation49_spill] sm:$0xff]  ;;  %v2500_v14 = vld [vmem:[%s2903_s30 + $0x198] sm:$0xff] }
 0x29a   : > { %2572 = vmatmul.msk.f32.gmra.mxu0 %vm1787_vm9, %v1755_v26  ;;  %v1708_v47 = vsel %vm1683_vm6, %v3993_v23, %v1215_v6  ;;  %v2525_v23 = vld [vmem:[%s2903_s30 + $0x141] sm:$0xff]  ;;  %v1558_v29 = vsel %vm1551_vm1, %v1525_v57, %v4916_v32  ;;  %v2532_v27 = vld [vmem:[%s2903_s30 + $0x199] sm:$0xff] }
 0x29b   : > { %v4917_v6 = vld [vmem:[#allocation93_spill] sm:$0xff] }
 0x29c   : > { %v1591_v26 = vsel %vm1584_vm2, %v1558_v29, %v4917_v6 }
 0x29e   : > { %1466 = vrot.lane.b32.xlu2 %v2556_v34, %s2820_s11  ;;  %1350 = vrot.lane.b32.xlu1 %v2698_v54, %s2818_s9  ;;  %v4918_v34 = vld [vmem:[#allocation103_spill] sm:$0xff] }
 0x29f   : > { %1338 = vrot.lane.b32.xlu0 %v2524_v48, %s2818_s9  ;;  %v1624_v48 = vsel %vm1617_vm3, %v1591_v26, %v4918_v34 }
 0x2a0   : > { %v1447_v9 = vpop.permute.xlu2 %1446  ;;  %v1343_v3 = vpop.permute.xlu1 %1342  ;;  %v1657_v54 = vsel %vm1650_vm4, %v1624_v48, %v3828_v38  ;;  %v2501_v38 = vld [vmem:[%s2903_s30 + $0x1a0] sm:$0xff] }
 0x2a1   : > { %v1331_v28 = vpop.permute.xlu0 %1330 }
 0x2a2   : > { %v1735_v15 = vsel %vm1716_vm7, %v1702_v40, %v1331_v28 }
 0x2a3   : > { %v1768_v43 = vsel %vm1749_vm8, %v1735_v15, %v1459_v11  ;;  %v1741_v11 = vsel %vm1716_vm7, %v1708_v47, %v1343_v3  ;;  %v4919_v3 = vld [vmem:[#allocation65_spill] sm:$0xff] }
 0x2a4   : > { %2585 = vmatmul.msk.f32.gmra.mxu2 %vm1787_vm9, %v1768_v43 }
 0x2a6   : > { %1224 = vrot.lane.b32.xlu2 %v2499_v5, %s2819_s10  ;;  %1212 = vrot.lane.b32.xlu1 %v2493_v42, %s2819_s10  ;;  %v2533_v5 = vld [vmem:[%s2903_s30 + $0x1a1] sm:$0xff] }
 0x2a7   : > { %1478 = vrot.lane.b32.xlu0 %v4910_v18, %s2820_s11  ;;  %v2564_v18 = vld [vmem:[%s2903_s30 + $0x19a] sm:$0xff]  ;;  %s2607_s30 = sshll.u32 %s2803_s15, 8 }
 0x2a8   : > { %v1461_v19 = vpop.permute.xlu2 %1460  ;;  %v1179_v16 = vpop.permute.xlu1 %1178 }
 0x2a9   : > { %v1471_v59 = vpop.permute.xlu0 %1470 }
 0x2aa   : > { %v1774_v0 = vsel %vm1749_vm8, %v1741_v11, %v1471_v59 }
 0x2ab   : > { %2591 = vmatmul.msk.f32.vlgmr.msra.gmra.mxu3 %vm1787_vm9, %v1774_v0 }
 0x2ae   : > { %1352 = vrot.lane.b32.xlu1 %v2531_v22, %s2818_s9  ;;  %1468 = vrot.lane.b32.xlu2 %v2557_v30, %s2820_s11 }
 0x2af   : > { %1340 = vrot.lane.b32.xlu0 %v2525_v23, %s2818_s9 }
 0x2b0   : > { %v1319_v8 = vpop.permute.xlu1 %1318  ;;  %v1193_v24 = vpop.permute.xlu2 %1192 }
 0x2b1   : > { %v1729_v17 = vsel %vm1716_vm7, %v1696_v2, %v1319_v8  ;;  %v1307_v41 = vpop.permute.xlu0 %1306 }
 0x2b2   : > { %v1762_v61 = vsel %vm1749_vm8, %v1729_v17, %v1447_v9  ;;  %v1690_v9 = vsel %vm1683_vm6, %v1657_v54, %v1179_v16  ;;  %v1703_v16 = vsel %vm1683_vm6, %v4054_v36, %v4373_v53 }
 0x2b3   : > { %2579 = vmatmul.msk.f32.gmra.mxu1 %vm1787_vm9, %v1762_v61  ;;  %v1723_v40 = vsel %vm1716_vm7, %v1690_v9, %v1307_v41 }
 0x2b6   : > { %1226 = vrot.lane.b32.xlu1 %v2500_v14, %s2819_s10  ;;  %1354 = vrot.lane.b32.xlu2 %v2532_v27, %s2818_s9 }
 0x2b7   : > { %1480 = vrot.lane.b32.xlu0 %v4919_v3, %s2820_s11 }
 0x2b8   : > { %v1435_v28 = vpop.permute.xlu1 %1434  ;;  %v1207_v42 = vpop.permute.xlu2 %1206 }
 0x2b9   : > { %v1217_v15 = vpop.permute.xlu0 %1216  ;;  %v1756_v43 = vsel %vm1749_vm8, %v1723_v40, %v1435_v28  ;;  %v1704_v27 = vsel %vm1683_vm6, %v4047_v10, %v1207_v42 }
 0x2ba   : > { %2573 = vmatmul.msk.f32.gmra.mxu0 %vm1787_vm9, %v1756_v43  ;;  %v1709_v36 = vsel %vm1683_vm6, %v4114_v25, %v1217_v15  ;;  %v1697_v25 = vsel %vm1683_vm6, %v3999_v49, %v1193_v24 }
 0x2be   : > { %1228 = vrot.lane.b32.xlu1 %v2501_v38, %s2819_s10  ;;  %1356 = vrot.lane.b32.xlu2 %v2533_v5, %s2818_s9 }
 0x2bf   : > { %1482 = vrot.lane.b32.xlu0 %v2564_v18, %s2820_s11 }
 0x2c0   : > { %v1905_v47 = vpop.f32.mrf.mxu0  ;;  %v1345_v11 = vpop.permute.xlu1 %1344 }
 0x2c1   : > { %2065 = vst [vmem:[%s4456_s19] sm:$0xff] %v1905_v47  ;;  %v1333_v59 = vpop.permute.xlu0 %1332  ;;  %v1449_v52 = vpop.permute.xlu2 %1448  ;;  %v2135_v22 = vmul.f32 %v1905_v47, %v1905_v47  ;;  %v1742_v30 = vsel %vm1716_vm7, %v1709_v36, %v1345_v11 }
 0x2c2   : > { %v1736_v0 = vsel %vm1716_vm7, %v1703_v16, %v1333_v59 }
 0x2c3   : > { %v1769_v21 = vsel %vm1749_vm8, %v1736_v0, %v1461_v19 }
 0x2c4   : > { %2586 = vmatmul.msk.f32.gmra.mxu2 %vm1787_vm9, %v1769_v21 }
 0x2c7   : > { %1484 = vrot.lane.b32.xlu0 %v2565_v50, %s2820_s11  ;;  %s2226_s11 = scalar_lea.hbm %s4683_s2, %s2607_s30 }
 0x2c8   : > { %v1908_v53 = vpop.f32.mrf.mxu0  ;;  %v1181_v23 = vpop.permute.xlu1 %1180  ;;  %s2229_s23 = sshll.u32 %s2226_s11, 4  ;;  %s2230_s23 = int_to_ptr.hbm [resolvable:$true] %s2229_s23 }
 0x2c9   : > { %2066 = vst [vmem:[%s4456_s19 + $0x8] sm:$0xff] %v1908_v53  ;;  %v2097_v35 = vadd.f32 %v1908_v53, %v1905_v47  ;;  %v2136_v12 = vmul.f32 %v1908_v53, %v1908_v53  ;;  %v1473_v55 = vpop.permute.xlu0 %1472  ;;  %v1463_v63 = vpop.permute.xlu2 %1462  ;;  %v1691_v57 = vsel %vm1683_vm6, %v3933_v62, %v1181_v23  ;;  %s2715_s27 = sshra.s32 %s2230_s23, 4  ;;  %s2716_s27 = int_to_ptr.hbm [resolvable:$true] %s2715_s27 }
 0x2ca   : > { %v1775_v19 = vsel %vm1749_vm8, %v1742_v30, %v1473_v55  ;;  %s2717_s28 = scalar_lea.hbm %s2716_s27, 256  ;;  %p2722_p1 = scmp.lt.s32.totalorder %s2716_s27, %s4683_s2 }
 0x2cb   : > { %v2167_v33 = vadd.f32 %v2136_v12, %v2135_v22  ;;  %2592 = vmatmul.msk.f32.gmra.mxu3 %vm1787_vm9, %v1775_v19  ;;  %p2718_p12 = scmp.ne.s32.totalorder %s2716_s27, %s2717_s28  ;;  %p2723_p2 = scmp.lt.s32.totalorder %s2721_s6, %s2717_s28 }
 0x2cd   : > { %p2719_p13 = pnand %p2718_p12, %p2883_p4  ;;  %p2724_p3 = por %p2723_p2, %p2722_p1 }
 0x2cf   : > { %p2720_p0 = pneg %p2719_p13 }
 0x2d0   : > { %v1321_v60 = vpop.permute.xlu1 %1320 }
 0x2d1   : > { %v1309_v7 = vpop.permute.xlu0 %1308  ;;  %v1730_v2 = vsel %vm1716_vm7, %v1697_v25, %v1321_v60  ;;  %v1911_v8 = vpop.f32.mrf.mxu0  ;;  %p2725_p5 = pnand %p2724_p3, %p2720_p0 }
 0x2d2   : > { %2067 = vst [vmem:[%s4456_s19 + $0x10] sm:$0xff] %v1911_v8  ;;  %v2098_v17 = vadd.f32 %v2097_v35, %v1911_v8  ;;  %v2137_v41 = vmul.f32 %v1911_v8, %v1911_v8  ;;  %v1763_v20 = vsel %vm1749_vm8, %v1730_v2, %v1449_v52  ;;  %v1724_v49 = vsel %vm1716_vm7, %v1691_v57, %v1309_v7  ;;  %v1323_v29 = vpop.permute.xlu2 %1322 }
 0x2d3   : > { %2580 = vmatmul.msk.f32.gmra.mxu1 %vm1787_vm9, %v1763_v20 }
 0x2d4   : > { %v2168_v46 = vadd.f32 %v2167_v33, %v2137_v41 }
 0x2d8   : > { %v4478_v61 = vpop.f32.mrf.mxu1  ;;  %v1437_v24 = vpop.permute.xlu1 %1436 }
 0x2d9   : > { %2073 = vst [vmem:[%s4456_s19 + $0x40] sm:$0xff] %v4478_v61  ;;  %v1219_v32 = vpop.permute.xlu0 %1218  ;;  %v1757_v14 = vsel %vm1749_vm8, %v1724_v49, %v1437_v24 }
 0x2da   : > { %2574 = vmatmul.msk.f32.gmra.mxu0 %vm1787_vm9, %v1757_v14  ;;  %v1451_v48 = vpop.permute.xlu2 %1450  ;;  %v1710_v9 = vsel %vm1683_vm6, %v4110_v51, %v1219_v32 }
 0x2e0   : > { %v1347_v6 = vpop.permute.xlu1 %1346 }
 0x2e1   : > { %v1335_v62 = vpop.permute.xlu0 %1334  ;;  %v1743_v40 = vsel %vm1716_vm7, %v1710_v9, %v1347_v6 }
 0x2e2   : > { %v1737_v26 = vsel %vm1716_vm7, %v1704_v27, %v1335_v62  ;;  %v1465_v47 = vpop.permute.xlu2 %1464 }
 0x2e3   : > { %v1770_v34 = vsel %vm1749_vm8, %v1737_v26, %v1463_v63 }
 0x2e4   : > { %2587 = vmatmul.msk.f32.gmra.mxu2 %vm1787_vm9, %v1770_v34 }
 0x2e7   : > { %v4490_v54 = vpop.f32.mrf.mxu1 }
 0x2e8   : > { %v1914_v3 = vpop.f32.mrf.mxu0  ;;  %2074 = vst [vmem:[%s4456_s19 + $0x48] sm:$0xff] %v4490_v54  ;;  %v1195_v15 = vpop.permute.xlu1 %1194 }
 0x2e9   : > { %2068 = vst [vmem:[%s4456_s19 + $0x18] sm:$0xff] %v1914_v3  ;;  %v2099_v10 = vadd.f32 %v2098_v17, %v1914_v3  ;;  %v2138_v28 = vmul.f32 %v1914_v3, %v1914_v3  ;;  %v1475_v43 = vpop.permute.xlu0 %1474  ;;  %v1698_v38 = vsel %vm1683_vm6, %v3996_v31, %v1195_v15 }
 0x2ea   : > { %v1776_v5 = vsel %vm1749_vm8, %v1743_v40, %v1475_v43  ;;  %v1731_v51 = vsel %vm1716_vm7, %v1698_v38, %v1323_v29  ;;  %v1325_v31 = vpop.permute.xlu2 %1324 }
 0x2eb   : > { %v2169_v42 = vadd.f32 %v2168_v46, %v2138_v28  ;;  %2593 = vmatmul.msk.f32.gmra.mxu3 %vm1787_vm9, %v1776_v5  ;;  %v1764_v18 = vsel %vm1749_vm8, %v1731_v51, %v1451_v48 }
 0x2ec   : > { %2581 = vmatmul.msk.f32.gmra.mxu1 %vm1787_vm9, %v1764_v18 }
 0x2f0   : > { %v1221_v16 = vpop.permute.xlu1 %1220 }
 0x2f1   : > { %v1209_v11 = vpop.permute.xlu0 %1208  ;;  %v1711_v22 = vsel %vm1683_vm6, %v4018_v39, %v1221_v16 }
 0x2f2   : > { %v1705_v0 = vsel %vm1683_vm6, %v3962_v56, %v1209_v11  ;;  %v1453_v63 = vpop.permute.xlu2 %1452 }
 0x2f6   : > { %v4505_v59 = vpop.f32.mrf.mxu2 }
 0x2f7   : > { %2081 = vst [vmem:[%s4456_s19 + $0x80] sm:$0xff] %v4505_v59 }
 0x2f8   : > { %v1349_v21 = vpop.permute.xlu1 %1348 }
 0x2f9   : > { %v1337_v50 = vpop.permute.xlu0 %1336  ;;  %v1744_v35 = vsel %vm1716_vm7, %v1711_v22, %v1349_v21 }
 0x2fa   : > { %v1738_v52 = vsel %vm1716_vm7, %v1705_v0, %v1337_v50  ;;  %v1467_v8 = vpop.permute.xlu2 %1466 }
 0x2fb   : > { %v1771_v36 = vsel %vm1749_vm8, %v1738_v52, %v1465_v47 }
 0x2fc   : > { %2588 = vmatmul.msk.f32.gmra.mxu2 %vm1787_vm9, %v1771_v36 }
 0x2ff   : > { %v4514_v53 = vpop.f32.mrf.mxu1 }
 0x300   : > { %v1917_v30 = vpop.f32.mrf.mxu0  ;;  %2075 = vst [vmem:[%s4456_s19 + $0x50] sm:$0xff] %v4514_v53  ;;  %v1197_v23 = vpop.permute.xlu1 %1196 }
 0x301   : > { %2069 = vst [vmem:[%s4456_s19 + $0x20] sm:$0xff] %v1917_v30  ;;  %v2100_v56 = vadd.f32 %v2099_v10, %v1917_v30  ;;  %v2139_v12 = vmul.f32 %v1917_v30, %v1917_v30  ;;  %v1477_v55 = vpop.permute.xlu0 %1476  ;;  %v1699_v19 = vsel %vm1683_vm6, %v3907_v1, %v1197_v23 }
 0x302   : > { %v1777_v33 = vsel %vm1749_vm8, %v1744_v35, %v1477_v55  ;;  %v1732_v39 = vsel %vm1716_vm7, %v1699_v19, %v1325_v31  ;;  %v1225_v32 = vpop.permute.xlu2 %1224 }
 0x303   : > { %v2170_v25 = vadd.f32 %v2169_v42, %v2139_v12  ;;  %2594 = vmatmul.msk.f32.gmra.mxu3 %vm1787_vm9, %v1777_v33  ;;  %v1765_v60 = vsel %vm1749_vm8, %v1732_v39, %v1453_v63  ;;  %v1713_v15 = vsel %vm1683_vm6, %v4143_v13, %v1225_v32  ;;  %v2143_v33 = vmul.f32 %v4478_v61, %v4478_v61 }
 0x304   : > { %2582 = vmatmul.msk.f32.gmra.mxu1 %vm1787_vm9, %v1765_v60  ;;  %v2144_v39 = vmul.f32 %v4490_v54, %v4490_v54 }
 0x308   : > { %v1223_v7 = vpop.permute.xlu1 %1222 }
 0x309   : > { %v1211_v2 = vpop.permute.xlu0 %1210  ;;  %v1712_v29 = vsel %vm1683_vm6, %v4146_v37, %v1223_v7 }
 0x30a   : > { %v1706_v41 = vsel %vm1683_vm6, %v4090_v58, %v1211_v2  ;;  %v1469_v48 = vpop.permute.xlu2 %1468  ;;  %v2145_v2 = vmul.f32 %v4514_v53, %v4514_v53 }
 0x30e   : > { %v4529_v17 = vpop.f32.mrf.mxu2 }
 0x30f   : > { %2082 = vst [vmem:[%s4456_s19 + $0x88] sm:$0xff] %v4529_v17 }
 0x310   : > { %v4533_v1 = vpop.f32.mrf.mxu1  ;;  %v1351_v20 = vpop.permute.xlu1 %1350 }
 0x311   : > { %v1339_v46 = vpop.permute.xlu0 %1338  ;;  %2076 = vst [vmem:[%s4456_s19 + $0x58] sm:$0xff] %v4533_v1  ;;  %v1745_v58 = vsel %vm1716_vm7, %v1712_v29, %v1351_v20  ;;  %v2146_v20 = vmul.f32 %v4533_v1, %v4533_v1 }
 0x312   : > { %v1739_v57 = vsel %vm1716_vm7, %v1706_v41, %v1339_v46  ;;  %v1355_v42 = vpop.permute.xlu2 %1354 }
 0x313   : > { %v1772_v49 = vsel %vm1749_vm8, %v1739_v57, %v1467_v8 }
 0x314   : > { %2589 = vmatmul.msk.f32.gmra.mxu2 %vm1787_vm9, %v1772_v49 }
 0x317   : > { %v1920_v24 = vpop.f32.mrf.mxu0 }
 0x318   : > { %2070 = vst [vmem:[%s4456_s19 + $0x28] sm:$0xff] %v1920_v24  ;;  %v2101_v14 = vadd.f32 %v2100_v56, %v1920_v24  ;;  %v2140_v27 = vmul.f32 %v1920_v24, %v1920_v24  ;;  %v1213_v6 = vpop.permute.xlu1 %1212 }
 0x319   : > { %v1479_v62 = vpop.permute.xlu0 %1478  ;;  %v1707_v9 = vsel %vm1683_vm6, %v4083_v45, %v1213_v6 }
 0x31a   : > { %v2171_v26 = vadd.f32 %v2170_v25, %v2140_v27  ;;  %v1778_v34 = vsel %vm1749_vm8, %v1745_v58, %v1479_v62 }
 0x31b   : > { %2595 = vmatmul.msk.f32.gmra.mxu3 %vm1787_vm9, %v1778_v34 }
 0x320   : > { %v1353_v3 = vpop.permute.xlu1 %1352 }
 0x321   : > { %v1341_v37 = vpop.permute.xlu0 %1340  ;;  %v1746_v43 = vsel %vm1716_vm7, %v1713_v15, %v1353_v3  ;;  %v2151_v3 = vmul.f32 %v4505_v59, %v4505_v59  ;;  %v2152_v15 = vmul.f32 %v4529_v17, %v4529_v17 }
 0x322   : > { %v1740_v40 = vsel %vm1716_vm7, %v1707_v9, %v1341_v37 }
 0x323   : > { %v1773_v10 = vsel %vm1749_vm8, %v1740_v40, %v1469_v48 }
 0x324   : > { %2590 = vmatmul.msk.f32.gmra.mxu2 %vm1787_vm9, %v1773_v10 }
 0x327   : > { %v4553_v28 = vpop.f32.mrf.mxu2 }
 0x328   : > { %2083 = vst [vmem:[%s4456_s19 + $0x90] sm:$0xff] %v4553_v28  ;;  %v1227_v45 = vpop.permute.xlu1 %1226 }
 0x329   : > { %v1481_v38 = vpop.permute.xlu0 %1480  ;;  %v1714_v51 = vsel %vm1683_vm6, %v4044_v44, %v1227_v45  ;;  %v1357_v44 = vpop.permute.xlu2 %1356 }
 0x32a   : > { %v1779_v5 = vsel %vm1749_vm8, %v1746_v43, %v1481_v38  ;;  %v1747_v47 = vsel %vm1716_vm7, %v1714_v51, %v1355_v42  ;;  %v2153_v38 = vmul.f32 %v4553_v28, %v4553_v28 }
 0x32b   : > { %2596 = vmatmul.msk.f32.gmra.mxu3 %vm1787_vm9, %v1779_v5 }
 0x32e   : > { %v4564_v18 = vpop.f32.mrf.mxu3 }
 0x32f   : > { %2089 = vst [vmem:[%s4456_s19 + $0xc0] sm:$0xff] %v4564_v18 }
 0x330   : > { %v1941_v13 = vpop.f32.mrf.mxu1  ;;  %v1229_v31 = vpop.permute.xlu1 %1228 }
 0x331   : > { %v1483_v16 = vpop.permute.xlu0 %1482  ;;  %2077 = vst [vmem:[%s4456_s19 + $0x60] sm:$0xff] %v1941_v13  ;;  %v1715_v0 = vsel %vm1683_vm6, %v4161_v4, %v1229_v31  ;;  %v2147_v57 = vmul.f32 %v1941_v13, %v1941_v13 }
 0x332   : > { %v1780_v11 = vsel %vm1749_vm8, %v1747_v47, %v1483_v16  ;;  %v1748_v36 = vsel %vm1716_vm7, %v1715_v0, %v1357_v44 }
 0x333   : > { %2597 = vmatmul.msk.f32.gmra.mxu3 %vm1787_vm9, %v1780_v11 }
 0x337   : > { %v1923_v21 = vpop.f32.mrf.mxu0 }
 0x338   : > { %2071 = vst [vmem:[%s4456_s19 + $0x30] sm:$0xff] %v1923_v21  ;;  %v2102_v50 = vadd.f32 %v2101_v14, %v1923_v21  ;;  %v2141_v52 = vmul.f32 %v1923_v21, %v1923_v21 }
 0x339   : > { %v1485_v22 = vpop.permute.xlu0 %1484 }
 0x33a   : > { %v2172_v30 = vadd.f32 %v2171_v26, %v2141_v52  ;;  %v1781_v35 = vsel %vm1749_vm8, %v1748_v36, %v1485_v22 }
 0x33b   : > { %2598 = vmatmul.msk.f32.gmra.mxu3 %vm1787_vm9, %v1781_v35 }
 0x347   : > { %v1962_v56 = vpop.f32.mrf.mxu2 }
 0x348   : > { %2084 = vst [vmem:[%s4456_s19 + $0x98] sm:$0xff] %v1962_v56  ;;  %v2154_v51 = vmul.f32 %v1962_v56, %v1962_v56 }
 0x34e   : > { %v4579_v12 = vpop.f32.mrf.mxu3 }
 0x34f   : > { %2090 = vst [vmem:[%s4456_s19 + $0xc8] sm:$0xff] %v4579_v12 }
 0x350   : > { %v1944_v4 = vpop.f32.mrf.mxu1 }
 0x351   : > { %2078 = vst [vmem:[%s4456_s19 + $0x68] sm:$0xff] %v1944_v4  ;;  %v2148_v24 = vmul.f32 %v1944_v4, %v1944_v4 }
 0x357   : > { %v1926_v23 = vpop.f32.mrf.mxu0 }
 0x358   : > { %2072 = vst [vmem:[%s4456_s19 + $0x38] sm:$0xff] %v1926_v23  ;;  %v2103_v55 = vadd.f32 %v2102_v50, %v1926_v23  ;;  %v2142_v19 = vmul.f32 %v1926_v23, %v1926_v23 }
 0x35a   : > { %v2104_v63 = vadd.f32 %v2103_v55, %v4478_v61  ;;  %v2173_v25 = vadd.f32 %v2172_v30, %v2142_v19  ;;  %v2160_v55 = vmul.f32 %v4579_v12, %v4579_v12 }
 0x35c   : > { %v2105_v60 = vadd.f32 %v2104_v63, %v4490_v54  ;;  %v2174_v7 = vadd.f32 %v2173_v25, %v2143_v33 }
 0x35e   : > { %v2106_v8 = vadd.f32 %v2105_v60, %v4514_v53  ;;  %v2175_v41 = vadd.f32 %v2174_v7, %v2144_v39 }
 0x360   : > { %v2176_v61 = vadd.f32 %v2175_v41, %v2145_v2  ;;  %v2107_v46 = vadd.f32 %v2106_v8, %v4533_v1 }
 0x362   : > { %v2108_v49 = vadd.f32 %v2107_v46, %v1941_v13  ;;  %v2177_v54 = vadd.f32 %v2176_v61, %v2146_v20 }
 0x364   : > { %v2109_v32 = vadd.f32 %v2108_v49, %v1944_v4  ;;  %v2178_v29 = vadd.f32 %v2177_v54, %v2147_v57 }
 0x366   : > { %v2179_v27 = vadd.f32 %v2178_v29, %v2148_v24 }
 0x367   : > { %v1965_v14 = vpop.f32.mrf.mxu2 }
 0x368   : > { %2085 = vst [vmem:[%s4456_s19 + $0xa0] sm:$0xff] %v1965_v14  ;;  %v2155_v47 = vmul.f32 %v1965_v14, %v1965_v14 }
 0x369   : > { %v1947_v53 = vpop.f32.mrf.mxu1 }
 0x36a   : > { %2079 = vst [vmem:[%s4456_s19 + $0x70] sm:$0xff] %v1947_v53  ;;  %v2149_v6 = vmul.f32 %v1947_v53, %v1947_v53  ;;  %v2110_v1 = vadd.f32 %v2109_v32, %v1947_v53 }
 0x36c   : > { %v2180_v34 = vadd.f32 %v2179_v27, %v2149_v6 }
 0x36e   : > { %v1983_v58 = vpop.f32.mrf.mxu3 }
 0x36f   : > { %2091 = vst [vmem:[%s4456_s19 + $0xd0] sm:$0xff] %v1983_v58  ;;  %v2161_v63 = vmul.f32 %v1983_v58, %v1983_v58 }
 0x37f   : > { %v1968_v62 = vpop.f32.mrf.mxu2 }
 0x380   : > { %2086 = vst [vmem:[%s4456_s19 + $0xa8] sm:$0xff] %v1968_v62  ;;  %v2156_v44 = vmul.f32 %v1968_v62, %v1968_v62 }
 0x381   : > { %v1950_v26 = vpop.f32.mrf.mxu1 }
 0x382   : > { %2080 = vst [vmem:[%s4456_s19 + $0x78] sm:$0xff] %v1950_v26  ;;  %v2111_v48 = vadd.f32 %v2110_v1, %v1950_v26  ;;  %v2150_v9 = vmul.f32 %v1950_v26, %v1950_v26 }
 0x384   : > { %v2112_v37 = vadd.f32 %v2111_v48, %v4505_v59  ;;  %v2181_v40 = vadd.f32 %v2180_v34, %v2150_v9 }
 0x386   : > { %v1986_v10 = vpop.f32.mrf.mxu3  ;;  %v2113_v43 = vadd.f32 %v2112_v37, %v4529_v17  ;;  %v2182_v45 = vadd.f32 %v2181_v40, %v2151_v3 }
 0x387   : > { %2092 = vst [vmem:[%s4456_s19 + $0xd8] sm:$0xff] %v1986_v10  ;;  %v2162_v2 = vmul.f32 %v1986_v10, %v1986_v10 }
 0x388   : > { %v2114_v5 = vadd.f32 %v2113_v43, %v4553_v28  ;;  %v2183_v42 = vadd.f32 %v2182_v45, %v2152_v15 }
 0x38a   : > { %v2184_v13 = vadd.f32 %v2183_v42, %v2153_v38  ;;  %v2115_v59 = vadd.f32 %v2114_v5, %v1962_v56  ;;  %v2159_v56 = vmul.f32 %v4564_v18, %v4564_v18 }
 0x38c   : > { %v2116_v16 = vadd.f32 %v2115_v59, %v1965_v14  ;;  %v2185_v11 = vadd.f32 %v2184_v13, %v2154_v51 }
 0x38e   : > { %v2186_v31 = vadd.f32 %v2185_v11, %v2155_v47  ;;  %v2117_v21 = vadd.f32 %v2116_v16, %v1968_v62 }
 0x390   : > { %v2187_v36 = vadd.f32 %v2186_v31, %v2156_v44 }
 0x397   : > { %v1971_v0 = vpop.f32.mrf.mxu2 }
 0x398   : > { %2087 = vst [vmem:[%s4456_s19 + $0xb0] sm:$0xff] %v1971_v0  ;;  %v2157_v50 = vmul.f32 %v1971_v0, %v1971_v0  ;;  %v2118_v52 = vadd.f32 %v2117_v21, %v1971_v0 }
 0x39a   : > { %v2188_v22 = vadd.f32 %v2187_v36, %v2157_v50 }
 0x39e   : > { %v1989_v17 = vpop.f32.mrf.mxu3 }
 0x39f   : > { %2093 = vst [vmem:[%s4456_s19 + $0xe0] sm:$0xff] %v1989_v17 }
 0x3a7   : > { %v1974_v28 = vpop.f32.mrf.mxu2 }
 0x3a8   : > { %2088 = vst [vmem:[%s4456_s19 + $0xb8] sm:$0xff] %v1974_v28  ;;  %v2119_v30 = vadd.f32 %v2118_v52, %v1974_v28  ;;  %v2158_v35 = vmul.f32 %v1974_v28, %v1974_v28 }
 0x3aa   : > { %v2120_v4 = vadd.f32 %v2119_v30, %v4564_v18  ;;  %v2189_v23 = vadd.f32 %v2188_v22, %v2158_v35  ;;  %v2163_v18 = vmul.f32 %v1989_v17, %v1989_v17 }
 0x3ac   : > { %v2121_v19 = vadd.f32 %v2120_v4, %v4579_v12  ;;  %v2190_v33 = vadd.f32 %v2189_v23, %v2159_v56 }
 0x3ae   : > { %v2122_v25 = vadd.f32 %v2121_v19, %v1983_v58  ;;  %v2191_v39 = vadd.f32 %v2190_v33, %v2160_v55  ;;  %v1992_v60 = vpop.f32.mrf.mxu3 }
 0x3af   : > { %2094 = vst [vmem:[%s4456_s19 + $0xe8] sm:$0xff] %v1992_v60  ;;  %v2164_v57 = vmul.f32 %v1992_v60, %v1992_v60 }
 0x3b0   : > { %v2192_v7 = vadd.f32 %v2191_v39, %v2161_v63  ;;  %v2123_v8 = vadd.f32 %v2122_v25, %v1986_v10 }
 0x3b2   : > { %v2193_v41 = vadd.f32 %v2192_v7, %v2162_v2  ;;  %v2124_v20 = vadd.f32 %v2123_v8, %v1989_v17 }
 0x3b4   : > { %v2194_v46 = vadd.f32 %v2193_v41, %v2163_v18  ;;  %v2125_v12 = vadd.f32 %v2124_v20, %v1992_v60 }
 0x3b6   : > { %v1995_v61 = vpop.f32.mrf.mxu3  ;;  %v2195_v49 = vadd.f32 %v2194_v46, %v2164_v57 }
 0x3b7   : > { %2095 = vst [vmem:[%s4456_s19 + $0xf0] sm:$0xff] %v1995_v61  ;;  %v2165_v54 = vmul.f32 %v1995_v61, %v1995_v61  ;;  %v2126_v24 = vadd.f32 %v2125_v12, %v1995_v61 }
 0x3b9   : > { %v2196_v29 = vadd.f32 %v2195_v49, %v2165_v54 }
 0x3be   : > { %v1998_v32 = vpop.f32.mrf.mxu3 }
 0x3bf   : > { %2096 = vst [vmem:[%s4456_s19 + $0xf8] sm:$0xff] %v1998_v32  ;;  %v2127_v14 = vadd.f32 %v2126_v24, %v1998_v32  ;;  %v2166_v27 = vmul.f32 %v1998_v32, %v1998_v32 }
 0x3c0   : > { %2728 = shalt.err (!%p2725_p5)
}
 0x3c1   : > { %s2821_s19 = smov 128   ;;  %v2128_v53 = vrot.slane %v2127_v14, 4  ;;  %v2197_v58 = vadd.f32 %v2196_v29, %v2166_v27  ;;  %s2372_s9 = sshll.u32 %s4442_s8, 1 }
 0x3c2   : > { %2624 = dma.vmem_to_hbm [thread:$0]  (%p2883_p4), %s2228_s21, 4096, %s2230_s23, %s2207_s26, %s2821_s19, %s2821_s19, %s2814_s5  }
 0x3c3   : > { %v2129_v6 = vadd.f32 %v2128_v53, %v2127_v14  ;;  %v2198_v62 = vrot.slane %v2197_v58, 4  ;;  %s2604_s10 = sshll.u32 %s2803_s15, 1  ;;  %s190_s29 = scalar_lea.vmem [#allocation5], %s2372_s9 }
 0x3c4   : > { %s2243_s28 = scalar_lea.hbm %s4684_s3, %s2604_s10  ;;  %s2244_s5 = sshll.u32 %s190_s29, 4  ;;  %s2245_s5 = int_to_ptr.vmem [resolvable:$true] %s2244_s5 }
 0x3c5   : > { %v2130_v1 = vrot.slane %v2129_v6, 2  ;;  %v2199_v26 = vadd.f32 %v2198_v62, %v2197_v58  ;;  %s2246_s21 = sshll.u32 %s2243_s28, 4  ;;  %s2212_s15 = scalar_lea.sflag [#allocation6], %s4442_s8  ;;  %s2247_s21 = int_to_ptr.hbm [resolvable:$true] %s2246_s21 }
 0x3c6   : > { %s2743_s23 = sshra.s32 %s2247_s21, 4  ;;  %s2749_s18 = scalar_lea.hbm %s4684_s3, 4  ;;  %s2744_s23 = int_to_ptr.hbm [resolvable:$true] %s2743_s23 }
 0x3c7   : > { %v2131_v34 = vadd.f32 %v2130_v1, %v2129_v6  ;;  %v2200_v48 = vrot.slane %v2199_v26, 2  ;;  %s2745_s26 = scalar_lea.hbm %s2744_s23, 2  ;;  %p2750_p10 = scmp.lt.s32.totalorder %s2744_s23, %s4684_s3 }
 0x3c8   : > { %p2746_p6 = scmp.ne.s32.totalorder %s2744_s23, %s2745_s26  ;;  %p2751_p11 = scmp.lt.s32.totalorder %s2749_s18, %s2745_s26 }
 0x3c9   : > { %v2132_v9 = vrot.slane %v2131_v34, 1  ;;  %v2201_v3 = vadd.f32 %v2200_v48, %v2199_v26 }
 0x3ca   : > { %p2747_p7 = pnand %p2746_p6, %p2883_p4  ;;  %p2752_p12 = por %p2751_p11, %p2750_p10 }
 0x3cb   : > { %v2133_v37 = vadd.f32 %v2132_v9, %v2131_v34  ;;  %v2202_v40 = vrot.slane %v2201_v3, 1 }
 0x3cc   : > { %p2748_p9 = pneg %p2747_p7 }
 0x3cd   : > { %2134 = vst [vmem:[%s190_s29] sm:$0x1] %v2133_v37  ;;  %v2203_v10 = vadd.f32 %v2202_v40, %v2201_v3 }
 0x3ce   : > { %p2753_p13 = pnand %p2752_p12, %p2748_p9 }
 0x3cf   : > { %2599 = vst [vmem:[%s190_s29 + $0x1] sm:$0x1] %v2203_v10 }
 0x3d0   : > { %2756 = shalt.err (!%p2753_p13)
}
 0x3d1   : > { %s2822_s8 = smov 1  }
 0x3d2   : > { %2625 = dma.vmem_to_hbm [thread:$0]  (%p2883_p4), %s2245_s5, 32, %s2247_s21, %s2212_s15, %s2816_s7, %s2816_s7, %s2822_s8  }
 0x3d3 PF: > { %p2635_p0 = scmp.ge.s32.totalorder %s2811_s17, 2  ;;  %s2261_s9 = sand.u32 1, %s2791_s12  }
 0x3d4   : > { %s2262_s10 = scalar_lea.sflag [#allocation4], %s2261_s9 }
 0x3d5   : > { %p2629_p1 = pnand %p2635_p0, %p2890_p8 }
 0x3d7   : > { %p2630_p2 = pneg %p2629_p1 }
 0x3d9   : > { %2782 = dma.done.wait (%p2630_p2), %s2262_s10, 4096  }
 0x3da   : > { %2784 = vsyncadd (%p2630_p2), %s2262_s10, 4294963200  ;;  %s2272_s11 = scalar_lea.sflag [#allocation6], %s2261_s9 }
 0x3db   : > { %2786 = dma.done.wait (%p2630_p2), %s2272_s11, 32  }
 0x3dc   : > { %2788 = vsyncadd (%p2630_p2), %s2272_s11, 4294967264  ;;  %s20_s17 = sadd.s32 1, %s2811_s17   ;;  %s4920_s12 = smov %s2795_s13 }
 0x3dd   : > { %p17_p3 = scmp.ge.s32.totalorder %s20_s17, 4   ;;  %s4921_s13 = smov %s2799_s14 }
 0x3de   : > { %s4922_s14 = smov %s2896_s25  ;;  %s4923_s15 = smov %s2807_s16 }
 0x3df   : > { %s4924_s16 = smov %s4926_s20  ;;  %19 = sbr.rel (!%p17_p3) target bundleno = 6 (0x6), region = 84 }
 0x3e4   :  { %2278 = vsyncpa [#allocation4], 1 }
 0x3e5   :  { %2280 = vsyncpa [#allocation4 + $0x1], 1 }
 0x3e6   :  { %2281 = vsyncpa [#allocation6], 1 }
 0x3e7   :  { %2283 = vsyncpa [#allocation6 + $0x1], 1 }

// kernel: tpu_custom_call.1
= control target key start
LH: loop header
LB: loop body
LE: loop exit
PB: predicated region body
PF: predicated region fallthrough
CT: control target
= control target key end

     0   :  { %9 = vsyncpa [#allocation4], 0  ;;  %s5478_s0 = inlined_call_operand.vmem [shape: f32[2,18,18,4], index: 0, kind: input, shape index: {}]   ;;  %s5479_s1 = inlined_call_operand.vmem [shape: f32[9,4,128], index: 1, kind: input, shape index: {}]   ;;  %s5480_s2 = inlined_call_operand.hbm [shape: f32[2,16,16,128], index: 2, kind: output, shape index: {0}]   ;;  %s5481_s3 = inlined_call_operand.hbm [shape: f32[2,2,1,128], index: 3, kind: output, shape index: {1}]  }
   0x1   :  { %11 = vsyncpa [#allocation4 + $0x1], 0 }
   0x2   :  { %12 = vsyncpa [#allocation6], 0 }
   0x3   :  { %14 = vsyncpa [#allocation6 + $0x1], 0  ;;  %s4270_s12 = smov 0   ;;  %s4272_s13 = smov 0  }
   0x4   :  { %s4274_s14 = smov 0   ;;  %s4276_s15 = smov 0  }
   0x5   :  { %s4278_s16 = smov 0   ;;  %s4280_s17 = smov 0  }
   0x6 LB: > { %s3552_s18 = sadd.s32 4294967295, %s4244_s17   ;;  %s3553_s19 = sadd.s32 4294967294, %s4244_s17   ;;  %s4244_s17 = sphi %s4280_s17, %s20_s17   ;;  %s4240_s16 = sphi %s4278_s16, %s5602_s16   ;;  %s4236_s15 = sphi %s4276_s15, %s5601_s15   ;;  %s4232_s14 = sphi %s4274_s14, %s5600_s14   ;;  %s4228_s13 = sphi %s4272_s13, %s5599_s13   ;;  %s4224_s12 = sphi %s4270_s12, %s5598_s12  }
   0x7   : > { %s32_s20 = sadd.s32 1, %s4240_s16  ;;  %s88_s21 = sadd.s32 1, %s4232_s14 }
   0x8   : > { %p34_p0 = scmp.ge.s32.totalorder %s32_s20, 2  ;;  %p98_p1 = scmp.ne.s32.totalorder %s4232_s14, %s4228_s13 }
   0x9   : > { %p99_p2 = scmp.eq.s32.totalorder %s3552_s18, 1  ;;  %p104_p3 = scmp.ne.s32.totalorder %s4228_s13, %s4224_s12 }
   0xa   : > { %s5604_s20 = smov (%p34_p0, %s32_s20), 0  ;;  %p105_p5 = scmp.eq.s32.totalorder %s3553_s19, 1 }
   0xb   : > { %p4310_p4 = por %p99_p2, %p98_p1  ;;  %s83_s23 = ssub.s32 %s4240_s16, %s5604_s20 }
   0xc   : > { %p3556_p6 = scmp.ge.s32.totalorder %s4244_s17, 1  ;;  %p86_p7 = scmp.eq.s32.totalorder %s83_s23, 0 }
   0xd   : > { %p4317_p8 = por %p105_p5, %p104_p3  ;;  %p162_p9 = scmp.lt.s32.totalorder %s4244_s17, 3 }
   0xe   : > { %s4323_s25 = scalar_select %p86_p7, %s4232_s14, %s88_s21  }
   0xf   : > { %p163_p10 = pnand %p3556_p6, %p162_p9 }
  0x11   : > { %166 = sbr.rel (%p163_p10) target bundleno = 757 (0x2f5), region = 28 }
  0x16   : > { %v232_v0 = vld [vmem:[%s5479_s1] sm:$0xf]  ;;  %vm330_vm0 = vcmask 1043456   ;;  %p191_p11 = scmp.lt.s32.totalorder %s4236_s15, 1  ;;  %v3627_v1 = vld [vmem:[%s5479_s1 + $0x8] sm:$0xf] }
  0x17   : > { %4066 = vmatpush.msk.msra.mxu1 %vm330_vm0, %v232_v0  ;;  %4067 = vmatpush.msk.msra.mxu2 %vm330_vm0, %v232_v0  ;;  %v3693_v2 = vld [vmem:[%s5479_s1 + $0xc] sm:$0xf]  ;;  %v3593_v3 = vld [vmem:[%s5479_s1 + $0x4] sm:$0xf]  ;;  %v3759_v4 = vld [vmem:[%s5479_s1 + $0x10] sm:$0xf] }
  0x18   : > { %s192_s7 = scalar_select %p191_p11, %s4236_s15, 1  ;;  %4068 = vmatpush.msk.msra.mxu3 %vm330_vm0, %v232_v0  ;;  %3560 = vmatpush.msk.msra.mxu0 %vm330_vm0, %v232_v0  ;;  %vm233_vm1 = vcmask 31744   ;;  %v3891_v25 = vld [vmem:[%s5479_s1 + $0x18] sm:$0xf]  ;;  %v3957_v26 = vld [vmem:[%s5479_s1 + $0x1c] sm:$0xf] }
  0x19   : > { %3628 = vmatpush.msk.msrb.mxu2 %vm330_vm0, %v3627_v1  ;;  %3594 = vmatpush.msk.msrb.mxu1 %vm330_vm0, %v3593_v3  ;;  %v3825_v27 = vld [vmem:[%s5479_s1 + $0x14] sm:$0xf]  ;;  %v4023_v32 = vld [vmem:[%s5479_s1 + $0x20] sm:$0xf]  ;;  %s5237_s5 = sand.u32 1, %s4228_s13   ;;  %s4065_s8 = sshll.u32 %s4236_s15, 8 }
  0x1a   : > { %3694 = vmatpush.msk.msrb.mxu3 %vm330_vm0, %v3693_v2  ;;  %s4069_s10 = smul.u32 432, %s192_s7  ;;  %3760 = vmatpush.msk.msrb.mxu0 %vm330_vm0, %v3759_v4  ;;  %s3557_s6 = sshll.u32 %s5237_s5, 8 }
  0x1b   : > { %s5252_s7 = scalar_lea.vmem [#allocation3], %s3557_s6  ;;  %s3414_s11 = scalar_lea.hbm %s5480_s2, %s4065_s8 }
  0x1c   : > { %s4353_s19 = scalar_lea.vmem %s5478_s0, %s4069_s10  ;;  %s3415_s18 = sshll.u32 %s5252_s7, 4  ;;  %s3416_s18 = int_to_ptr.vmem [resolvable:$true] %s3415_s18 }
  0x1d   : > { %v4356_v5 = vld [vmem:[%s4353_s19 + $0x60] sm:$0xff]  ;;  %v4373_v9 = vld [vmem:[%s4353_s19 + $0x68] sm:$0xff]  ;;  %v4390_v13 = vld [vmem:[%s4353_s19 + $0x78] sm:$0xff]  ;;  %s3395_s21 = scalar_lea.sflag [#allocation4], %s5237_s5  ;;  %s4154_s29 = scalar_lea.hbm %s5480_s2, 512 }
  0x1e   : > { %v4359_v6 = vld [vmem:[%s4353_s19 + $0xc0] sm:$0xff]  ;;  %3569 = vmatmul.msk.f32.vlgmr.msra.gmra.mxu1 %vm233_vm1, %v4356_v5  ;;  %v4376_v10 = vld [vmem:[%s4353_s19 + $0xc8] sm:$0xff]  ;;  %v4393_v14 = vld [vmem:[%s4353_s19 + $0xd8] sm:$0xff] }
  0x1f   : > { %v4362_v7 = vld [vmem:[%s4353_s19 + $0x120] sm:$0xff]  ;;  %3577 = vmatmul.msk.f32.vlgmr.msra.gmra.mxu2 %vm233_vm1, %v4359_v6  ;;  %v4379_v11 = vld [vmem:[%s4353_s19 + $0x128] sm:$0xff]  ;;  %v4396_v15 = vld [vmem:[%s4353_s19 + $0x138] sm:$0xff]  ;;  %3826 = vmatpush.msk.msra.mxu1 %vm330_vm0, %v3825_v27 }
  0x20   : > { %v200_v8 = vld [vmem:[%s4353_s19] sm:$0xff]  ;;  %3585 = vmatmul.msk.f32.vlgmr.msra.gmra.mxu3 %vm233_vm1, %v4362_v7  ;;  %v201_v12 = vld [vmem:[%s4353_s19 + $0x8] sm:$0xff]  ;;  %v202_v16 = vld [vmem:[%s4353_s19 + $0x18] sm:$0xff]  ;;  %3892 = vmatpush.msk.msra.mxu2 %vm330_vm0, %v3891_v25 }
  0x21   : > { %3561 = vmatmul.msk.f32.vlgmr.msra.gmra.mxu0 %vm233_vm1, %v200_v8  ;;  %v4407_v17 = vld [vmem:[%s4353_s19 + $0x80] sm:$0xff]  ;;  %v4424_v21 = vld [vmem:[%s4353_s19 + $0x90] sm:$0xff]  ;;  %3958 = vmatpush.msk.msra.mxu3 %vm330_vm0, %v3957_v26  ;;  %v4456_v28 = vld [vmem:[%s4353_s19 + $0x98] sm:$0xff] }
  0x22   : > { %v4410_v18 = vld [vmem:[%s4353_s19 + $0xe0] sm:$0xff]  ;;  %v4427_v22 = vld [vmem:[%s4353_s19 + $0xf0] sm:$0xff]  ;;  %v4459_v29 = vld [vmem:[%s4353_s19 + $0xf8] sm:$0xff]  ;;  %4024 = vmatpush.msk.msra.mxu0 %vm330_vm0, %v4023_v32 }
  0x23   : > { %v4413_v19 = vld [vmem:[%s4353_s19 + $0x140] sm:$0xff]  ;;  %v4430_v23 = vld [vmem:[%s4353_s19 + $0x150] sm:$0xff]  ;;  %v4462_v30 = vld [vmem:[%s4353_s19 + $0x158] sm:$0xff] }
  0x24   : > { %v203_v20 = vld [vmem:[%s4353_s19 + $0x20] sm:$0xff]  ;;  %v4433_v24 = vld [vmem:[%s4353_s19 + $0x30] sm:$0xff]  ;;  %v4465_v31 = vld [vmem:[%s4353_s19 + $0x38] sm:$0xff] }
  0x25   : > { %v4480_v33 = vld [vmem:[%s4353_s19 + $0xa8] sm:$0xff]  ;;  %v4500_v37 = vld [vmem:[%s4353_s19 + $0xb0] sm:$0xff]  ;;  %v3727_v43 = vld [vmem:[%s4353_s19 + $0x19] sm:$0xff] }
  0x26   : > { %3570 = vmatmul.msk.f32.gmra.mxu1 %vm233_vm1, %v4373_v9  ;;  %v4483_v34 = vld [vmem:[%s4353_s19 + $0x108] sm:$0xff]  ;;  %v4503_v38 = vld [vmem:[%s4353_s19 + $0x110] sm:$0xff]  ;;  %v4534_v47 = vld [vmem:[%s4353_s19 + $0x1a] sm:$0xff] }
  0x27   : > { %3578 = vmatmul.msk.f32.gmra.mxu2 %vm233_vm1, %v4376_v10  ;;  %v4486_v35 = vld [vmem:[%s4353_s19 + $0x168] sm:$0xff]  ;;  %v4506_v39 = vld [vmem:[%s4353_s19 + $0x170] sm:$0xff]  ;;  %v4550_v50 = vld [vmem:[%s4353_s19 + $0x39] sm:$0xff] }
  0x28   : > { %3586 = vmatmul.msk.f32.gmra.mxu3 %vm233_vm1, %v4379_v11  ;;  %v4489_v36 = vld [vmem:[%s4353_s19 + $0x48] sm:$0xff]  ;;  %v4509_v40 = vld [vmem:[%s4353_s19 + $0x50] sm:$0xff]  ;;  %v4574_v53 = vld [vmem:[%s4353_s19 + $0x3a] sm:$0xff] }
  0x29   : > { %3562 = vmatmul.msk.f32.gmra.mxu0 %vm233_vm1, %v201_v12  ;;  %v479_v41 = vld [vmem:[%s4353_s19 + $0x1] sm:$0xff]  ;;  %v480_v44 = vld [vmem:[%s4353_s19 + $0x9] sm:$0xff]  ;;  %v4537_v48 = vld [vmem:[%s4353_s19 + $0x31] sm:$0xff] }
  0x2a   : > { %v821_v42 = vld [vmem:[%s4353_s19 + $0x2] sm:$0xff]  ;;  %v822_v45 = vld [vmem:[%s4353_s19 + $0xa] sm:$0xff]  ;;  %v4560_v51 = vld [vmem:[%s4353_s19 + $0x32] sm:$0xff] }
  0x2b   : > { %v3728_v46 = vld [vmem:[%s4353_s19 + $0x21] sm:$0xff]  ;;  %v4563_v52 = vld [vmem:[%s4353_s19 + $0x49] sm:$0xff]  ;;  %v4577_v54 = vld [vmem:[%s4353_s19 + $0x51] sm:$0xff] }
  0x2c   : > { %v4547_v49 = vld [vmem:[%s4353_s19 + $0x22] sm:$0xff]  ;;  %v4588_v55 = vld [vmem:[%s4353_s19 + $0x4a] sm:$0xff]  ;;  %v4602_v57 = vld [vmem:[%s4353_s19 + $0x52] sm:$0xff] }
  0x2d   : > { %v4591_v56 = vld [vmem:[%s4353_s19 + $0x61] sm:$0xff]  ;;  %v4605_v58 = vld [vmem:[%s4353_s19 + $0x69] sm:$0xff]  ;;  %v4623_v62 = vld [vmem:[%s4353_s19 + $0x79] sm:$0xff] }
  0x2e   : > { %3571 = vmatmul.msk.f32.gmra.mxu1 %vm233_vm1, %v4390_v13  ;;  %5510 = vst [vmem:[#allocation9_spill] sm:$0xff] %v4605_v58  ;;  %v4618_v60 = vld [vmem:[%s4353_s19 + $0x62] sm:$0xff]  ;;  %v4640_v2 = vld [vmem:[%s4353_s19 + $0x6a] sm:$0xff]  ;;  %v4662_v12 = vld [vmem:[%s4353_s19 + $0x7a] sm:$0xff] }
  0x2f   : > { %3579 = vmatmul.msk.f32.gmra.mxu2 %vm233_vm1, %v4393_v14  ;;  %5511 = vst [vmem:[#allocation10_spill] sm:$0xff] %v4623_v62  ;;  %v4645_v4 = vld [vmem:[%s4353_s19 + $0x81] sm:$0xff]  ;;  %v4689_v32 = vld [vmem:[%s4353_s19 + $0x99] sm:$0xff] }
  0x30   : > { %3587 = vmatmul.msk.f32.gmra.mxu3 %vm233_vm1, %v4396_v15  ;;  %5513 = vst [vmem:[#allocation12_spill] sm:$0xff] %v4640_v2  ;;  %v4684_v26 = vld [vmem:[%s4353_s19 + $0x82] sm:$0xff] }
  0x31   : > { %3563 = vmatmul.msk.f32.gmra.mxu0 %vm233_vm1, %v202_v16  ;;  %5514 = vst [vmem:[#allocation13_spill] sm:$0xff] %v4645_v4 }
  0x32   : > { %5516 = vst [vmem:[#allocation15_spill] sm:$0xff] %v4662_v12 }
  0x33   : > { %5519 = vst [vmem:[#allocation18_spill] sm:$0xff] %v4684_v26 }
  0x34   : > { %5520 = vst [vmem:[#allocation19_spill] sm:$0xff] %v4689_v32 }
  0x36   : > { %3572 = vmatmul.msk.f32.gmra.mxu1 %vm233_vm1, %v4407_v17 }
  0x37   : > { %3580 = vmatmul.msk.f32.gmra.mxu2 %vm233_vm1, %v4410_v18 }
  0x38   : > { %3588 = vmatmul.msk.f32.gmra.mxu3 %vm233_vm1, %v4413_v19 }
  0x39   : > { %3564 = vmatmul.msk.f32.gmra.mxu0 %vm233_vm1, %v203_v20 }
  0x3e   : > { %3573 = vmatmul.msk.f32.gmra.mxu1 %vm233_vm1, %v4424_v21 }
  0x3f   : > { %3581 = vmatmul.msk.f32.gmra.mxu2 %vm233_vm1, %v4427_v22 }
  0x40   : > { %3589 = vmatmul.msk.f32.gmra.mxu3 %vm233_vm1, %v4430_v23 }
  0x41   : > { %3565 = vmatmul.msk.f32.gmra.mxu0 %vm233_vm1, %v4433_v24 }
  0x46   : > { %3574 = vmatmul.msk.f32.gmra.mxu1 %vm233_vm1, %v4456_v28 }
  0x47   : > { %3582 = vmatmul.msk.f32.gmra.mxu2 %vm233_vm1, %v4459_v29 }
  0x48   : > { %3590 = vmatmul.msk.f32.gmra.mxu3 %vm233_vm1, %v4462_v30 }
  0x49   : > { %3566 = vmatmul.msk.f32.gmra.mxu0 %vm233_vm1, %v4465_v31 }
  0x4e   : > { %3575 = vmatmul.msk.f32.gmra.mxu1 %vm233_vm1, %v4480_v33 }
  0x4f   : > { %3583 = vmatmul.msk.f32.gmra.mxu2 %vm233_vm1, %v4483_v34 }
  0x50   : > { %3591 = vmatmul.msk.f32.gmra.mxu3 %vm233_vm1, %v4486_v35 }
  0x51   : > { %3567 = vmatmul.msk.f32.gmra.mxu0 %vm233_vm1, %v4489_v36 }
  0x56   : > { %3576 = vmatmul.msk.f32.gmra.mxu1 %vm233_vm1, %v4500_v37 }
  0x57   : > { %3584 = vmatmul.msk.f32.gmra.mxu2 %vm233_vm1, %v4503_v38 }
  0x58   : > { %3592 = vmatmul.msk.f32.gmra.mxu3 %vm233_vm1, %v4506_v39 }
  0x59   : > { %3568 = vmatmul.msk.f32.gmra.mxu0 %vm233_vm1, %v4509_v40 }
  0x5e   : > { %3595 = vmatmul.msk.f32.vlgmr.msrb.gmra.mxu1 %vm233_vm1, %v479_v41 }
  0x5f   : > { %3629 = vmatmul.msk.f32.vlgmr.msrb.gmra.mxu2 %vm233_vm1, %v821_v42 }
  0x60   : > { %3695 = vmatmul.msk.f32.vlgmr.msrb.gmra.mxu3 %vm233_vm1, %v202_v16  ;;  %v4667_v16 = vld [vmem:[%s4353_s19 + $0x91] sm:$0xff] }
  0x61   : > { %3761 = vmatmul.msk.f32.vlgmr.msrb.gmra.mxu0 %vm233_vm1, %v3727_v43  ;;  %5517 = vst [vmem:[#allocation16_spill] sm:$0xff] %v4667_v16 }
  0x66   : > { %3596 = vmatmul.msk.f32.gmra.mxu1 %vm233_vm1, %v480_v44 }
  0x67   : > { %3630 = vmatmul.msk.f32.gmra.mxu2 %vm233_vm1, %v822_v45  ;;  %v4711_v45 = vld [vmem:[%s4353_s19 + $0xa9] sm:$0xff] }
  0x68   : > { %3696 = vmatmul.msk.f32.gmra.mxu3 %vm233_vm1, %v203_v20  ;;  %5523 = vst [vmem:[#allocation22_spill] sm:$0xff] %v4711_v45 }
  0x69   : > { %3762 = vmatmul.msk.f32.gmra.mxu0 %vm233_vm1, %v3728_v46 }
  0x6e   : > { %3597 = vmatmul.msk.f32.gmra.mxu1 %vm233_vm1, %v3727_v43  ;;  %v4706_v43 = vld [vmem:[%s4353_s19 + $0x92] sm:$0xff] }
  0x6f   : > { %3631 = vmatmul.msk.f32.gmra.mxu2 %vm233_vm1, %v4534_v47  ;;  %5522 = vst [vmem:[#allocation21_spill] sm:$0xff] %v4706_v43 }
  0x70   : > { %3697 = vmatmul.msk.f32.gmra.mxu3 %vm233_vm1, %v4433_v24 }
  0x71   : > { %3763 = vmatmul.msk.f32.gmra.mxu0 %vm233_vm1, %v4537_v48 }
  0x76   : > { %3598 = vmatmul.msk.f32.gmra.mxu1 %vm233_vm1, %v3728_v46 }
  0x77   : > { %3632 = vmatmul.msk.f32.gmra.mxu2 %vm233_vm1, %v4547_v49 }
  0x78   : > { %3698 = vmatmul.msk.f32.gmra.mxu3 %vm233_vm1, %v4465_v31 }
  0x79   : > { %3764 = vmatmul.msk.f32.gmra.mxu0 %vm233_vm1, %v4550_v50 }
  0x7e   : > { %3599 = vmatmul.msk.f32.gmra.mxu1 %vm233_vm1, %v4537_v48 }
  0x7f   : > { %3633 = vmatmul.msk.f32.gmra.mxu2 %vm233_vm1, %v4560_v51 }
  0x80   : > { %3699 = vmatmul.msk.f32.gmra.mxu3 %vm233_vm1, %v4489_v36 }
  0x81   : > { %3765 = vmatmul.msk.f32.gmra.mxu0 %vm233_vm1, %v4563_v52 }
  0x86   : > { %3600 = vmatmul.msk.f32.gmra.mxu1 %vm233_vm1, %v4550_v50 }
  0x87   : > { %3634 = vmatmul.msk.f32.gmra.mxu2 %vm233_vm1, %v4574_v53 }
  0x88   : > { %3700 = vmatmul.msk.f32.gmra.mxu3 %vm233_vm1, %v4509_v40 }
  0x89   : > { %3766 = vmatmul.msk.f32.gmra.mxu0 %vm233_vm1, %v4577_v54 }
  0x8e   : > { %3601 = vmatmul.msk.f32.gmra.mxu1 %vm233_vm1, %v4563_v52 }
  0x8f   : > { %3635 = vmatmul.msk.f32.gmra.mxu2 %vm233_vm1, %v4588_v55 }
  0x90   : > { %3701 = vmatmul.msk.f32.gmra.mxu3 %vm233_vm1, %v4356_v5 }
  0x91   : > { %3767 = vmatmul.msk.f32.gmra.mxu0 %vm233_vm1, %v4591_v56 }
  0x96   : > { %3602 = vmatmul.msk.f32.gmra.mxu1 %vm233_vm1, %v4577_v54 }
  0x97   : > { %3636 = vmatmul.msk.f32.gmra.mxu2 %vm233_vm1, %v4602_v57 }
  0x98   : > { %3702 = vmatmul.msk.f32.gmra.mxu3 %vm233_vm1, %v4373_v9 }
  0x99   : > { %3768 = vmatmul.msk.f32.gmra.mxu0 %vm233_vm1, %v4605_v58 }
  0x9b   : > { %v4615_v59 = vpop.f32.mrf.mxu1 }
  0x9e   : > { %v4620_v61 = vpop.f32.mrf.mxu0  ;;  %3603 = vmatmul.msk.f32.gmra.mxu1 %vm233_vm1, %v4591_v56 }
  0x9f   : > { %3637 = vmatmul.msk.f32.gmra.mxu2 %vm233_vm1, %v4618_v60 }
  0xa0   : > { %3703 = vmatmul.msk.f32.gmra.mxu3 %vm233_vm1, %v4390_v13 }
  0xa1   : > { %3769 = vmatmul.msk.f32.gmra.mxu0 %vm233_vm1, %v4623_v62 }
  0xa2   : > { %v4633_v63 = vpop.f32.mrf.mxu2 }
  0xa3   : > { %v4635_v0 = vpop.f32.mrf.mxu3  ;;  %v4637_v1 = vpop.f32.mrf.mxu1 }
  0xa4   : > { %5512 = vst [vmem:[#allocation11_spill] sm:$0xff] %v4635_v0  ;;  %v4733_v0 = vld [vmem:[%s4353_s19 + $0xb1] sm:$0xff] }
  0xa5   : > { %5527 = vst [vmem:[#allocation26_spill] sm:$0xff] %v4733_v0 }
  0xa6   : > { %v4642_v3 = vpop.f32.mrf.mxu0  ;;  %3604 = vmatmul.msk.f32.gmra.mxu1 %vm233_vm1, %v4605_v58 }
  0xa7   : > { %3638 = vmatmul.msk.f32.gmra.mxu2 %vm233_vm1, %v4640_v2  ;;  %v4807_v2 = vld [vmem:[%s4353_s19 + $0xca] sm:$0xff] }
  0xa8   : > { %3704 = vmatmul.msk.f32.gmra.mxu3 %vm233_vm1, %v4407_v17 }
  0xa9   : > { %3770 = vmatmul.msk.f32.gmra.mxu0 %vm233_vm1, %v4645_v4 }
  0xaa   : > { %v4655_v5 = vpop.f32.mrf.mxu2 }
  0xab   : > { %v4657_v8 = vpop.f32.mrf.mxu3  ;;  %v4659_v9 = vpop.f32.mrf.mxu1 }
  0xac   : > { %5515 = vst [vmem:[#allocation14_spill] sm:$0xff] %v4657_v8 }
  0xae   : > { %v4664_v13 = vpop.f32.mrf.mxu0  ;;  %3605 = vmatmul.msk.f32.gmra.mxu1 %vm233_vm1, %v4623_v62 }
  0xaf   : > { %3639 = vmatmul.msk.f32.gmra.mxu2 %vm233_vm1, %v4662_v12  ;;  %v4777_v12 = vld [vmem:[%s4353_s19 + $0xc9] sm:$0xff] }
  0xb0   : > { %3705 = vmatmul.msk.f32.gmra.mxu3 %vm233_vm1, %v4424_v21 }
  0xb1   : > { %3771 = vmatmul.msk.f32.gmra.mxu0 %vm233_vm1, %v4667_v16 }
  0xb2   : > { %v4677_v17 = vpop.f32.mrf.mxu2 }
  0xb3   : > { %v4679_v20 = vpop.f32.mrf.mxu3  ;;  %v4681_v25 = vpop.f32.mrf.mxu1 }
  0xb4   : > { %5518 = vst [vmem:[#allocation17_spill] sm:$0xff] %v4679_v20  ;;  %v4728_v20 = vld [vmem:[%s4353_s19 + $0x9a] sm:$0xff] }
  0xb5   : > { %5526 = vst [vmem:[#allocation25_spill] sm:$0xff] %v4728_v20 }
  0xb6   : > { %v4686_v27 = vpop.f32.mrf.mxu0  ;;  %3606 = vmatmul.msk.f32.gmra.mxu1 %vm233_vm1, %v4645_v4  ;;  %v4772_v4 = vld [vmem:[%s4353_s19 + $0xb2] sm:$0xff] }
  0xb7   : > { %3640 = vmatmul.msk.f32.gmra.mxu2 %vm233_vm1, %v4684_v26  ;;  %v4755_v26 = vld [vmem:[%s4353_s19 + $0xc1] sm:$0xff]  ;;  %5534 = vst [vmem:[#allocation33_spill] sm:$0xff] %v4772_v4 }
  0xb8   : > { %3706 = vmatmul.msk.f32.gmra.mxu3 %vm233_vm1, %v4456_v28  ;;  %5531 = vst [vmem:[#allocation30_spill] sm:$0xff] %v4755_v26 }
  0xb9   : > { %3772 = vmatmul.msk.f32.gmra.mxu0 %vm233_vm1, %v4689_v32 }
  0xba   : > { %v4699_v21 = vpop.f32.mrf.mxu2 }
  0xbb   : > { %v4701_v41 = vpop.f32.mrf.mxu3  ;;  %v4703_v42 = vpop.f32.mrf.mxu1 }
  0xbc   : > { %5521 = vst [vmem:[#allocation20_spill] sm:$0xff] %v4701_v41 }
  0xbe   : > { %v4708_v44 = vpop.f32.mrf.mxu0  ;;  %3607 = vmatmul.msk.f32.gmra.mxu1 %vm233_vm1, %v4667_v16  ;;  %v4750_v16 = vld [vmem:[%s4353_s19 + $0xaa] sm:$0xff] }
  0xbf   : > { %3641 = vmatmul.msk.f32.gmra.mxu2 %vm233_vm1, %v4706_v43  ;;  %5530 = vst [vmem:[#allocation29_spill] sm:$0xff] %v4750_v16 }
  0xc0   : > { %3707 = vmatmul.msk.f32.gmra.mxu3 %vm233_vm1, %v4480_v33 }
  0xc1   : > { %3773 = vmatmul.msk.f32.gmra.mxu0 %vm233_vm1, %v4711_v45 }
  0xc2   : > { %v4721_v28 = vpop.f32.mrf.mxu2 }
  0xc3   : > { %5524 = vst [vmem:[#allocation23_spill] sm:$0xff] %v4721_v28  ;;  %v4723_v46 = vpop.f32.mrf.mxu3  ;;  %v4725_v41 = vpop.f32.mrf.mxu1  ;;  %v4810_v28 = vld [vmem:[%s4353_s19 + $0xe1] sm:$0xff] }
  0xc4   : > { %5525 = vst [vmem:[#allocation24_spill] sm:$0xff] %v4723_v46 }
  0xc6   : > { %v4730_v8 = vpop.f32.mrf.mxu0  ;;  %3608 = vmatmul.msk.f32.gmra.mxu1 %vm233_vm1, %v4689_v32 }
  0xc7   : > { %3642 = vmatmul.msk.f32.gmra.mxu2 %vm233_vm1, %v4728_v20 }
  0xc8   : > { %3708 = vmatmul.msk.f32.gmra.mxu3 %vm233_vm1, %v4500_v37 }
  0xc9   : > { %3774 = vmatmul.msk.f32.gmra.mxu0 %vm233_vm1, %v4733_v0 }
  0xca   : > { %v4743_v33 = vpop.f32.mrf.mxu2 }
  0xcb   : > { %5528 = vst [vmem:[#allocation27_spill] sm:$0xff] %v4743_v33  ;;  %v4745_v46 = vpop.f32.mrf.mxu3  ;;  %v4747_v43 = vpop.f32.mrf.mxu1 }
  0xcc   : > { %5529 = vst [vmem:[#allocation28_spill] sm:$0xff] %v4745_v46 }
  0xce   : > { %v4752_v32 = vpop.f32.mrf.mxu0  ;;  %3609 = vmatmul.msk.f32.gmra.mxu1 %vm233_vm1, %v4711_v45 }
  0xcf   : > { %3643 = vmatmul.msk.f32.gmra.mxu2 %vm233_vm1, %v4750_v16 }
  0xd0   : > { %3709 = vmatmul.msk.f32.gmra.mxu3 %vm233_vm1, %v4359_v6 }
  0xd1   : > { %3775 = vmatmul.msk.f32.gmra.mxu0 %vm233_vm1, %v4755_v26 }
  0xd2   : > { %v4765_v37 = vpop.f32.mrf.mxu2 }
  0xd3   : > { %5532 = vst [vmem:[#allocation31_spill] sm:$0xff] %v4765_v37  ;;  %v4767_v46 = vpop.f32.mrf.mxu3  ;;  %v4769_v20 = vpop.f32.mrf.mxu1  ;;  %v4792_v37 = vld [vmem:[%s4353_s19 + $0xc2] sm:$0xff] }
  0xd4   : > { %5533 = vst [vmem:[#allocation32_spill] sm:$0xff] %v4767_v46 }
  0xd5   : > { %5537 = vst [vmem:[#allocation36_spill] sm:$0xff] %v4792_v37 }
  0xd6   : > { %v4774_v45 = vpop.f32.mrf.mxu0  ;;  %3610 = vmatmul.msk.f32.gmra.mxu1 %vm233_vm1, %v4733_v0  ;;  %v4795_v0 = vld [vmem:[%s4353_s19 + $0xd9] sm:$0xff] }
  0xd7   : > { %3644 = vmatmul.msk.f32.gmra.mxu2 %vm233_vm1, %v4772_v4 }
  0xd8   : > { %3710 = vmatmul.msk.f32.gmra.mxu3 %vm233_vm1, %v4376_v10 }
  0xd9   : > { %3776 = vmatmul.msk.f32.gmra.mxu0 %vm233_vm1, %v4777_v12 }
  0xda   : > { %v4787_v6 = vpop.f32.mrf.mxu2 }
  0xdb   : > { %5535 = vst [vmem:[#allocation34_spill] sm:$0xff] %v4787_v6  ;;  %v4789_v46 = vpop.f32.mrf.mxu3  ;;  %v629_v16 = vpop.f32.mrf.mxu1 }
  0xdc   : > { %5536 = vst [vmem:[#allocation35_spill] sm:$0xff] %v4789_v46  ;;  %v757_v10 = vadd.f32 %v629_v16, %v4620_v61 }
  0xde   : > { %v1658_v62 = vpop.f32.mrf.mxu0  ;;  %3611 = vmatmul.msk.f32.gmra.mxu1 %vm233_vm1, %v4755_v26 }
  0xdf   : > { %3645 = vmatmul.msk.f32.gmra.mxu2 %vm233_vm1, %v4792_v37 }
  0xe0   : > { %3711 = vmatmul.msk.f32.gmra.mxu3 %vm233_vm1, %v4393_v14 }
  0xe1   : > { %3777 = vmatmul.msk.f32.gmra.mxu0 %vm233_vm1, %v4795_v0 }
  0xe2   : > { %v971_v46 = vpop.f32.mrf.mxu2 }
  0xe3   : > { %v1099_v4 = vadd.f32 %v971_v46, %v757_v10  ;;  %v1316_v6 = vpop.f32.mrf.mxu3  ;;  %v632_v33 = vpop.f32.mrf.mxu1  ;;  %v4827_v10 = vld [vmem:[%s4353_s19 + $0xf1] sm:$0xff] }
  0xe4   : > { %v758_v14 = vadd.f32 %v632_v33, %v4642_v3 }
  0xe5   : > { %v1444_v58 = vadd.f32 %v1316_v6, %v1099_v4 }
  0xe6   : > { %v1661_v26 = vpop.f32.mrf.mxu0  ;;  %3612 = vmatmul.msk.f32.gmra.mxu1 %vm233_vm1, %v4777_v12 }
  0xe7   : > { %v4812_v37 = vadd.f32 %v1658_v62, %v1444_v58  ;;  %3646 = vmatmul.msk.f32.gmra.mxu2 %vm233_vm1, %v4807_v2  ;;  %v4824_v62 = vld [vmem:[%s4353_s19 + $0xda] sm:$0xff] }
  0xe8   : > { %3712 = vmatmul.msk.f32.gmra.mxu3 %vm233_vm1, %v4410_v18 }
  0xe9   : > { %5538 = vst [vmem:[#allocation37_spill] sm:$0xff] %v4812_v37  ;;  %3778 = vmatmul.msk.f32.gmra.mxu0 %vm233_vm1, %v4810_v28 }
  0xea   : > { %v974_v61 = vpop.f32.mrf.mxu2 }
  0xeb   : > { %v1100_v4 = vadd.f32 %v974_v61, %v758_v14  ;;  %v1319_v16 = vpop.f32.mrf.mxu3  ;;  %v635_v58 = vpop.f32.mrf.mxu1  ;;  %v4841_v61 = vld [vmem:[%s4353_s19 + $0xe2] sm:$0xff] }
  0xec   : > { %v759_v18 = vadd.f32 %v635_v58, %v4664_v13 }
  0xed   : > { %v1445_v46 = vadd.f32 %v1319_v16, %v1100_v4 }
  0xee   : > { %v1664_v6 = vpop.f32.mrf.mxu0  ;;  %3613 = vmatmul.msk.f32.gmra.mxu1 %vm233_vm1, %v4795_v0 }
  0xef   : > { %v4829_v37 = vadd.f32 %v1661_v26, %v1445_v46  ;;  %3647 = vmatmul.msk.f32.gmra.mxu2 %vm233_vm1, %v4824_v62  ;;  %v4844_v46 = vld [vmem:[%s4353_s19 + $0xf9] sm:$0xff] }
  0xf0   : > { %3713 = vmatmul.msk.f32.gmra.mxu3 %vm233_vm1, %v4427_v22 }
  0xf1   : > { %5539 = vst [vmem:[#allocation38_spill] sm:$0xff] %v4829_v37  ;;  %3779 = vmatmul.msk.f32.gmra.mxu0 %vm233_vm1, %v4827_v10 }
  0xf2   : > { %v977_v3 = vpop.f32.mrf.mxu2 }
  0xf3   : > { %v1101_v33 = vadd.f32 %v977_v3, %v759_v18  ;;  %v1322_v14 = vpop.f32.mrf.mxu3  ;;  %v638_v26 = vpop.f32.mrf.mxu1  ;;  %v4858_v3 = vld [vmem:[%s4353_s19 + $0xf2] sm:$0xff] }
  0xf4   : > { %v760_v22 = vadd.f32 %v638_v26, %v4686_v27 }
  0xf5   : > { %v1446_v4 = vadd.f32 %v1322_v14, %v1101_v33 }
  0xf6   : > { %v1667_v16 = vpop.f32.mrf.mxu0  ;;  %3614 = vmatmul.msk.f32.gmra.mxu1 %vm233_vm1, %v4810_v28 }
  0xf7   : > { %v4846_v37 = vadd.f32 %v1664_v6, %v1446_v4  ;;  %3648 = vmatmul.msk.f32.gmra.mxu2 %vm233_vm1, %v4841_v61  ;;  %v4861_v4 = vld [vmem:[%s4353_s19 + $0x109] sm:$0xff] }
  0xf8   : > { %3714 = vmatmul.msk.f32.gmra.mxu3 %vm233_vm1, %v4459_v29 }
  0xf9   : > { %5540 = vst [vmem:[#allocation39_spill] sm:$0xff] %v4846_v37  ;;  %3780 = vmatmul.msk.f32.gmra.mxu0 %vm233_vm1, %v4844_v46 }
  0xfa   : > { %v980_v13 = vpop.f32.mrf.mxu2 }
  0xfb   : > { %v1102_v58 = vadd.f32 %v980_v13, %v760_v22  ;;  %v1325_v18 = vpop.f32.mrf.mxu3  ;;  %v641_v6 = vpop.f32.mrf.mxu1  ;;  %v4875_v13 = vld [vmem:[%s4353_s19 + $0xfa] sm:$0xff] }
  0xfc   : > { %v761_v29 = vadd.f32 %v641_v6, %v4708_v44 }
  0xfd   : > { %v1447_v33 = vadd.f32 %v1325_v18, %v1102_v58 }
  0xfe   : > { %v1670_v14 = vpop.f32.mrf.mxu0  ;;  %3615 = vmatmul.msk.f32.gmra.mxu1 %vm233_vm1, %v4827_v10 }
  0xff   : > { %v4863_v37 = vadd.f32 %v1667_v16, %v1447_v33  ;;  %3649 = vmatmul.msk.f32.gmra.mxu2 %vm233_vm1, %v4858_v3  ;;  %v4878_v33 = vld [vmem:[%s4353_s19 + $0x111] sm:$0xff] }
 0x100   : > { %3715 = vmatmul.msk.f32.gmra.mxu3 %vm233_vm1, %v4483_v34 }
 0x101   : > { %5541 = vst [vmem:[#allocation40_spill] sm:$0xff] %v4863_v37  ;;  %3781 = vmatmul.msk.f32.gmra.mxu0 %vm233_vm1, %v4861_v4 }
 0x102   : > { %v983_v27 = vpop.f32.mrf.mxu2 }
 0x103   : > { %v1103_v26 = vadd.f32 %v983_v27, %v761_v29  ;;  %v1328_v22 = vpop.f32.mrf.mxu3  ;;  %v644_v16 = vpop.f32.mrf.mxu1  ;;  %v4892_v27 = vld [vmem:[%s4353_s19 + $0x10a] sm:$0xff] }
 0x104   : > { %v762_v34 = vadd.f32 %v644_v16, %v4730_v8 }
 0x105   : > { %v1448_v58 = vadd.f32 %v1328_v22, %v1103_v26 }
 0x106   : > { %v1673_v18 = vpop.f32.mrf.mxu0  ;;  %3616 = vmatmul.msk.f32.gmra.mxu1 %vm233_vm1, %v4844_v46 }
 0x107   : > { %v4880_v37 = vadd.f32 %v1670_v14, %v1448_v58  ;;  %3650 = vmatmul.msk.f32.gmra.mxu2 %vm233_vm1, %v4875_v13  ;;  %v4895_v58 = vld [vmem:[%s4353_s19 + $0x121] sm:$0xff] }
 0x108   : > { %3716 = vmatmul.msk.f32.gmra.mxu3 %vm233_vm1, %v4503_v38 }
 0x109   : > { %5542 = vst [vmem:[#allocation41_spill] sm:$0xff] %v4880_v37  ;;  %3782 = vmatmul.msk.f32.gmra.mxu0 %vm233_vm1, %v4878_v33 }
 0x10a   : > { %v986_v44 = vpop.f32.mrf.mxu2 }
 0x10b   : > { %v1104_v6 = vadd.f32 %v986_v44, %v762_v34  ;;  %v1331_v29 = vpop.f32.mrf.mxu3  ;;  %v647_v14 = vpop.f32.mrf.mxu1  ;;  %v4909_v44 = vld [vmem:[%s4353_s19 + $0x112] sm:$0xff] }
 0x10c   : > { %v763_v38 = vadd.f32 %v647_v14, %v4752_v32 }
 0x10d   : > { %v1449_v26 = vadd.f32 %v1331_v29, %v1104_v6 }
 0x10e   : > { %v1676_v22 = vpop.f32.mrf.mxu0  ;;  %3617 = vmatmul.msk.f32.gmra.mxu1 %vm233_vm1, %v4861_v4 }
 0x10f   : > { %v4897_v37 = vadd.f32 %v1673_v18, %v1449_v26  ;;  %3651 = vmatmul.msk.f32.gmra.mxu2 %vm233_vm1, %v4892_v27  ;;  %v4912_v26 = vld [vmem:[%s4353_s19 + $0x129] sm:$0xff] }
 0x110   : > { %3717 = vmatmul.msk.f32.gmra.mxu3 %vm233_vm1, %v4362_v7 }
 0x111   : > { %5543 = vst [vmem:[#allocation42_spill] sm:$0xff] %v4897_v37  ;;  %3783 = vmatmul.msk.f32.gmra.mxu0 %vm233_vm1, %v4895_v58 }
 0x112   : > { %v989_v8 = vpop.f32.mrf.mxu2 }
 0x113   : > { %v1105_v16 = vadd.f32 %v989_v8, %v763_v38  ;;  %v1334_v34 = vpop.f32.mrf.mxu3  ;;  %v650_v18 = vpop.f32.mrf.mxu1  ;;  %v4926_v8 = vld [vmem:[%s4353_s19 + $0x122] sm:$0xff] }
 0x114   : > { %v764_v7 = vadd.f32 %v650_v18, %v4774_v45 }
 0x115   : > { %v1450_v6 = vadd.f32 %v1334_v34, %v1105_v16 }
 0x116   : > { %v1679_v29 = vpop.f32.mrf.mxu0  ;;  %3618 = vmatmul.msk.f32.gmra.mxu1 %vm233_vm1, %v4878_v33 }
 0x117   : > { %v4914_v37 = vadd.f32 %v1676_v22, %v1450_v6  ;;  %3652 = vmatmul.msk.f32.gmra.mxu2 %vm233_vm1, %v4909_v44  ;;  %v4929_v6 = vld [vmem:[%s4353_s19 + $0x139] sm:$0xff] }
 0x118   : > { %3718 = vmatmul.msk.f32.gmra.mxu3 %vm233_vm1, %v4379_v11 }
 0x119   : > { %5544 = vst [vmem:[#allocation43_spill] sm:$0xff] %v4914_v37  ;;  %3784 = vmatmul.msk.f32.gmra.mxu0 %vm233_vm1, %v4912_v26 }
 0x11a   : > { %v992_v32 = vpop.f32.mrf.mxu2 }
 0x11b   : > { %v1106_v14 = vadd.f32 %v992_v32, %v764_v7  ;;  %v1337_v38 = vpop.f32.mrf.mxu3  ;;  %v653_v22 = vpop.f32.mrf.mxu1  ;;  %v4943_v32 = vld [vmem:[%s4353_s19 + $0x12a] sm:$0xff] }
 0x11c   : > { %v765_v11 = vadd.f32 %v653_v22, %v4615_v59 }
 0x11d   : > { %v1451_v16 = vadd.f32 %v1337_v38, %v1106_v14 }
 0x11e   : > { %v1682_v34 = vpop.f32.mrf.mxu0  ;;  %3619 = vmatmul.msk.f32.gmra.mxu1 %vm233_vm1, %v4895_v58 }
 0x11f   : > { %v4931_v37 = vadd.f32 %v1679_v29, %v1451_v16  ;;  %3653 = vmatmul.msk.f32.gmra.mxu2 %vm233_vm1, %v4926_v8  ;;  %v4946_v16 = vld [vmem:[%s4353_s19 + $0x141] sm:$0xff] }
 0x120   : > { %3719 = vmatmul.msk.f32.gmra.mxu3 %vm233_vm1, %v4396_v15 }
 0x121   : > { %5545 = vst [vmem:[#allocation44_spill] sm:$0xff] %v4931_v37  ;;  %3785 = vmatmul.msk.f32.gmra.mxu0 %vm233_vm1, %v4929_v6 }
 0x122   : > { %v995_v45 = vpop.f32.mrf.mxu2 }
 0x123   : > { %v1107_v18 = vadd.f32 %v995_v45, %v765_v11  ;;  %v1340_v7 = vpop.f32.mrf.mxu3  ;;  %v656_v29 = vpop.f32.mrf.mxu1  ;;  %v4960_v45 = vld [vmem:[%s4353_s19 + $0x13a] sm:$0xff] }
 0x124   : > { %v766_v15 = vadd.f32 %v656_v29, %v4637_v1 }
 0x125   : > { %v1452_v14 = vadd.f32 %v1340_v7, %v1107_v18 }
 0x126   : > { %v1685_v38 = vpop.f32.mrf.mxu0  ;;  %3620 = vmatmul.msk.f32.gmra.mxu1 %vm233_vm1, %v4912_v26 }
 0x127   : > { %v4948_v37 = vadd.f32 %v1682_v34, %v1452_v14  ;;  %3654 = vmatmul.msk.f32.gmra.mxu2 %vm233_vm1, %v4943_v32  ;;  %v4963_v14 = vld [vmem:[%s4353_s19 + $0x151] sm:$0xff] }
 0x128   : > { %3720 = vmatmul.msk.f32.gmra.mxu3 %vm233_vm1, %v4413_v19 }
 0x129   : > { %5546 = vst [vmem:[#allocation45_spill] sm:$0xff] %v4948_v37  ;;  %3786 = vmatmul.msk.f32.gmra.mxu0 %vm233_vm1, %v4946_v16 }
 0x12a   : > { %v998_v59 = vpop.f32.mrf.mxu2 }
 0x12b   : > { %v1108_v22 = vadd.f32 %v998_v59, %v766_v15  ;;  %v1343_v11 = vpop.f32.mrf.mxu3  ;;  %v659_v34 = vpop.f32.mrf.mxu1  ;;  %v4977_v59 = vld [vmem:[%s4353_s19 + $0x142] sm:$0xff] }
 0x12c   : > { %v767_v19 = vadd.f32 %v659_v34, %v4659_v9 }
 0x12d   : > { %v1453_v18 = vadd.f32 %v1343_v11, %v1108_v22 }
 0x12e   : > { %v1688_v7 = vpop.f32.mrf.mxu0  ;;  %3621 = vmatmul.msk.f32.gmra.mxu1 %vm233_vm1, %v4929_v6 }
 0x12f   : > { %v4965_v37 = vadd.f32 %v1685_v38, %v1453_v18  ;;  %3655 = vmatmul.msk.f32.gmra.mxu2 %vm233_vm1, %v4960_v45  ;;  %v4980_v18 = vld [vmem:[%s4353_s19 + $0x159] sm:$0xff] }
 0x130   : > { %3721 = vmatmul.msk.f32.gmra.mxu3 %vm233_vm1, %v4430_v23  ;;  %5548 = vst [vmem:[#allocation47_spill] sm:$0xff] %v4980_v18 }
 0x131   : > { %5547 = vst [vmem:[#allocation46_spill] sm:$0xff] %v4965_v37  ;;  %3787 = vmatmul.msk.f32.gmra.mxu0 %vm233_vm1, %v4963_v14 }
 0x132   : > { %v1001_v1 = vpop.f32.mrf.mxu2 }
 0x133   : > { %v1109_v29 = vadd.f32 %v1001_v1, %v767_v19  ;;  %v1346_v15 = vpop.f32.mrf.mxu3  ;;  %v662_v38 = vpop.f32.mrf.mxu1  ;;  %v4994_v1 = vld [vmem:[%s4353_s19 + $0x152] sm:$0xff] }
 0x134   : > { %v768_v23 = vadd.f32 %v662_v38, %v4681_v25 }
 0x135   : > { %v1454_v22 = vadd.f32 %v1346_v15, %v1109_v29 }
 0x136   : > { %v1691_v11 = vpop.f32.mrf.mxu0  ;;  %3622 = vmatmul.msk.f32.gmra.mxu1 %vm233_vm1, %v4946_v16 }
 0x137   : > { %v4982_v37 = vadd.f32 %v1688_v7, %v1454_v22  ;;  %3656 = vmatmul.msk.f32.gmra.mxu2 %vm233_vm1, %v4977_v59  ;;  %v4997_v22 = vld [vmem:[%s4353_s19 + $0x169] sm:$0xff] }
 0x138   : > { %3722 = vmatmul.msk.f32.gmra.mxu3 %vm233_vm1, %v4462_v30 }
 0x139   : > { %5549 = vst [vmem:[#allocation48_spill] sm:$0xff] %v4982_v37  ;;  %3788 = vmatmul.msk.f32.gmra.mxu0 %vm233_vm1, %v4980_v18 }
 0x13a   : > { %v1004_v9 = vpop.f32.mrf.mxu2 }
 0x13b   : > { %v1110_v34 = vadd.f32 %v1004_v9, %v768_v23  ;;  %v1349_v19 = vpop.f32.mrf.mxu3  ;;  %v665_v7 = vpop.f32.mrf.mxu1  ;;  %v5011_v9 = vld [vmem:[%s4353_s19 + $0x15a] sm:$0xff] }
 0x13c   : > { %v769_v30 = vadd.f32 %v665_v7, %v4703_v42  ;;  %5551 = vst [vmem:[#allocation50_spill] sm:$0xff] %v5011_v9 }
 0x13d   : > { %v1455_v29 = vadd.f32 %v1349_v19, %v1110_v34 }
 0x13e   : > { %v1694_v15 = vpop.f32.mrf.mxu0  ;;  %3623 = vmatmul.msk.f32.gmra.mxu1 %vm233_vm1, %v4963_v14 }
 0x13f   : > { %v4999_v37 = vadd.f32 %v1691_v11, %v1455_v29  ;;  %3657 = vmatmul.msk.f32.gmra.mxu2 %vm233_vm1, %v4994_v1  ;;  %v5014_v29 = vld [vmem:[%s4353_s19 + $0x171] sm:$0xff] }
 0x140   : > { %3723 = vmatmul.msk.f32.gmra.mxu3 %vm233_vm1, %v4486_v35 }
 0x141   : > { %5550 = vst [vmem:[#allocation49_spill] sm:$0xff] %v4999_v37  ;;  %3789 = vmatmul.msk.f32.gmra.mxu0 %vm233_vm1, %v4997_v22 }
 0x142   : > { %v1007_v25 = vpop.f32.mrf.mxu2 }
 0x143   : > { %v1111_v38 = vadd.f32 %v1007_v25, %v769_v30  ;;  %v1352_v23 = vpop.f32.mrf.mxu3  ;;  %v668_v11 = vpop.f32.mrf.mxu1 }
 0x144   : > { %v770_v35 = vadd.f32 %v668_v11, %v4725_v41 }
 0x145   : > { %v1456_v34 = vadd.f32 %v1352_v23, %v1111_v38  ;;  %v3691_v23 = vld [vmem:[%s4353_s19 + $0x180] sm:$0xff] }
 0x146   : > { %v1697_v19 = vpop.f32.mrf.mxu0  ;;  %3624 = vmatmul.msk.f32.gmra.mxu1 %vm233_vm1, %v4980_v18 }
 0x147   : > { %v5016_v37 = vadd.f32 %v1694_v15, %v1456_v34  ;;  %3658 = vmatmul.msk.f32.gmra.mxu2 %vm233_vm1, %v5011_v9  ;;  %v851_v15 = vld [vmem:[%s4353_s19 + $0x16a] sm:$0xff] }
 0x148   : > { %3724 = vmatmul.msk.f32.gmra.mxu3 %vm233_vm1, %v4506_v39 }
 0x149   : > { %5552 = vst [vmem:[#allocation51_spill] sm:$0xff] %v5016_v37  ;;  %3790 = vmatmul.msk.f32.gmra.mxu0 %vm233_vm1, %v5014_v29  ;;  %v5030_v37 = vld [vmem:[%s4353_s19 + $0x181] sm:$0xff] }
 0x14a   : > { %v1010_v42 = vpop.f32.mrf.mxu2 }
 0x14b   : > { %v1112_v7 = vadd.f32 %v1010_v42, %v770_v35  ;;  %v1355_v30 = vpop.f32.mrf.mxu3  ;;  %v671_v25 = vpop.f32.mrf.mxu1 }
 0x14c   : > { %v771_v39 = vadd.f32 %v671_v25, %v4747_v43 }
 0x14d   : > { %v1457_v38 = vadd.f32 %v1355_v30, %v1112_v7  ;;  %v852_v7 = vld [vmem:[%s4353_s19 + $0x172] sm:$0xff] }
 0x14e   : > { %v1700_v34 = vpop.f32.mrf.mxu0  ;;  %3625 = vmatmul.msk.f32.gmra.mxu1 %vm233_vm1, %v4997_v22 }
 0x14f   : > { %v5032_v9 = vadd.f32 %v1697_v19, %v1457_v38  ;;  %3659 = vmatmul.msk.f32.gmra.mxu2 %vm233_vm1, %v851_v15  ;;  %v3692_v19 = vld [vmem:[%s4353_s19 + $0x188] sm:$0xff] }
 0x150   : > { %3725 = vmatmul.msk.f32.gmra.mxu3 %vm233_vm1, %v3691_v23 }
 0x151   : > { %5553 = vst [vmem:[#allocation52_spill] sm:$0xff] %v5032_v9  ;;  %3791 = vmatmul.msk.f32.gmra.mxu0 %vm233_vm1, %v5030_v37  ;;  %v3758_v9 = vld [vmem:[%s4353_s19 + $0x189] sm:$0xff] }
 0x152   : > { %v1013_v41 = vpop.f32.mrf.mxu2 }
 0x153   : > { %v1113_v11 = vadd.f32 %v1013_v41, %v771_v39  ;;  %v1358_v35 = vpop.f32.mrf.mxu3  ;;  %v674_v42 = vpop.f32.mrf.mxu1 }
 0x154   : > { %v772_v43 = vadd.f32 %v674_v42, %v4769_v20 }
 0x155   : > { %v1458_v30 = vadd.f32 %v1358_v35, %v1113_v11 }
 0x156   : > { %v1703_v38 = vpop.f32.mrf.mxu0  ;;  %3626 = vmatmul.msk.f32.gmra.mxu1 %vm233_vm1, %v5014_v29 }
 0x157   : > { %v5044_v18 = vadd.f32 %v1700_v34, %v1458_v30  ;;  %3660 = vmatmul.msk.f32.gmra.mxu2 %vm233_vm1, %v852_v7 }
 0x158   : > { %3726 = vmatmul.msk.f32.gmra.mxu3 %vm233_vm1, %v3692_v19 }
 0x159   : > { %3792 = vmatmul.msk.f32.gmra.mxu0 %vm233_vm1, %v3758_v9 }
 0x15a   : > { %v1016_v25 = vpop.f32.mrf.mxu2 }
 0x15b   : > { %v1114_v15 = vadd.f32 %v1016_v25, %v772_v43  ;;  %v1361_v23 = vpop.f32.mrf.mxu3  ;;  %v677_v39 = vpop.f32.mrf.mxu1 }
 0x15c   : > { %v773_v20 = vadd.f32 %v677_v39, %v4633_v63 }
 0x15d   : > { %v1459_v41 = vadd.f32 %v1361_v23, %v1114_v15 }
 0x15e   : > { %v1706_v11 = vpop.f32.mrf.mxu0  ;;  %3827 = vmatmul.msk.f32.vlgmr.msra.gmra.mxu1 %vm233_vm1, %v4534_v47 }
 0x15f   : > { %v5052_v35 = vadd.f32 %v1703_v38, %v1459_v41  ;;  %3893 = vmatmul.msk.f32.vlgmr.msra.gmra.mxu2 %vm233_vm1, %v4433_v24 }
 0x160   : > { %3959 = vmatmul.msk.f32.vlgmr.msra.gmra.mxu3 %vm233_vm1, %v4537_v48 }
 0x161   : > { %4025 = vmatmul.msk.f32.vlgmr.msra.gmra.mxu0 %vm233_vm1, %v4560_v51 }
 0x162   : > { %v1019_v9 = vpop.f32.mrf.mxu2 }
 0x163   : > { %v1115_v34 = vadd.f32 %v1019_v9, %v773_v20  ;;  %v1364_v42 = vpop.f32.mrf.mxu3  ;;  %v680_v7 = vpop.f32.mrf.mxu1 }
 0x164   : > { %v774_v24 = vadd.f32 %v680_v7, %v4655_v5 }
 0x165   : > { %v1460_v30 = vadd.f32 %v1364_v42, %v1115_v34  ;;  %v3863_v34 = vld [vmem:[%s4353_s19 + $0x60] sm:$0xff] }
 0x166   : > { %v1709_v19 = vpop.f32.mrf.mxu0  ;;  %3828 = vmatmul.msk.f32.gmra.mxu1 %vm233_vm1, %v4547_v49 }
 0x167   : > { %v5063_v38 = vadd.f32 %v1706_v11, %v1460_v30  ;;  %3894 = vmatmul.msk.f32.gmra.mxu2 %vm233_vm1, %v4465_v31 }
 0x168   : > { %3960 = vmatmul.msk.f32.gmra.mxu3 %vm233_vm1, %v4550_v50 }
 0x169   : > { %4026 = vmatmul.msk.f32.gmra.mxu0 %vm233_vm1, %v4574_v53 }
 0x16a   : > { %v1022_v47 = vpop.f32.mrf.mxu2 }
 0x16b   : > { %v1116_v48 = vadd.f32 %v1022_v47, %v774_v24  ;;  %v1367_v63 = vpop.f32.mrf.mxu3  ;;  %v683_v43 = vpop.f32.mrf.mxu1  ;;  %v3864_v47 = vld [vmem:[%s4353_s19 + $0x68] sm:$0xff] }
 0x16c   : > { %v775_v31 = vadd.f32 %v683_v43, %v4677_v17 }
 0x16d   : > { %v1461_v25 = vadd.f32 %v1367_v63, %v1116_v48 }
 0x16e   : > { %v1712_v15 = vpop.f32.mrf.mxu0  ;;  %3829 = vmatmul.msk.f32.gmra.mxu1 %vm233_vm1, %v4560_v51 }
 0x16f   : > { %v5074_v23 = vadd.f32 %v1709_v19, %v1461_v25  ;;  %3895 = vmatmul.msk.f32.gmra.mxu2 %vm233_vm1, %v4489_v36  ;;  %v5557_v25 = vld [vmem:[#allocation27_spill] sm:$0xff] }
 0x170   : > { %3961 = vmatmul.msk.f32.gmra.mxu3 %vm233_vm1, %v4563_v52 }
 0x171   : > { %4027 = vmatmul.msk.f32.gmra.mxu0 %vm233_vm1, %v4588_v55 }
 0x172   : > { %v1025_v49 = vpop.f32.mrf.mxu2 }
 0x173   : > { %v1117_v50 = vadd.f32 %v1025_v49, %v775_v31  ;;  %v1370_v5 = vpop.f32.mrf.mxu3  ;;  %v686_v39 = vpop.f32.mrf.mxu1 }
 0x174   : > { %v776_v36 = vadd.f32 %v686_v39, %v4699_v21  ;;  %v3865_v39 = vld [vmem:[%s4353_s19 + $0x78] sm:$0xff] }
 0x175   : > { %v1462_v41 = vadd.f32 %v1370_v5, %v1117_v50 }
 0x176   : > { %v1715_v11 = vpop.f32.mrf.mxu0  ;;  %3830 = vmatmul.msk.f32.gmra.mxu1 %vm233_vm1, %v4574_v53 }
 0x177   : > { %v5085_v20 = vadd.f32 %v1712_v15, %v1462_v41  ;;  %3896 = vmatmul.msk.f32.gmra.mxu2 %vm233_vm1, %v4509_v40  ;;  %v5554_v40 = vld [vmem:[#allocation23_spill] sm:$0xff] }
 0x178   : > { %3962 = vmatmul.msk.f32.gmra.mxu3 %vm233_vm1, %v4577_v54 }
 0x179   : > { %4028 = vmatmul.msk.f32.gmra.mxu0 %vm233_vm1, %v4602_v57 }
 0x17a   : > { %v1028_v51 = vpop.f32.mrf.mxu2 }
 0x17b   : > { %v1118_v52 = vadd.f32 %v1028_v51, %v776_v36  ;;  %v1373_v17 = vpop.f32.mrf.mxu3  ;;  %v689_v9 = vpop.f32.mrf.mxu1  ;;  %v5559_v51 = vld [vmem:[#allocation15_spill] sm:$0xff] }
 0x17c   : > { %v777_v54 = vadd.f32 %v689_v9, %v5554_v40  ;;  %v3866_v40 = vld [vmem:[%s4353_s19 + $0x80] sm:$0xff] }
 0x17d   : > { %v1463_v42 = vadd.f32 %v1373_v17, %v1118_v52  ;;  %v5560_v52 = vld [vmem:[#allocation31_spill] sm:$0xff] }
 0x17e   : > { %v1718_v7 = vpop.f32.mrf.mxu0  ;;  %3831 = vmatmul.msk.f32.gmra.mxu1 %vm233_vm1, %v4588_v55  ;;  %v5555_v55 = vld [vmem:[#allocation9_spill] sm:$0xff] }
 0x17f   : > { %v5097_v53 = vadd.f32 %v1715_v11, %v1463_v42  ;;  %3897 = vmatmul.msk.f32.gmra.mxu2 %vm233_vm1, %v3863_v34 }
 0x180   : > { %3963 = vmatmul.msk.f32.gmra.mxu3 %vm233_vm1, %v4591_v56  ;;  %v5556_v56 = vld [vmem:[#allocation12_spill] sm:$0xff] }
 0x181   : > { %4029 = vmatmul.msk.f32.gmra.mxu0 %vm233_vm1, %v4618_v60 }
 0x182   : > { %v1031_v21 = vpop.f32.mrf.mxu2 }
 0x183   : > { %v1119_v30 = vadd.f32 %v1031_v21, %v777_v54  ;;  %v1376_v19 = vpop.f32.mrf.mxu3  ;;  %v692_v24 = vpop.f32.mrf.mxu1 }
 0x184   : > { %v778_v15 = vadd.f32 %v692_v24, %v5557_v25  ;;  %v5563_v24 = vld [vmem:[#allocation34_spill] sm:$0xff] }
 0x185   : > { %v1464_v48 = vadd.f32 %v1376_v19, %v1119_v30  ;;  %v5562_v19 = vld [vmem:[#allocation18_spill] sm:$0xff] }
 0x186   : > { %v1721_v63 = vpop.f32.mrf.mxu0  ;;  %3832 = vmatmul.msk.f32.gmra.mxu1 %vm233_vm1, %v4602_v57  ;;  %v5558_v57 = vld [vmem:[#allocation10_spill] sm:$0xff] }
 0x187   : > { %v5108_v43 = vadd.f32 %v1718_v7, %v1464_v48  ;;  %3898 = vmatmul.msk.f32.gmra.mxu2 %vm233_vm1, %v3864_v47 }
 0x188   : > { %3964 = vmatmul.msk.f32.gmra.mxu3 %vm233_vm1, %v5555_v55 }
 0x189   : > { %4030 = vmatmul.msk.f32.gmra.mxu0 %vm233_vm1, %v5556_v56 }
 0x18a   : > { %v1034_v31 = vpop.f32.mrf.mxu2 }
 0x18b   : > { %v1120_v49 = vadd.f32 %v1034_v31, %v778_v15  ;;  %v1379_v50 = vpop.f32.mrf.mxu3  ;;  %v695_v5 = vpop.f32.mrf.mxu1  ;;  %v3867_v15 = vld [vmem:[%s4353_s19 + $0x90] sm:$0xff] }
 0x18c   : > { %v779_v17 = vadd.f32 %v695_v5, %v5560_v52  ;;  %v5565_v5 = vld [vmem:[#allocation21_spill] sm:$0xff] }
 0x18d   : > { %v1465_v41 = vadd.f32 %v1379_v50, %v1120_v49 }
 0x18e   : > { %v1724_v11 = vpop.f32.mrf.mxu0  ;;  %3833 = vmatmul.msk.f32.gmra.mxu1 %vm233_vm1, %v4618_v60  ;;  %v5561_v60 = vld [vmem:[#allocation13_spill] sm:$0xff] }
 0x18f   : > { %v5119_v36 = vadd.f32 %v1721_v63, %v1465_v41  ;;  %3899 = vmatmul.msk.f32.gmra.mxu2 %vm233_vm1, %v3865_v39  ;;  %v5566_v39 = vld [vmem:[#allocation11_spill] sm:$0xff] }
 0x190   : > { %3965 = vmatmul.msk.f32.gmra.mxu3 %vm233_vm1, %v5558_v57 }
 0x191   : > { %4031 = vmatmul.msk.f32.gmra.mxu0 %vm233_vm1, %v5559_v51 }
 0x192   : > { %v1037_v9 = vpop.f32.mrf.mxu2 }
 0x193   : > { %v1121_v34 = vadd.f32 %v1037_v9, %v779_v17  ;;  %v1382_v42 = vpop.f32.mrf.mxu3  ;;  %v698_v7 = vpop.f32.mrf.mxu1  ;;  %v3868_v9 = vld [vmem:[%s4353_s19 + $0x98] sm:$0xff] }
 0x194   : > { %v780_v47 = vadd.f32 %v698_v7, %v5563_v24 }
 0x195   : > { %v1466_v54 = vadd.f32 %v1382_v42, %v1121_v34 }
 0x196   : > { %v1727_v21 = vpop.f32.mrf.mxu0  ;;  %3834 = vmatmul.msk.f32.gmra.mxu1 %vm233_vm1, %v5556_v56  ;;  %v5564_v56 = vld [vmem:[#allocation16_spill] sm:$0xff] }
 0x197   : > { %v5130_v30 = vadd.f32 %v1724_v11, %v1466_v54  ;;  %3900 = vmatmul.msk.f32.gmra.mxu2 %vm233_vm1, %v3866_v40  ;;  %v5568_v40 = vld [vmem:[#allocation25_spill] sm:$0xff]  ;;  %v5569_v54 = vld [vmem:[#allocation14_spill] sm:$0xff] }
 0x198   : > { %3966 = vmatmul.msk.f32.gmra.mxu3 %vm233_vm1, %v5561_v60 }
 0x199   : > { %4032 = vmatmul.msk.f32.gmra.mxu0 %vm233_vm1, %v5562_v19 }
 0x19a   : > { %v1040_v48 = vpop.f32.mrf.mxu2 }
 0x19b   : > { %v1122_v63 = vadd.f32 %v1040_v48, %v780_v47  ;;  %v1385_v55 = vpop.f32.mrf.mxu3  ;;  %v701_v25 = vpop.f32.mrf.mxu1 }
 0x19c   : > { %v781_v41 = vadd.f32 %v701_v25, %v5566_v39 }
 0x19d   : > { %v1467_v31 = vadd.f32 %v1385_v55, %v1122_v63  ;;  %v3869_v63 = vld [vmem:[%s4353_s19 + $0xa8] sm:$0xff] }
 0x19e   : > { %v1730_v49 = vpop.f32.mrf.mxu0  ;;  %3835 = vmatmul.msk.f32.gmra.mxu1 %vm233_vm1, %v5559_v51  ;;  %v5567_v51 = vld [vmem:[#allocation19_spill] sm:$0xff] }
 0x19f   : > { %v5141_v50 = vadd.f32 %v1727_v21, %v1467_v31  ;;  %3901 = vmatmul.msk.f32.gmra.mxu2 %vm233_vm1, %v3867_v15  ;;  %v5571_v31 = vld [vmem:[#allocation29_spill] sm:$0xff] }
 0x1a0   : > { %3967 = vmatmul.msk.f32.gmra.mxu3 %vm233_vm1, %v5564_v56 }
 0x1a1   : > { %4033 = vmatmul.msk.f32.gmra.mxu0 %vm233_vm1, %v5565_v5 }
 0x1a2   : > { %v1043_v11 = vpop.f32.mrf.mxu2 }
 0x1a3   : > { %v1123_v57 = vadd.f32 %v1043_v11, %v781_v41  ;;  %v1388_v52 = vpop.f32.mrf.mxu3  ;;  %v704_v17 = vpop.f32.mrf.mxu1 }
 0x1a4   : > { %v782_v21 = vadd.f32 %v704_v17, %v5569_v54 }
 0x1a5   : > { %v1468_v34 = vadd.f32 %v1388_v52, %v1123_v57  ;;  %v3870_v52 = vld [vmem:[%s4353_s19 + $0xb0] sm:$0xff] }
 0x1a6   : > { %v1733_v42 = vpop.f32.mrf.mxu0  ;;  %3836 = vmatmul.msk.f32.gmra.mxu1 %vm233_vm1, %v5562_v19  ;;  %v5570_v19 = vld [vmem:[#allocation22_spill] sm:$0xff] }
 0x1a7   : > { %v5152_v7 = vadd.f32 %v1730_v49, %v1468_v34  ;;  %3902 = vmatmul.msk.f32.gmra.mxu2 %vm233_vm1, %v3868_v9  ;;  %v5572_v49 = vld [vmem:[#allocation17_spill] sm:$0xff] }
 0x1a8   : > { %3968 = vmatmul.msk.f32.gmra.mxu3 %vm233_vm1, %v5567_v51  ;;  %v5575_v51 = vld [vmem:[#allocation20_spill] sm:$0xff] }
 0x1a9   : > { %4034 = vmatmul.msk.f32.gmra.mxu0 %vm233_vm1, %v5568_v40 }
 0x1aa   : > { %v1046_v60 = vpop.f32.mrf.mxu2 }
 0x1ab   : > { %v1124_v24 = vadd.f32 %v1046_v60, %v782_v21  ;;  %v1391_v47 = vpop.f32.mrf.mxu3  ;;  %v707_v48 = vpop.f32.mrf.mxu1 }
 0x1ac   : > { %v783_v56 = vadd.f32 %v707_v48, %v5572_v49  ;;  %v3871_v48 = vld [vmem:[%s4353_s19 + $0xc0] sm:$0xff] }
 0x1ad   : > { %v1469_v55 = vadd.f32 %v1391_v47, %v1124_v24  ;;  %v5578_v49 = vld [vmem:[#allocation24_spill] sm:$0xff] }
 0x1ae   : > { %v1736_v25 = vpop.f32.mrf.mxu0  ;;  %3837 = vmatmul.msk.f32.gmra.mxu1 %vm233_vm1, %v5565_v5  ;;  %v5573_v5 = vld [vmem:[#allocation26_spill] sm:$0xff] }
 0x1af   : > { %v5163_v15 = vadd.f32 %v1733_v42, %v1469_v55  ;;  %3903 = vmatmul.msk.f32.gmra.mxu2 %vm233_vm1, %v3869_v63  ;;  %v5574_v42 = vld [vmem:[#allocation33_spill] sm:$0xff] }
 0x1b0   : > { %3969 = vmatmul.msk.f32.gmra.mxu3 %vm233_vm1, %v5570_v19  ;;  %v5577_v19 = vld [vmem:[#allocation36_spill] sm:$0xff] }
 0x1b1   : > { %4035 = vmatmul.msk.f32.gmra.mxu0 %vm233_vm1, %v5571_v31 }
 0x1b2   : > { %v1049_v39 = vpop.f32.mrf.mxu2 }
 0x1b3   : > { %v1125_v41 = vadd.f32 %v1049_v39, %v783_v56  ;;  %v1394_v11 = vpop.f32.mrf.mxu3  ;;  %v710_v57 = vpop.f32.mrf.mxu1 }
 0x1b4   : > { %v784_v54 = vadd.f32 %v710_v57, %v5575_v51 }
 0x1b5   : > { %v1470_v17 = vadd.f32 %v1394_v11, %v1125_v41 }
 0x1b6   : > { %v1739_v9 = vpop.f32.mrf.mxu0  ;;  %3838 = vmatmul.msk.f32.gmra.mxu1 %vm233_vm1, %v5568_v40  ;;  %v5576_v40 = vld [vmem:[#allocation30_spill] sm:$0xff] }
 0x1b7   : > { %v5174_v34 = vadd.f32 %v1736_v25, %v1470_v17  ;;  %3904 = vmatmul.msk.f32.gmra.mxu2 %vm233_vm1, %v3870_v52  ;;  %v3872_v52 = vld [vmem:[%s4353_s19 + $0xc8] sm:$0xff] }
 0x1b8   : > { %3970 = vmatmul.msk.f32.gmra.mxu3 %vm233_vm1, %v5573_v5 }
 0x1b9   : > { %4036 = vmatmul.msk.f32.gmra.mxu0 %vm233_vm1, %v5574_v42 }
 0x1ba   : > { %v1052_v21 = vpop.f32.mrf.mxu2 }
 0x1bb   : > { %v1126_v60 = vadd.f32 %v1052_v21, %v784_v54  ;;  %v1397_v24 = vpop.f32.mrf.mxu3  ;;  %v713_v47 = vpop.f32.mrf.mxu1 }
 0x1bc   : > { %v785_v56 = vadd.f32 %v713_v47, %v5578_v49  ;;  %v3873_v47 = vld [vmem:[%s4353_s19 + $0xd8] sm:$0xff] }
 0x1bd   : > { %v1471_v63 = vadd.f32 %v1397_v24, %v1126_v60 }
 0x1be   : > { %v1742_v55 = vpop.f32.mrf.mxu0  ;;  %3839 = vmatmul.msk.f32.gmra.mxu1 %vm233_vm1, %v5571_v31  ;;  %v5579_v31 = vld [vmem:[#allocation28_spill] sm:$0xff] }
 0x1bf   : > { %v5185_v25 = vadd.f32 %v1739_v9, %v1471_v63  ;;  %3905 = vmatmul.msk.f32.gmra.mxu2 %vm233_vm1, %v3871_v48 }
 0x1c0   : > { %3971 = vmatmul.msk.f32.gmra.mxu3 %vm233_vm1, %v5576_v40 }
 0x1c1   : > { %4037 = vmatmul.msk.f32.gmra.mxu0 %vm233_vm1, %v5577_v19 }
 0x1c2   : > { %v1055_v39 = vpop.f32.mrf.mxu2 }
 0x1c3   : > { %v1127_v41 = vadd.f32 %v1055_v39, %v785_v56  ;;  %v1400_v11 = vpop.f32.mrf.mxu3  ;;  %v716_v57 = vpop.f32.mrf.mxu1 }
 0x1c4   : > { %v786_v51 = vadd.f32 %v716_v57, %v5579_v31 }
 0x1c5   : > { %v1472_v17 = vadd.f32 %v1400_v11, %v1127_v41  ;;  %v3874_v41 = vld [vmem:[%s4353_s19 + $0xe0] sm:$0xff] }
 0x1c6   : > { %v1745_v9 = vpop.f32.mrf.mxu0  ;;  %3840 = vmatmul.msk.f32.gmra.mxu1 %vm233_vm1, %v5574_v42 }
 0x1c7   : > { %v5196_v5 = vadd.f32 %v1742_v55, %v1472_v17  ;;  %3906 = vmatmul.msk.f32.gmra.mxu2 %vm233_vm1, %v3872_v52 }
 0x1c8   : > { %3972 = vmatmul.msk.f32.gmra.mxu3 %vm233_vm1, %v4777_v12  ;;  %v5580_v12 = vld [vmem:[#allocation32_spill] sm:$0xff] }
 0x1c9   : > { %4038 = vmatmul.msk.f32.gmra.mxu0 %vm233_vm1, %v4807_v2 }
 0x1ca   : > { %v1058_v54 = vpop.f32.mrf.mxu2 }
 0x1cb   : > { %v1128_v21 = vadd.f32 %v1058_v54, %v786_v51  ;;  %v1403_v60 = vpop.f32.mrf.mxu3  ;;  %v719_v24 = vpop.f32.mrf.mxu1  ;;  %v3875_v54 = vld [vmem:[%s4353_s19 + $0xf0] sm:$0xff] }
 0x1cc   : > { %v787_v42 = vadd.f32 %v719_v24, %v5580_v12 }
 0x1cd   : > { %v1473_v48 = vadd.f32 %v1403_v60, %v1128_v21 }
 0x1ce   : > { %v1748_v63 = vpop.f32.mrf.mxu0  ;;  %3841 = vmatmul.msk.f32.gmra.mxu1 %vm233_vm1, %v5577_v19 }
 0x1cf   : > { %v5207_v55 = vadd.f32 %v1745_v9, %v1473_v48  ;;  %3907 = vmatmul.msk.f32.gmra.mxu2 %vm233_vm1, %v3873_v47 }
 0x1d0   : > { %3973 = vmatmul.msk.f32.gmra.mxu3 %vm233_vm1, %v4795_v0  ;;  %v5581_v0 = vld [vmem:[#allocation35_spill] sm:$0xff] }
 0x1d1   : > { %4039 = vmatmul.msk.f32.gmra.mxu0 %vm233_vm1, %v4824_v62 }
 0x1d2   : > { %v1061_v40 = vpop.f32.mrf.mxu2 }
 0x1d3   : > { %v1129_v49 = vadd.f32 %v1061_v40, %v787_v42  ;;  %v1406_v56 = vpop.f32.mrf.mxu3  ;;  %v722_v39 = vpop.f32.mrf.mxu1 }
 0x1d4   : > { %v788_v19 = vadd.f32 %v722_v39, %v5581_v0 }
 0x1d5   : > { %v1474_v11 = vadd.f32 %v1406_v56, %v1129_v49 }
 0x1d6   : > { %v1751_v57 = vpop.f32.mrf.mxu0  ;;  %3842 = vmatmul.msk.f32.gmra.mxu1 %vm233_vm1, %v4807_v2 }
 0x1d7   : > { %v5218_v52 = vadd.f32 %v1748_v63, %v1474_v11  ;;  %3908 = vmatmul.msk.f32.gmra.mxu2 %vm233_vm1, %v3874_v41 }
 0x1d8   : > { %3974 = vmatmul.msk.f32.gmra.mxu3 %vm233_vm1, %v4810_v28  ;;  %v5582_v28 = vld [vmem:[#allocation37_spill] sm:$0xff] }
 0x1d9   : > { %4040 = vmatmul.msk.f32.gmra.mxu0 %vm233_vm1, %v4841_v61 }
 0x1da   : > { %v1064_v17 = vpop.f32.mrf.mxu2 }
 0x1db   : > { %v1130_v9 = vadd.f32 %v1064_v17, %v788_v19  ;;  %v1409_v31 = vpop.f32.mrf.mxu3  ;;  %v2000_v51 = vpop.f32.mrf.mxu1 }
 0x1dc   : > { %v2128_v24 = vadd.f32 %v2000_v51, %v5582_v28 }
 0x1dd   : > { %v1475_v21 = vadd.f32 %v1409_v31, %v1130_v9  ;;  %v5584_v9 = vld [vmem:[#allocation39_spill] sm:$0xff] }
 0x1de   : > { %v3029_v60 = vpop.f32.mrf.mxu0  ;;  %3843 = vmatmul.msk.f32.gmra.mxu1 %vm233_vm1, %v4824_v62  ;;  %v3876_v62 = vld [vmem:[%s4353_s19 + $0xf8] sm:$0xff] }
 0x1df   : > { %v5229_v2 = vadd.f32 %v1751_v57, %v1475_v21  ;;  %3909 = vmatmul.msk.f32.gmra.mxu2 %vm233_vm1, %v3875_v54 }
 0x1e0   : > { %3975 = vmatmul.msk.f32.gmra.mxu3 %vm233_vm1, %v4827_v10  ;;  %v5583_v10 = vld [vmem:[#allocation38_spill] sm:$0xff] }
 0x1e1   : > { %4041 = vmatmul.msk.f32.gmra.mxu0 %vm233_vm1, %v4858_v3 }
 0x1e2   : > { %v2345_v47 = vpop.f32.mrf.mxu2 }
 0x1e3   : > { %v2473_v48 = vadd.f32 %v2345_v47, %v2128_v24  ;;  %v2687_v63 = vpop.f32.mrf.mxu3  ;;  %v2003_v12 = vpop.f32.mrf.mxu1  ;;  %v3878_v47 = vld [vmem:[%s4353_s19 + $0x110] sm:$0xff] }
 0x1e4   : > { %v2129_v56 = vadd.f32 %v2003_v12, %v5583_v10  ;;  %v5585_v12 = vld [vmem:[#allocation40_spill] sm:$0xff] }
 0x1e5   : > { %v2815_v42 = vadd.f32 %v2687_v63, %v2473_v48 }
 0x1e6   : > { %v3032_v40 = vpop.f32.mrf.mxu0  ;;  %3844 = vmatmul.msk.f32.gmra.mxu1 %vm233_vm1, %v4841_v61  ;;  %v3877_v61 = vld [vmem:[%s4353_s19 + $0x108] sm:$0xff] }
 0x1e7   : > { %v3157_v49 = vadd.f32 %v3029_v60, %v2815_v42  ;;  %3910 = vmatmul.msk.f32.gmra.mxu2 %vm233_vm1, %v3876_v62 }
 0x1e8   : > { %3976 = vmatmul.msk.f32.gmra.mxu3 %vm233_vm1, %v4844_v46 }
 0x1e9   : > { %4042 = vmatmul.msk.f32.gmra.mxu0 %vm233_vm1, %v4875_v13  ;;  %3253 = vst [vmem:[%s5252_s7] sm:$0xff] %v3157_v49  ;;  %v3323_v46 = vmul.f32 %v3157_v49, %v3157_v49 }
 0x1ea   : > { %v2348_v39 = vpop.f32.mrf.mxu2 }
 0x1eb   : > { %v2474_v41 = vadd.f32 %v2348_v39, %v2129_v56  ;;  %v2690_v11 = vpop.f32.mrf.mxu3  ;;  %v2006_v57 = vpop.f32.mrf.mxu1 }
 0x1ec   : > { %v2130_v31 = vadd.f32 %v2006_v57, %v5584_v9 }
 0x1ed   : > { %v2816_v0 = vadd.f32 %v2690_v11, %v2474_v41 }
 0x1ee   : > { %v3035_v19 = vpop.f32.mrf.mxu0  ;;  %3845 = vmatmul.msk.f32.gmra.mxu1 %vm233_vm1, %v4858_v3 }
 0x1ef   : > { %v3158_v17 = vadd.f32 %v3032_v40, %v2816_v0  ;;  %3911 = vmatmul.msk.f32.gmra.mxu2 %vm233_vm1, %v3877_v61 }
 0x1f0   : > { %3977 = vmatmul.msk.f32.gmra.mxu3 %vm233_vm1, %v4861_v4 }
 0x1f1   : > { %4043 = vmatmul.msk.f32.gmra.mxu0 %vm233_vm1, %v4892_v27  ;;  %3254 = vst [vmem:[%s5252_s7 + $0x8] sm:$0xff] %v3158_v17  ;;  %v3285_v51 = vadd.f32 %v3158_v17, %v3157_v49  ;;  %v3324_v54 = vmul.f32 %v3158_v17, %v3158_v17 }
 0x1f2   : > { %v2351_v21 = vpop.f32.mrf.mxu2 }
 0x1f3   : > { %v3355_v60 = vadd.f32 %v3324_v54, %v3323_v46  ;;  %v2475_v28 = vadd.f32 %v2351_v21, %v2130_v31  ;;  %v2693_v24 = vpop.f32.mrf.mxu3  ;;  %v2009_v3 = vpop.f32.mrf.mxu1 }
 0x1f4   : > { %v2131_v62 = vadd.f32 %v2009_v3, %v5585_v12 }
 0x1f5   : > { %v2817_v48 = vadd.f32 %v2693_v24, %v2475_v28 }
 0x1f6   : > { %v3038_v63 = vpop.f32.mrf.mxu0  ;;  %3846 = vmatmul.msk.f32.gmra.mxu1 %vm233_vm1, %v4875_v13  ;;  %v3879_v13 = vld [vmem:[%s4353_s19 + $0x120] sm:$0xff] }
 0x1f7   : > { %v3159_v4 = vadd.f32 %v3035_v19, %v2817_v48  ;;  %3912 = vmatmul.msk.f32.gmra.mxu2 %vm233_vm1, %v3878_v47 }
 0x1f8   : > { %3978 = vmatmul.msk.f32.gmra.mxu3 %vm233_vm1, %v4878_v33  ;;  %v5586_v33 = vld [vmem:[#allocation41_spill] sm:$0xff] }
 0x1f9   : > { %4044 = vmatmul.msk.f32.gmra.mxu0 %vm233_vm1, %v4909_v44  ;;  %3255 = vst [vmem:[%s5252_s7 + $0x10] sm:$0xff] %v3159_v4  ;;  %v3286_v42 = vadd.f32 %v3285_v51, %v3159_v4  ;;  %v3325_v40 = vmul.f32 %v3159_v4, %v3159_v4 }
 0x1fa   : > { %v2354_v49 = vpop.f32.mrf.mxu2 }
 0x1fb   : > { %v3356_v10 = vadd.f32 %v3355_v60, %v3325_v40  ;;  %v2476_v56 = vadd.f32 %v2354_v49, %v2131_v62  ;;  %v2696_v39 = vpop.f32.mrf.mxu3  ;;  %v2012_v41 = vpop.f32.mrf.mxu1 }
 0x1fc   : > { %v2132_v0 = vadd.f32 %v2012_v41, %v5586_v33 }
 0x1fd   : > { %v2818_v11 = vadd.f32 %v2696_v39, %v2476_v56 }
 0x1fe   : > { %v3041_v57 = vpop.f32.mrf.mxu0  ;;  %3847 = vmatmul.msk.f32.gmra.mxu1 %vm233_vm1, %v4892_v27  ;;  %v3880_v27 = vld [vmem:[%s4353_s19 + $0x128] sm:$0xff] }
 0x1ff   : > { %v3160_v61 = vadd.f32 %v3038_v63, %v2818_v11  ;;  %3913 = vmatmul.msk.f32.gmra.mxu2 %vm233_vm1, %v3879_v13 }
 0x200   : > { %3979 = vmatmul.msk.f32.gmra.mxu3 %vm233_vm1, %v4895_v58  ;;  %v5587_v58 = vld [vmem:[#allocation42_spill] sm:$0xff] }
 0x201   : > { %4045 = vmatmul.msk.f32.gmra.mxu0 %vm233_vm1, %v4926_v8  ;;  %3256 = vst [vmem:[%s5252_s7 + $0x18] sm:$0xff] %v3160_v61  ;;  %v3287_v19 = vadd.f32 %v3286_v42, %v3160_v61  ;;  %v3326_v17 = vmul.f32 %v3160_v61, %v3160_v61 }
 0x202   : > { %v2357_v46 = vpop.f32.mrf.mxu2 }
 0x203   : > { %v3357_v9 = vadd.f32 %v3356_v10, %v3326_v17  ;;  %v2477_v31 = vadd.f32 %v2357_v46, %v2132_v0  ;;  %v2699_v51 = vpop.f32.mrf.mxu3  ;;  %v2015_v54 = vpop.f32.mrf.mxu1 }
 0x204   : > { %v2133_v24 = vadd.f32 %v2015_v54, %v5587_v58 }
 0x205   : > { %v2819_v21 = vadd.f32 %v2699_v51, %v2477_v31 }
 0x206   : > { %v3044_v60 = vpop.f32.mrf.mxu0  ;;  %3848 = vmatmul.msk.f32.gmra.mxu1 %vm233_vm1, %v4909_v44  ;;  %v3881_v44 = vld [vmem:[%s4353_s19 + $0x138] sm:$0xff] }
 0x207   : > { %v3161_v28 = vadd.f32 %v3041_v57, %v2819_v21  ;;  %3914 = vmatmul.msk.f32.gmra.mxu2 %vm233_vm1, %v3880_v27 }
 0x208   : > { %3980 = vmatmul.msk.f32.gmra.mxu3 %vm233_vm1, %v4912_v26  ;;  %v5588_v26 = vld [vmem:[#allocation43_spill] sm:$0xff] }
 0x209   : > { %4046 = vmatmul.msk.f32.gmra.mxu0 %vm233_vm1, %v4943_v32  ;;  %3257 = vst [vmem:[%s5252_s7 + $0x20] sm:$0xff] %v3161_v28  ;;  %v3288_v3 = vadd.f32 %v3287_v19, %v3161_v28  ;;  %v3327_v47 = vmul.f32 %v3161_v28, %v3161_v28 }
 0x20a   : > { %v2360_v48 = vpop.f32.mrf.mxu2 }
 0x20b   : > { %v3358_v63 = vadd.f32 %v3357_v9, %v3327_v47  ;;  %v2478_v4 = vadd.f32 %v2360_v48, %v2133_v24  ;;  %v2702_v12 = vpop.f32.mrf.mxu3  ;;  %v2018_v62 = vpop.f32.mrf.mxu1 }
 0x20c   : > { %v2134_v10 = vadd.f32 %v2018_v62, %v5588_v26  ;;  %v3884_v62 = vld [vmem:[%s4353_s19 + $0x158] sm:$0xff] }
 0x20d   : > { %v2820_v42 = vadd.f32 %v2702_v12, %v2478_v4 }
 0x20e   : > { %v3047_v40 = vpop.f32.mrf.mxu0  ;;  %3849 = vmatmul.msk.f32.gmra.mxu1 %vm233_vm1, %v4926_v8  ;;  %v3882_v8 = vld [vmem:[%s4353_s19 + $0x140] sm:$0xff] }
 0x20f   : > { %v3162_v49 = vadd.f32 %v3044_v60, %v2820_v42  ;;  %3915 = vmatmul.msk.f32.gmra.mxu2 %vm233_vm1, %v3881_v44 }
 0x210   : > { %3981 = vmatmul.msk.f32.gmra.mxu3 %vm233_vm1, %v4929_v6  ;;  %v5589_v6 = vld [vmem:[#allocation44_spill] sm:$0xff] }
 0x211   : > { %4047 = vmatmul.msk.f32.gmra.mxu0 %vm233_vm1, %v4960_v45  ;;  %3258 = vst [vmem:[%s5252_s7 + $0x28] sm:$0xff] %v3162_v49  ;;  %v3289_v56 = vadd.f32 %v3288_v3, %v3162_v49  ;;  %v3328_v39 = vmul.f32 %v3162_v49, %v3162_v49  ;;  %v5593_v49 = vld [vmem:[#allocation46_spill] sm:$0xff] }
 0x212   : > { %v2363_v41 = vpop.f32.mrf.mxu2 }
 0x213   : > { %v3359_v13 = vadd.f32 %v3358_v63, %v3328_v39  ;;  %v2479_v11 = vadd.f32 %v2363_v41, %v2134_v10  ;;  %v2705_v57 = vpop.f32.mrf.mxu3  ;;  %v2021_v61 = vpop.f32.mrf.mxu1 }
 0x214   : > { %v2135_v17 = vadd.f32 %v2021_v61, %v5589_v6  ;;  %v3819_v61 = vld [vmem:[%s4353_s19 + $0x152] sm:$0xff] }
 0x215   : > { %v2821_v33 = vadd.f32 %v2705_v57, %v2479_v11 }
 0x216   : > { %v3050_v0 = vpop.f32.mrf.mxu0  ;;  %3850 = vmatmul.msk.f32.gmra.mxu1 %vm233_vm1, %v4943_v32  ;;  %v3883_v32 = vld [vmem:[%s4353_s19 + $0x150] sm:$0xff] }
 0x217   : > { %v3163_v19 = vadd.f32 %v3047_v40, %v2821_v33  ;;  %3916 = vmatmul.msk.f32.gmra.mxu2 %vm233_vm1, %v3882_v8  ;;  %v5592_v40 = vld [vmem:[#allocation50_spill] sm:$0xff] }
 0x218   : > { %3982 = vmatmul.msk.f32.gmra.mxu3 %vm233_vm1, %v4946_v16  ;;  %v3885_v8 = vld [vmem:[%s4353_s19 + $0x168] sm:$0xff] }
 0x219   : > { %4048 = vmatmul.msk.f32.gmra.mxu0 %vm233_vm1, %v4977_v59  ;;  %3259 = vst [vmem:[%s5252_s7 + $0x30] sm:$0xff] %v3163_v19  ;;  %v3290_v46 = vadd.f32 %v3289_v56, %v3163_v19  ;;  %v3329_v9 = vmul.f32 %v3163_v19, %v3163_v19  ;;  %v5590_v59 = vld [vmem:[#allocation45_spill] sm:$0xff] }
 0x21a   : > { %v2366_v31 = vpop.f32.mrf.mxu2  ;;  %v4017_v19 = vld [vmem:[%s4353_s19 + $0x16a] sm:$0xff] }
 0x21b   : > { %v3360_v51 = vadd.f32 %v3359_v13, %v3329_v9  ;;  %v2480_v54 = vadd.f32 %v2366_v31, %v2135_v17  ;;  %v2708_v27 = vpop.f32.mrf.mxu3  ;;  %v2024_v21 = vpop.f32.mrf.mxu1  ;;  %v5594_v17 = vld [vmem:[#allocation48_spill] sm:$0xff] }
 0x21c   : > { %v2136_v58 = vadd.f32 %v2024_v21, %v5590_v59 }
 0x21d   : > { %v2822_v60 = vadd.f32 %v2708_v27, %v2480_v54 }
 0x21e   : > { %v3053_v28 = vpop.f32.mrf.mxu0  ;;  %3851 = vmatmul.msk.f32.gmra.mxu1 %vm233_vm1, %v4960_v45  ;;  %v3818_v45 = vld [vmem:[%s4353_s19 + $0x142] sm:$0xff] }
 0x21f   : > { %v3164_v16 = vadd.f32 %v3050_v0, %v2822_v60  ;;  %3917 = vmatmul.msk.f32.gmra.mxu2 %vm233_vm1, %v3883_v32  ;;  %v3820_v60 = vld [vmem:[%s4353_s19 + $0x15a] sm:$0xff] }
 0x220   : > { %3983 = vmatmul.msk.f32.gmra.mxu3 %vm233_vm1, %v4963_v14 }
 0x221   : > { %4049 = vmatmul.msk.f32.gmra.mxu0 %vm233_vm1, %v4994_v1  ;;  %3260 = vst [vmem:[%s5252_s7 + $0x38] sm:$0xff] %v3164_v16  ;;  %v3291_v24 = vadd.f32 %v3290_v46, %v3164_v16  ;;  %v3330_v3 = vmul.f32 %v3164_v16, %v3164_v16  ;;  %v5591_v1 = vld [vmem:[#allocation47_spill] sm:$0xff] }
 0x222   : > { %v2369_v47 = vpop.f32.mrf.mxu2 }
 0x223   : > { %v3361_v48 = vadd.f32 %v3360_v51, %v3330_v3  ;;  %v2481_v63 = vadd.f32 %v2369_v47, %v2136_v58  ;;  %v2711_v4 = vpop.f32.mrf.mxu3  ;;  %v2027_v12 = vpop.f32.mrf.mxu1  ;;  %v4018_v58 = vld [vmem:[%s4353_s19 + $0x172] sm:$0xff] }
 0x224   : > { %v2137_v26 = vadd.f32 %v2027_v12, %v5593_v49 }
 0x225   : > { %v2823_v44 = vadd.f32 %v2711_v4, %v2481_v63 }
 0x226   : > { %v3056_v42 = vpop.f32.mrf.mxu0  ;;  %3852 = vmatmul.msk.f32.gmra.mxu1 %vm233_vm1, %v3818_v45 }
 0x227   : > { %v3165_v14 = vadd.f32 %v3053_v28, %v2823_v44  ;;  %3918 = vmatmul.msk.f32.gmra.mxu2 %vm233_vm1, %v3884_v62  ;;  %v3886_v28 = vld [vmem:[%s4353_s19 + $0x170] sm:$0xff]  ;;  %v3887_v44 = vld [vmem:[%s4353_s19 + $0x180] sm:$0xff] }
 0x228   : > { %3984 = vmatmul.msk.f32.gmra.mxu3 %vm233_vm1, %v5591_v1  ;;  %v4019_v1 = vld [vmem:[%s4353_s19 + $0x182] sm:$0xff] }
 0x229   : > { %4050 = vmatmul.msk.f32.gmra.mxu0 %vm233_vm1, %v5592_v40  ;;  %3261 = vst [vmem:[%s5252_s7 + $0x40] sm:$0xff] %v3165_v14  ;;  %v3292_v10 = vadd.f32 %v3291_v24, %v3165_v14  ;;  %v3331_v56 = vmul.f32 %v3165_v14, %v3165_v14  ;;  %v5595_v24 = vld [vmem:[#allocation49_spill] sm:$0xff] }
 0x22a   : > { %v2372_v39 = vpop.f32.mrf.mxu2 }
 0x22b   : > { %v3362_v41 = vadd.f32 %v3361_v48, %v3331_v56  ;;  %v2482_v13 = vadd.f32 %v2372_v39, %v2137_v26  ;;  %v2714_v11 = vpop.f32.mrf.mxu3  ;;  %v2030_v57 = vpop.f32.mrf.mxu1 }
 0x22c   : > { %v2138_v46 = vadd.f32 %v2030_v57, %v5594_v17  ;;  %v3888_v57 = vld [vmem:[%s4353_s19 + $0x188] sm:$0xff] }
 0x22d   : > { %v2824_v33 = vadd.f32 %v2714_v11, %v2482_v13 }
 0x22e   : > { %v3059_v0 = vpop.f32.mrf.mxu0  ;;  %3853 = vmatmul.msk.f32.gmra.mxu1 %vm233_vm1, %v3819_v61 }
 0x22f   : > { %v3166_v6 = vadd.f32 %v3056_v42, %v2824_v33  ;;  %3919 = vmatmul.msk.f32.gmra.mxu2 %vm233_vm1, %v3885_v8  ;;  %v3954_v8 = vld [vmem:[%s4353_s19 + $0x189] sm:$0xff] }
 0x230   : > { %3985 = vmatmul.msk.f32.gmra.mxu3 %vm233_vm1, %v4997_v22 }
 0x231   : > { %4051 = vmatmul.msk.f32.gmra.mxu0 %vm233_vm1, %v4017_v19  ;;  %3262 = vst [vmem:[%s5252_s7 + $0x48] sm:$0xff] %v3166_v6  ;;  %v3293_v9 = vadd.f32 %v3292_v10, %v3166_v6  ;;  %v3332_v31 = vmul.f32 %v3166_v6, %v3166_v6 }
 0x232   : > { %v2375_v51 = vpop.f32.mrf.mxu2 }
 0x233   : > { %v3363_v54 = vadd.f32 %v3362_v41, %v3332_v31  ;;  %v2483_v27 = vadd.f32 %v2375_v51, %v2138_v46  ;;  %v2717_v21 = vpop.f32.mrf.mxu3  ;;  %v2033_v32 = vpop.f32.mrf.mxu1 }
 0x234   : > { %v2139_v3 = vadd.f32 %v2033_v32, %v5595_v24 }
 0x235   : > { %v2825_v16 = vadd.f32 %v2717_v21, %v2483_v27  ;;  %v3889_v21 = vld [vmem:[%s4353_s19 + $0x198] sm:$0xff] }
 0x236   : > { %v3062_v59 = vpop.f32.mrf.mxu0  ;;  %3854 = vmatmul.msk.f32.gmra.mxu1 %vm233_vm1, %v3820_v60  ;;  %v3955_v60 = vld [vmem:[%s4353_s19 + $0x199] sm:$0xff] }
 0x237   : > { %v3167_v22 = vadd.f32 %v3059_v0, %v2825_v16  ;;  %3920 = vmatmul.msk.f32.gmra.mxu2 %vm233_vm1, %v3886_v28  ;;  %v4020_v0 = vld [vmem:[%s4353_s19 + $0x18a] sm:$0xff]  ;;  %v4021_v16 = vld [vmem:[%s4353_s19 + $0x19a] sm:$0xff] }
 0x238   : > { %3986 = vmatmul.msk.f32.gmra.mxu3 %vm233_vm1, %v5014_v29  ;;  %v5596_v29 = vld [vmem:[#allocation51_spill] sm:$0xff] }
 0x239   : > { %4052 = vmatmul.msk.f32.gmra.mxu0 %vm233_vm1, %v4018_v58  ;;  %3263 = vst [vmem:[%s5252_s7 + $0x50] sm:$0xff] %v3167_v22  ;;  %v3294_v47 = vadd.f32 %v3293_v9, %v3167_v22  ;;  %v3333_v48 = vmul.f32 %v3167_v22, %v3167_v22 }
 0x23a   : > { %v2378_v63 = vpop.f32.mrf.mxu2 }
 0x23b   : > { %v3364_v4 = vadd.f32 %v3363_v54, %v3333_v48  ;;  %v2484_v12 = vadd.f32 %v2378_v63, %v2139_v3  ;;  %v2720_v45 = vpop.f32.mrf.mxu3  ;;  %v2036_v62 = vpop.f32.mrf.mxu1 }
 0x23c   : > { %v2140_v49 = vadd.f32 %v2036_v62, %v5596_v29  ;;  %v3956_v62 = vld [vmem:[%s4353_s19 + $0x1a1] sm:$0xff] }
 0x23d   : > { %v2826_v42 = vadd.f32 %v2720_v45, %v2484_v12  ;;  %v3890_v12 = vld [vmem:[%s4353_s19 + $0x1a0] sm:$0xff] }
 0x23e   : > { %v3065_v14 = vpop.f32.mrf.mxu0  ;;  %3855 = vmatmul.msk.f32.gmra.mxu1 %vm233_vm1, %v4017_v19  ;;  %v5597_v19 = vld [vmem:[#allocation52_spill] sm:$0xff] }
 0x23f   : > { %v3168_v40 = vadd.f32 %v3062_v59, %v2826_v42  ;;  %3921 = vmatmul.msk.f32.gmra.mxu2 %vm233_vm1, %v3887_v44  ;;  %v4022_v42 = vld [vmem:[%s4353_s19 + $0x1a2] sm:$0xff]  ;;  %s3417_s19 = sshll.u32 %s3414_s11, 4  ;;  %s3418_s19 = int_to_ptr.hbm [resolvable:$true] %s3417_s19 }
 0x240   : > { %3987 = vmatmul.msk.f32.gmra.mxu3 %vm233_vm1, %v5030_v37  ;;  %s4148_s23 = sshra.s32 %s3418_s19, 4  ;;  %s4149_s23 = int_to_ptr.hbm [resolvable:$true] %s4148_s23 }
 0x241   : > { %4053 = vmatmul.msk.f32.gmra.mxu0 %vm233_vm1, %v4019_v1  ;;  %3264 = vst [vmem:[%s5252_s7 + $0x58] sm:$0xff] %v3168_v40  ;;  %v3295_v26 = vadd.f32 %v3294_v47, %v3168_v40  ;;  %v3334_v10 = vmul.f32 %v3168_v40, %v3168_v40  ;;  %s4150_s26 = scalar_lea.hbm %s4149_s23, 256  ;;  %p4155_p1 = scmp.lt.s32.totalorder %s4149_s23, %s5480_s2 }
 0x242   : > { %v2381_v56 = vpop.f32.mrf.mxu2  ;;  %p4151_p12 = scmp.ne.s32.totalorder %s4149_s23, %s4150_s26  ;;  %p4156_p2 = scmp.lt.s32.totalorder %s4154_s29, %s4150_s26 }
 0x243   : > { %v3365_v39 = vadd.f32 %v3364_v4, %v3334_v10  ;;  %v2485_v41 = vadd.f32 %v2381_v56, %v2140_v49  ;;  %v2723_v13 = vpop.f32.mrf.mxu3  ;;  %v2039_v11 = vpop.f32.mrf.mxu1 }
 0x244   : > { %v2141_v6 = vadd.f32 %v2039_v11, %v5597_v19  ;;  %p4152_p13 = pnand %p4151_p12, %p4310_p4  ;;  %p4157_p3 = por %p4156_p2, %p4155_p1 }
 0x245   : > { %v2827_v61 = vadd.f32 %v2723_v13, %v2485_v41 }
 0x246   : > { %v3068_v33 = vpop.f32.mrf.mxu0  ;;  %3856 = vmatmul.msk.f32.gmra.mxu1 %vm233_vm1, %v4018_v58  ;;  %p4153_p0 = pneg %p4152_p13 }
 0x247   : > { %v3169_v37 = vadd.f32 %v3065_v14, %v2827_v61  ;;  %3922 = vmatmul.msk.f32.gmra.mxu2 %vm233_vm1, %v3888_v57 }
 0x248   : > { %3988 = vmatmul.msk.f32.gmra.mxu3 %vm233_vm1, %v3954_v8  ;;  %p4158_p5 = pnand %p4157_p3, %p4153_p0 }
 0x249   : > { %4054 = vmatmul.msk.f32.gmra.mxu0 %vm233_vm1, %v4020_v0  ;;  %3265 = vst [vmem:[%s5252_s7 + $0x60] sm:$0xff] %v3169_v37  ;;  %v3296_v17 = vadd.f32 %v3295_v26, %v3169_v37  ;;  %v3335_v46 = vmul.f32 %v3169_v37, %v3169_v37 }
 0x24a   : > { %v2384_v9 = vpop.f32.mrf.mxu2 }
 0x24b   : > { %v3366_v31 = vadd.f32 %v3365_v39, %v3335_v46  ;;  %v2486_v51 = vadd.f32 %v2384_v9, %v2141_v6  ;;  %v2726_v54 = vpop.f32.mrf.mxu3  ;;  %v2042_v27 = vpop.f32.mrf.mxu1 }
 0x24c   : > { %v2142_v58 = vadd.f32 %v2042_v27, %v5044_v18 }
 0x24d   : > { %v2828_v32 = vadd.f32 %v2726_v54, %v2486_v51 }
 0x24e   : > { %v3071_v28 = vpop.f32.mrf.mxu0  ;;  %3857 = vmatmul.msk.f32.gmra.mxu1 %vm233_vm1, %v4019_v1 }
 0x24f   : > { %v3170_v59 = vadd.f32 %v3068_v33, %v2828_v32  ;;  %3923 = vmatmul.msk.f32.gmra.mxu2 %vm233_vm1, %v3889_v21 }
 0x250   : > { %3989 = vmatmul.msk.f32.gmra.mxu3 %vm233_vm1, %v3955_v60 }
 0x251   : > { %4055 = vmatmul.msk.f32.gmra.mxu0 %vm233_vm1, %v4021_v16  ;;  %3266 = vst [vmem:[%s5252_s7 + $0x68] sm:$0xff] %v3170_v59  ;;  %v3297_v22 = vadd.f32 %v3296_v17, %v3170_v59  ;;  %v3336_v24 = vmul.f32 %v3170_v59, %v3170_v59 }
 0x252   : > { %v2387_v3 = vpop.f32.mrf.mxu2 }
 0x253   : > { %v3367_v47 = vadd.f32 %v3366_v31, %v3336_v24  ;;  %v2487_v48 = vadd.f32 %v2387_v3, %v2142_v58  ;;  %v2729_v63 = vpop.f32.mrf.mxu3  ;;  %v2045_v4 = vpop.f32.mrf.mxu1 }
 0x254   : > { %v2143_v18 = vadd.f32 %v2045_v4, %v5052_v35 }
 0x255   : > { %v2829_v45 = vadd.f32 %v2729_v63, %v2487_v48 }
 0x256   : > { %v3074_v44 = vpop.f32.mrf.mxu0  ;;  %3858 = vmatmul.msk.f32.gmra.mxu1 %vm233_vm1, %v4020_v0 }
 0x257   : > { %v3171_v14 = vadd.f32 %v3071_v28, %v2829_v45  ;;  %3924 = vmatmul.msk.f32.gmra.mxu2 %vm233_vm1, %v3890_v12 }
 0x258   : > { %3990 = vmatmul.msk.f32.gmra.mxu3 %vm233_vm1, %v3956_v62 }
 0x259   : > { %4056 = vmatmul.msk.f32.gmra.mxu0 %vm233_vm1, %v4022_v42  ;;  %3267 = vst [vmem:[%s5252_s7 + $0x70] sm:$0xff] %v3171_v14  ;;  %v3298_v1 = vadd.f32 %v3297_v22, %v3171_v14  ;;  %v3337_v40 = vmul.f32 %v3171_v14, %v3171_v14 }
 0x25a   : > { %v2390_v29 = vpop.f32.mrf.mxu2 }
 0x25b   : > { %v3368_v49 = vadd.f32 %v3367_v47, %v3337_v40  ;;  %v2488_v26 = vadd.f32 %v2390_v29, %v2143_v18  ;;  %v2732_v10 = vpop.f32.mrf.mxu3  ;;  %v2048_v56 = vpop.f32.mrf.mxu1 }
 0x25c   : > { %v2144_v11 = vadd.f32 %v2048_v56, %v5063_v38 }
 0x25d   : > { %v2830_v39 = vadd.f32 %v2732_v10, %v2488_v26 }
 0x25e   : > { %v3077_v41 = vpop.f32.mrf.mxu0 }
 0x25f   : > { %v3172_v13 = vadd.f32 %v3074_v44, %v2830_v39 }
 0x261   : > { %3268 = vst [vmem:[%s5252_s7 + $0x78] sm:$0xff] %v3172_v13  ;;  %v3299_v57 = vadd.f32 %v3298_v1, %v3172_v13  ;;  %v3338_v61 = vmul.f32 %v3172_v13, %v3172_v13 }
 0x262   : > { %v2393_v8 = vpop.f32.mrf.mxu2 }
 0x263   : > { %v3369_v33 = vadd.f32 %v3368_v49, %v3338_v61  ;;  %v2489_v35 = vadd.f32 %v2393_v8, %v2144_v11  ;;  %v2735_v0 = vpop.f32.mrf.mxu3  ;;  %v2051_v37 = vpop.f32.mrf.mxu1 }
 0x264   : > { %v2145_v46 = vadd.f32 %v2051_v37, %v5074_v23 }
 0x265   : > { %v2831_v19 = vadd.f32 %v2735_v0, %v2489_v35 }
 0x266   : > { %v3080_v6 = vpop.f32.mrf.mxu0 }
 0x267   : > { %v3173_v17 = vadd.f32 %v3077_v41, %v2831_v19 }
 0x269   : > { %3269 = vst [vmem:[%s5252_s7 + $0x80] sm:$0xff] %v3173_v17  ;;  %v3300_v9 = vadd.f32 %v3299_v57, %v3173_v17  ;;  %v3339_v31 = vmul.f32 %v3173_v17, %v3173_v17 }
 0x26a   : > { %v2396_v51 = vpop.f32.mrf.mxu2 }
 0x26b   : > { %v3370_v54 = vadd.f32 %v3369_v33, %v3339_v31  ;;  %v2490_v38 = vadd.f32 %v2396_v51, %v2145_v46  ;;  %v2738_v27 = vpop.f32.mrf.mxu3  ;;  %v2054_v21 = vpop.f32.mrf.mxu1 }
 0x26c   : > { %v2146_v16 = vadd.f32 %v2054_v21, %v5085_v20 }
 0x26d   : > { %v2832_v32 = vadd.f32 %v2738_v27, %v2490_v38 }
 0x26e   : > { %v3083_v60 = vpop.f32.mrf.mxu0 }
 0x26f   : > { %v3174_v28 = vadd.f32 %v3080_v6, %v2832_v32 }
 0x271   : > { %3270 = vst [vmem:[%s5252_s7 + $0x88] sm:$0xff] %v3174_v28  ;;  %v3301_v59 = vadd.f32 %v3300_v9, %v3174_v28  ;;  %v3340_v58 = vmul.f32 %v3174_v28, %v3174_v28 }
 0x272   : > { %v2399_v22 = vpop.f32.mrf.mxu2 }
 0x273   : > { %v3371_v24 = vadd.f32 %v3370_v54, %v3340_v58  ;;  %v2491_v23 = vadd.f32 %v2399_v22, %v2146_v16  ;;  %v2741_v3 = vpop.f32.mrf.mxu3  ;;  %v2057_v47 = vpop.f32.mrf.mxu1 }
 0x274   : > { %v2147_v12 = vadd.f32 %v2057_v47, %v5097_v53 }
 0x275   : > { %v2833_v48 = vadd.f32 %v2741_v3, %v2491_v23 }
 0x276   : > { %v3086_v63 = vpop.f32.mrf.mxu0 }
 0x277   : > { %v3175_v4 = vadd.f32 %v3083_v60, %v2833_v48 }
 0x279   : > { %3271 = vst [vmem:[%s5252_s7 + $0x90] sm:$0xff] %v3175_v4  ;;  %v3302_v45 = vadd.f32 %v3301_v59, %v3175_v4  ;;  %v3341_v62 = vmul.f32 %v3175_v4, %v3175_v4 }
 0x27a   : > { %v2402_v44 = vpop.f32.mrf.mxu2 }
 0x27b   : > { %v3372_v42 = vadd.f32 %v3371_v24, %v3341_v62  ;;  %v2492_v20 = vadd.f32 %v2402_v44, %v2147_v12  ;;  %v2744_v14 = vpop.f32.mrf.mxu3  ;;  %v2060_v18 = vpop.f32.mrf.mxu1 }
 0x27c   : > { %v2148_v49 = vadd.f32 %v2060_v18, %v5108_v43 }
 0x27d   : > { %v2834_v1 = vadd.f32 %v2744_v14, %v2492_v20 }
 0x27e   : > { %v3089_v40 = vpop.f32.mrf.mxu0 }
 0x27f   : > { %v3176_v29 = vadd.f32 %v3086_v63, %v2834_v1 }
 0x281   : > { %3272 = vst [vmem:[%s5252_s7 + $0x98] sm:$0xff] %v3176_v29  ;;  %v3303_v26 = vadd.f32 %v3302_v45, %v3176_v29  ;;  %v3342_v10 = vmul.f32 %v3176_v29, %v3176_v29 }
 0x282   : > { %v2405_v56 = vpop.f32.mrf.mxu2 }
 0x283   : > { %v3373_v39 = vadd.f32 %v3372_v42, %v3342_v10  ;;  %v2493_v53 = vadd.f32 %v2405_v56, %v2148_v49  ;;  %v2747_v41 = vpop.f32.mrf.mxu3  ;;  %v2063_v13 = vpop.f32.mrf.mxu1 }
 0x284   : > { %v2149_v8 = vadd.f32 %v2063_v13, %v5119_v36 }
 0x285   : > { %v2835_v11 = vadd.f32 %v2747_v41, %v2493_v53 }
 0x286   : > { %v3092_v57 = vpop.f32.mrf.mxu0 }
 0x287   : > { %v3177_v61 = vadd.f32 %v3089_v40, %v2835_v11 }
 0x289   : > { %3273 = vst [vmem:[%s5252_s7 + $0xa0] sm:$0xff] %v3177_v61  ;;  %v3304_v33 = vadd.f32 %v3303_v26, %v3177_v61  ;;  %v3343_v35 = vmul.f32 %v3177_v61, %v3177_v61 }
 0x28a   : > { %v2408_v0 = vpop.f32.mrf.mxu2 }
 0x28b   : > { %v3374_v37 = vadd.f32 %v3373_v39, %v3343_v35  ;;  %v2494_v43 = vadd.f32 %v2408_v0, %v2149_v8  ;;  %v2750_v19 = vpop.f32.mrf.mxu3  ;;  %v2066_v6 = vpop.f32.mrf.mxu1 }
 0x28c   : > { %v2150_v31 = vadd.f32 %v2066_v6, %v5130_v30 }
 0x28d   : > { %v2836_v17 = vadd.f32 %v2750_v19, %v2494_v43 }
 0x28e   : > { %v3095_v46 = vpop.f32.mrf.mxu0 }
 0x28f   : > { %v3178_v9 = vadd.f32 %v3092_v57, %v2836_v17 }
 0x291   : > { %3274 = vst [vmem:[%s5252_s7 + $0xa8] sm:$0xff] %v3178_v9  ;;  %v3305_v51 = vadd.f32 %v3304_v33, %v3178_v9  ;;  %v3344_v54 = vmul.f32 %v3178_v9, %v3178_v9 }
 0x292   : > { %v2411_v38 = vpop.f32.mrf.mxu2 }
 0x293   : > { %v3375_v27 = vadd.f32 %v3374_v37, %v3344_v54  ;;  %v2495_v36 = vadd.f32 %v2411_v38, %v2150_v31  ;;  %v2753_v21 = vpop.f32.mrf.mxu3  ;;  %v2069_v32 = vpop.f32.mrf.mxu1 }
 0x294   : > { %v2151_v59 = vadd.f32 %v2069_v32, %v5141_v50 }
 0x295   : > { %v2837_v60 = vadd.f32 %v2753_v21, %v2495_v36 }
 0x296   : > { %v3098_v28 = vpop.f32.mrf.mxu0 }
 0x297   : > { %v3179_v16 = vadd.f32 %v3095_v46, %v2837_v60 }
 0x299   : > { %3275 = vst [vmem:[%s5252_s7 + $0xb0] sm:$0xff] %v3179_v16  ;;  %v3306_v58 = vadd.f32 %v3305_v51, %v3179_v16  ;;  %v3345_v22 = vmul.f32 %v3179_v16, %v3179_v16 }
 0x29a   : > { %v2414_v24 = vpop.f32.mrf.mxu2 }
 0x29b   : > { %v3376_v23 = vadd.f32 %v3375_v27, %v3345_v22  ;;  %v2496_v30 = vadd.f32 %v2414_v24, %v2151_v59  ;;  %v2756_v3 = vpop.f32.mrf.mxu3  ;;  %v2072_v47 = vpop.f32.mrf.mxu1 }
 0x29c   : > { %v2152_v12 = vadd.f32 %v2072_v47, %v5152_v7 }
 0x29d   : > { %v2838_v48 = vadd.f32 %v2756_v3, %v2496_v30 }
 0x29e   : > { %v3101_v63 = vpop.f32.mrf.mxu0 }
 0x29f   : > { %v3180_v4 = vadd.f32 %v3098_v28, %v2838_v48 }
 0x2a1   : > { %3276 = vst [vmem:[%s5252_s7 + $0xb8] sm:$0xff] %v3180_v4  ;;  %v3307_v45 = vadd.f32 %v3306_v58, %v3180_v4  ;;  %v3346_v62 = vmul.f32 %v3180_v4, %v3180_v4 }
 0x2a2   : > { %v2417_v44 = vpop.f32.mrf.mxu2 }
 0x2a3   : > { %v3377_v42 = vadd.f32 %v3376_v23, %v3346_v62  ;;  %v2497_v50 = vadd.f32 %v2417_v44, %v2152_v12  ;;  %v2759_v20 = vpop.f32.mrf.mxu3  ;;  %v2075_v14 = vpop.f32.mrf.mxu1 }
 0x2a4   : > { %v2153_v29 = vadd.f32 %v2075_v14, %v5163_v15 }
 0x2a5   : > { %v2839_v18 = vadd.f32 %v2759_v20, %v2497_v50 }
 0x2a6   : > { %v3104_v1 = vpop.f32.mrf.mxu0 }
 0x2a7   : > { %v3181_v40 = vadd.f32 %v3101_v63, %v2839_v18 }
 0x2a9   : > { %3277 = vst [vmem:[%s5252_s7 + $0xc0] sm:$0xff] %v3181_v40  ;;  %v3308_v49 = vadd.f32 %v3307_v45, %v3181_v40  ;;  %v3347_v26 = vmul.f32 %v3181_v40, %v3181_v40 }
 0x2aa   : > { %v2420_v10 = vpop.f32.mrf.mxu2 }
 0x2ab   : > { %v3378_v56 = vadd.f32 %v3377_v42, %v3347_v26  ;;  %v2498_v7 = vadd.f32 %v2420_v10, %v2153_v29  ;;  %v2762_v39 = vpop.f32.mrf.mxu3  ;;  %v2078_v53 = vpop.f32.mrf.mxu1 }
 0x2ac   : > { %v2154_v57 = vadd.f32 %v2078_v53, %v5174_v34 }
 0x2ad   : > { %v2840_v41 = vadd.f32 %v2762_v39, %v2498_v7 }
 0x2ae   : > { %v3107_v13 = vpop.f32.mrf.mxu0 }
 0x2af   : > { %v3182_v11 = vadd.f32 %v3104_v1, %v2840_v41 }
 0x2b1   : > { %3278 = vst [vmem:[%s5252_s7 + $0xc8] sm:$0xff] %v3182_v11  ;;  %v3309_v61 = vadd.f32 %v3308_v49, %v3182_v11  ;;  %v3348_v8 = vmul.f32 %v3182_v11, %v3182_v11 }
 0x2b2   : > { %v2423_v33 = vpop.f32.mrf.mxu2 }
 0x2b3   : > { %v3379_v35 = vadd.f32 %v3378_v56, %v3348_v8  ;;  %v2499_v15 = vadd.f32 %v2423_v33, %v2154_v57  ;;  %v2765_v0 = vpop.f32.mrf.mxu3  ;;  %v2081_v37 = vpop.f32.mrf.mxu1 }
 0x2b4   : > { %v2155_v17 = vadd.f32 %v2081_v37, %v5185_v25 }
 0x2b5   : > { %v2841_v43 = vadd.f32 %v2765_v0, %v2499_v15 }
 0x2b6   : > { %v3110_v19 = vpop.f32.mrf.mxu0 }
 0x2b7   : > { %v3183_v6 = vadd.f32 %v3107_v13, %v2841_v43 }
 0x2b9   : > { %3279 = vst [vmem:[%s5252_s7 + $0xd0] sm:$0xff] %v3183_v6  ;;  %v3310_v46 = vadd.f32 %v3309_v61, %v3183_v6  ;;  %v3349_v9 = vmul.f32 %v3183_v6, %v3183_v6 }
 0x2ba   : > { %v2426_v31 = vpop.f32.mrf.mxu2 }
 0x2bb   : > { %v3380_v51 = vadd.f32 %v3379_v35, %v3349_v9  ;;  %v2500_v34 = vadd.f32 %v2426_v31, %v2155_v17  ;;  %v2768_v54 = vpop.f32.mrf.mxu3  ;;  %v2084_v38 = vpop.f32.mrf.mxu1 }
 0x2bc   : > { %v2156_v32 = vadd.f32 %v2084_v38, %v5196_v5 }
 0x2bd   : > { %v2842_v27 = vadd.f32 %v2768_v54, %v2500_v34 }
 0x2be   : > { %v3113_v36 = vpop.f32.mrf.mxu0 }
 0x2bf   : > { %v3184_v21 = vadd.f32 %v3110_v19, %v2842_v27 }
 0x2c1   : > { %3280 = vst [vmem:[%s5252_s7 + $0xd8] sm:$0xff] %v3184_v21  ;;  %v3311_v60 = vadd.f32 %v3310_v46, %v3184_v21  ;;  %v3350_v28 = vmul.f32 %v3184_v21, %v3184_v21 }
 0x2c2   : > { %v2429_v16 = vpop.f32.mrf.mxu2 }
 0x2c3   : > { %v3381_v59 = vadd.f32 %v3380_v51, %v3350_v28  ;;  %v2501_v25 = vadd.f32 %v2429_v16, %v2156_v32  ;;  %v2771_v58 = vpop.f32.mrf.mxu3  ;;  %v2087_v22 = vpop.f32.mrf.mxu1 }
 0x2c4   : > { %v2157_v3 = vadd.f32 %v2087_v22, %v5207_v55 }
 0x2c5   : > { %v2843_v24 = vadd.f32 %v2771_v58, %v2501_v25 }
 0x2c6   : > { %v3116_v30 = vpop.f32.mrf.mxu0 }
 0x2c7   : > { %v3185_v23 = vadd.f32 %v3113_v36, %v2843_v24 }
 0x2c9   : > { %3281 = vst [vmem:[%s5252_s7 + $0xe0] sm:$0xff] %v3185_v23  ;;  %v3312_v47 = vadd.f32 %v3311_v60, %v3185_v23  ;;  %v3351_v48 = vmul.f32 %v3185_v23, %v3185_v23 }
 0x2ca   : > { %v2432_v63 = vpop.f32.mrf.mxu2 }
 0x2cb   : > { %v3382_v4 = vadd.f32 %v3381_v59, %v3351_v48  ;;  %v2502_v5 = vadd.f32 %v2432_v63, %v2157_v3  ;;  %v2774_v12 = vpop.f32.mrf.mxu3  ;;  %v2090_v45 = vpop.f32.mrf.mxu1 }
 0x2cc   : > { %v2158_v42 = vadd.f32 %v2090_v45, %v5218_v52 }
 0x2cd   : > { %v2844_v62 = vadd.f32 %v2774_v12, %v2502_v5 }
 0x2ce   : > { %v3119_v18 = vpop.f32.mrf.mxu0 }
 0x2cf   : > { %v3186_v44 = vadd.f32 %v3116_v30, %v2844_v62 }
 0x2d1   : > { %3282 = vst [vmem:[%s5252_s7 + $0xe8] sm:$0xff] %v3186_v44  ;;  %v3313_v50 = vadd.f32 %v3312_v47, %v3186_v44  ;;  %v3352_v20 = vmul.f32 %v3186_v44, %v3186_v44 }
 0x2d2   : > { %v2435_v14 = vpop.f32.mrf.mxu2 }
 0x2d3   : > { %v3383_v55 = vadd.f32 %v3382_v4, %v3352_v20  ;;  %v2503_v1 = vadd.f32 %v2435_v14, %v2158_v42  ;;  %v2777_v40 = vpop.f32.mrf.mxu3  ;;  %v2093_v49 = vpop.f32.mrf.mxu1 }
 0x2d4   : > { %v2159_v52 = vadd.f32 %v2093_v49, %v5229_v2 }
 0x2d5   : > { %v2845_v29 = vadd.f32 %v2777_v40, %v2503_v1 }
 0x2d6   : > { %v3122_v13 = vpop.f32.mrf.mxu0 }
 0x2d7   : > { %v3187_v26 = vadd.f32 %v3119_v18, %v2845_v29 }
 0x2d9   : > { %3283 = vst [vmem:[%s5252_s7 + $0xf0] sm:$0xff] %v3187_v26  ;;  %v3314_v10 = vadd.f32 %v3313_v50, %v3187_v26  ;;  %v3353_v56 = vmul.f32 %v3187_v26, %v3187_v26 }
 0x2da   : > { %v2438_v7 = vpop.f32.mrf.mxu2 }
 0x2db   : > { %v3384_v39 = vadd.f32 %v3383_v55, %v3353_v56  ;;  %v2504_v53 = vadd.f32 %v2438_v7, %v2159_v52  ;;  %v2780_v41 = vpop.f32.mrf.mxu3 }
 0x2dd   : > { %v2846_v11 = vadd.f32 %v2780_v41, %v2504_v53 }
 0x2df   : > { %v3188_v57 = vadd.f32 %v3122_v13, %v2846_v11 }
 0x2e1   : > { %3284 = vst [vmem:[%s5252_s7 + $0xf8] sm:$0xff] %v3188_v57  ;;  %v3315_v61 = vadd.f32 %v3314_v10, %v3188_v57  ;;  %v3354_v8 = vmul.f32 %v3188_v57, %v3188_v57 }
 0x2e2   : > { %4161 = shalt.err (!%p4158_p5)
}
 0x2e3   : > { %s4246_s6 = smov 128   ;;  %s4247_s7 = smov 8   ;;  %v3316_v2 = vrot.slane %v3315_v61, 4  ;;  %v3385_v33 = vadd.f32 %v3384_v39, %v3354_v8 }
 0x2e4   : > { %4070 = dma.vmem_to_hbm [thread:$0]  (%p4310_p4), %s3416_s18, 4096, %s3418_s19, %s3395_s21, %s4246_s6, %s4246_s6, %s4247_s7  }
 0x2e5   : > { %v3317_v35 = vadd.f32 %v3316_v2, %v3315_v61  ;;  %v3386_v15 = vrot.slane %v3385_v33, 4  ;;  %s3558_s8 = sshll.u32 %s5237_s5, 1  ;;  %s4062_s9 = sshll.u32 %s4236_s15, 1 }
 0x2e6   : > { %s3431_s23 = scalar_lea.hbm %s5481_s3, %s4062_s9  ;;  %s190_s26 = scalar_lea.vmem [#allocation5], %s3558_s8 }
 0x2e7   : > { %v3318_v0 = vrot.slane %v3317_v35, 2  ;;  %v3387_v37 = vadd.f32 %v3386_v15, %v3385_v33  ;;  %s3432_s18 = sshll.u32 %s190_s26, 4  ;;  %s3434_s19 = sshll.u32 %s3431_s23, 4  ;;  %s3433_s18 = int_to_ptr.vmem [resolvable:$true] %s3432_s18  ;;  %s3435_s19 = int_to_ptr.hbm [resolvable:$true] %s3434_s19 }
 0x2e8   : > { %s3400_s15 = scalar_lea.sflag [#allocation6], %s5237_s5  ;;  %s4176_s21 = sshra.s32 %s3435_s19, 4  ;;  %s4177_s21 = int_to_ptr.hbm [resolvable:$true] %s4176_s21 }
 0x2e9   : > { %v3319_v43 = vadd.f32 %v3318_v0, %v3317_v35  ;;  %v3388_v19 = vrot.slane %v3387_v37, 2  ;;  %s4178_s27 = scalar_lea.hbm %s4177_s21, 2  ;;  %s4182_s30 = scalar_lea.hbm %s5481_s3, 4 }
 0x2ea   : > { %p4179_p6 = scmp.ne.s32.totalorder %s4177_s21, %s4178_s27  ;;  %p4183_p10 = scmp.lt.s32.totalorder %s4177_s21, %s5481_s3 }
 0x2eb   : > { %v3320_v6 = vrot.slane %v3319_v43, 1  ;;  %v3389_v17 = vadd.f32 %v3388_v19, %v3387_v37  ;;  %p4184_p11 = scmp.lt.s32.totalorder %s4182_s30, %s4178_s27 }
 0x2ec   : > { %p4180_p7 = pnand %p4179_p6, %p4310_p4 }
 0x2ed   : > { %v3321_v46 = vadd.f32 %v3320_v6, %v3319_v43  ;;  %v3390_v9 = vrot.slane %v3389_v17, 1  ;;  %p4185_p12 = por %p4184_p11, %p4183_p10 }
 0x2ee   : > { %p4181_p9 = pneg %p4180_p7 }
 0x2ef   : > { %v3391_v31 = vadd.f32 %v3390_v9, %v3389_v17  ;;  %3322 = vst [vmem:[%s190_s26] sm:$0x1] %v3321_v46 }
 0x2f0   : > { %p4186_p13 = pnand %p4185_p12, %p4181_p9 }
 0x2f1   : > { %4057 = vst [vmem:[%s190_s26 + $0x1] sm:$0x1] %v3391_v31 }
 0x2f2   : > { %4189 = shalt.err (!%p4186_p13)
}
 0x2f3   : > { %s4248_s5 = smov 16   ;;  %s4249_s7 = smov 1  }
 0x2f4   : > { %4071 = dma.vmem_to_hbm [thread:$0]  (%p4310_p4), %s3433_s18, 32, %s3435_s19, %s3400_s15, %s4248_s5, %s4248_s5, %s4249_s7  }
 0x2f5 PF: > { %p4081_p0 = scmp.ge.s32.totalorder %s4244_s17, 2  ;;  %s3449_s8 = sand.u32 1, %s4224_s12  }
 0x2f6   : > { %s3450_s9 = scalar_lea.sflag [#allocation4], %s3449_s8 }
 0x2f7   : > { %p4075_p1 = pnand %p4081_p0, %p4317_p8 }
 0x2f9   : > { %p4076_p2 = pneg %p4075_p1 }
 0x2fb   : > { %4215 = dma.done.wait (%p4076_p2), %s3450_s9, 4096  }
 0x2fc   : > { %4217 = vsyncadd (%p4076_p2), %s3450_s9, 4294963200  ;;  %s3460_s10 = scalar_lea.sflag [#allocation6], %s3449_s8 }
 0x2fd   : > { %4219 = dma.done.wait (%p4076_p2), %s3460_s10, 32  }
 0x2fe   : > { %4221 = vsyncadd (%p4076_p2), %s3460_s10, 4294967264  ;;  %s20_s17 = sadd.s32 1, %s4244_s17   ;;  %s5598_s12 = smov %s4228_s13 }
 0x2ff   : > { %p17_p3 = scmp.ge.s32.totalorder %s20_s17, 4   ;;  %s5599_s13 = smov %s4232_s14 }
 0x300   : > { %s5600_s14 = smov %s4323_s25  ;;  %s5601_s15 = smov %s4240_s16 }
 0x301   : > { %s5602_s16 = smov %s5604_s20  ;;  %19 = sbr.rel (!%p17_p3) target bundleno = 6 (0x6), region = 92 }
 0x306   :  { %3466 = vsyncpa [#allocation4], 1 }
 0x307   :  { %3468 = vsyncpa [#allocation4 + $0x1], 1 }
 0x308   :  { %3469 = vsyncpa [#allocation6], 1 }
 0x309   :  { %3471 = vsyncpa [#allocation6 + $0x1], 1 }

</bundles_post_ra>
